<compile_context>
chip_gen: v6e
topology: v6e:2x2x1
jax: 0.10.0
libtpu: 0.0.40
codegen_flags: <defaults>
</compile_context>

<pallas_src>
import functools
import math

import jax
import jax.numpy as jnp
from jax.experimental import pallas as pl
from jax.experimental.pallas import tpu as pltpu


# ----------------------------------------------------------------------------
# Shared epilogue (f32): + bias, optional GELU, + fused residual
# ----------------------------------------------------------------------------

def _epilogue(out, bias_ref, res_ref, activation):
    if bias_ref is not None:
        out = out + bias_ref[...].astype(jnp.float32)
    if activation == "gelu":
        c = jnp.float32(math.sqrt(2.0 / math.pi))
        out = 0.5 * out * (1.0 + jnp.tanh(c * (out + 0.044715 * out * out * out)))
    if res_ref is not None:
        out = out + res_ref[...].astype(jnp.float32)
    return out


# ----------------------------------------------------------------------------
# Pallas kernels
# ----------------------------------------------------------------------------

def _matmul_kernel(*refs, activation, has_bias, has_res, multi_k):
    """Tiled matmul: o = act(a @ w + bias) + residual  (bf16 in, f32 acc)."""
    it = iter(refs)
    a_ref = next(it)
    w_ref = next(it)
    bias_ref = next(it) if has_bias else None
    res_ref = next(it) if has_res else None
    o_ref = next(it)
    acc_ref = next(it) if multi_k else None

    if multi_k:
        @pl.when(pl.program_id(2) == 0)
        def _():
            acc_ref[...] = jnp.zeros_like(acc_ref)

        acc_ref[...] += jnp.dot(a_ref[...], w_ref[...],
                                preferred_element_type=jnp.float32)

        @pl.when(pl.program_id(2) == pl.num_programs(2) - 1)
        def _():
            o_ref[...] = _epilogue(acc_ref[...], bias_ref, res_ref,
                                   activation).astype(o_ref.dtype)
    else:
        # K fits in one tile: no accumulator scratch / init / finalize needed.
        out = jnp.dot(a_ref[...], w_ref[...], preferred_element_type=jnp.float32)
        o_ref[...] = _epilogue(out, bias_ref, res_ref,
                               activation).astype(o_ref.dtype)


def _ln_matmul_kernel(*refs, activation, has_bias):
    """Fused LayerNorm prologue + matmul: o = act(LN(x) @ w + bias).

    LayerNorm is computed once per row tile (at j == 0) into a bf16 VMEM
    scratch and reused for every output-column tile j.  The x block spans the
    full feature dim K, so mean/var are exact.
    """
    it = iter(refs)
    x_ref = next(it)
    g_ref = next(it)
    b_ref = next(it)
    w_ref = next(it)
    bias_ref = next(it) if has_bias else None
    o_ref = next(it)
    h_ref = next(it)          # (tm, K) bf16 scratch: cached LN(x)

    @pl.when(pl.program_id(1) == 0)
    def _():
        x = x_ref[...].astype(jnp.float32)
        mean = jnp.mean(x, axis=-1, keepdims=True)
        # One-pass variance: E[x^2] - mean^2 (clamped against rounding).
        var = jnp.maximum(jnp.mean(x * x, axis=-1, keepdims=True) - mean * mean,
                          jnp.float32(0.0))
        h = (x - mean) * jax.lax.rsqrt(var + 1e-5)
        h = h * g_ref[...].astype(jnp.float32) + b_ref[...].astype(jnp.float32)
        h_ref[...] = h.astype(h_ref.dtype)

    out = jnp.dot(h_ref[...], w_ref[...], preferred_element_type=jnp.float32)
    o_ref[...] = _epilogue(out, bias_ref, None, activation).astype(o_ref.dtype)


def _sharedqk_attn_proj_kernel(q_ref, kv_ref, wo_ref, bo_ref, res_ref, o_ref,
                               acc_ref, *, heads, dh, scale, q_tile):
    """Shared-QK full attention + fused output projection + residual.

    One grid step handles one (batch b, query-tile qi) pair for ALL heads:
      q_ref:   (Tq, D)  bf16  qk slab rows of this query tile (q = raw qk)
      kv_ref:  (T, 2D)  bf16  full [qk | v] slab of batch element b (keys/values)
      wo_ref:  (D, D)   bf16  output projection weight
      bo_ref:  (1, D)   f32   output projection bias
      res_ref: (Tq, D)  bf16  x1 reversible residual tile
      o_ref:   (Tq, D)  bf16  y1 tile (lane-dense store)
      acc_ref: (Tq, D)  f32   VMEM scratch accumulator
    k = l2-normalized(qk); self-attention (diagonal) masked to -5e4.
    """
    qi = pl.program_id(1)
    t = kv_ref.shape[0]
    d = heads * dh

    # Start the accumulator with the fused bias + reversible residual.
    acc_ref[...] = res_ref[...].astype(jnp.float32) + bo_ref[...].astype(jnp.float32)

    # Diagonal self-mask (global query index vs key index), reused across heads.
    ri = jax.lax.broadcasted_iota(jnp.int32, (q_tile, t), 0) + qi * q_tile
    ci = jax.lax.broadcasted_iota(jnp.int32, (q_tile, t), 1)
    diag = ri == ci

    for h in range(heads):
        lo, hi = h * dh, (h + 1) * dh

        # Scale folded into the small (Tq, DH) q tile instead of the (Tq, T) dots.
        q = (q_ref[:, lo:hi].astype(jnp.float32) * scale).astype(jnp.bfloat16)

        # k = F.normalize(qk, dim=-1, eps=1e-12); rsqrt on the EUP.
        kq = kv_ref[:, lo:hi].astype(jnp.float32)          # (T, DH) f32
        sumsq = jnp.sum(kq * kq, axis=-1, keepdims=True)
        inv_norm = jax.lax.rsqrt(jnp.maximum(sumsq, jnp.float32(1e-24)))
        k = (kq * inv_norm).astype(jnp.bfloat16)

        dots = jax.lax.dot_general(
            q, k, (((1,), (1,)), ((), ())),
            preferred_element_type=jnp.float32)            # (Tq, T) f32
        dots = jnp.where(diag, jnp.float32(-5e4), dots)    # TOKEN_SELF_ATTN_VALUE

        dots = dots - jnp.max(dots, axis=-1, keepdims=True)
        p = jnp.exp(dots)                                  # f32 (v5e-safe)
        inv = pl.reciprocal(jnp.sum(p, axis=-1, keepdims=True), approx=True)

        v = kv_ref[:, d + lo:d + hi]                       # (T, DH) bf16
        o_h = jnp.dot(p.astype(jnp.bfloat16), v,
                      preferred_element_type=jnp.float32) * inv

        # Fused output projection: concat(o_h) @ wo == sum_h o_h @ wo[lo:hi, :].
        acc_ref[...] += jnp.dot(o_h.astype(jnp.bfloat16), wo_ref[lo:hi, :],
                                preferred_element_type=jnp.float32)

    o_ref[...] = acc_ref[...].astype(o_ref.dtype)


# ----------------------------------------------------------------------------
# Wrappers
# ----------------------------------------------------------------------------

def _pick_tile(dim, pref, base):
    """Largest multiple of `base` that divides `dim` and is <= pref (or dim)."""
    if dim <= pref:
        return dim
    t = (pref // base) * base
    while t >= base:
        if dim % t == 0:
            return t
        t -= base
    return dim  # full-dim escape hatch


def matmul_bias(a, w, bias=None, residual=None, activation=None,
                tm=256, tn=512, tk=512):
    """a: (M, K), w: (K, N) -> act(a @ w + bias) + residual, dtype of `a`."""
    M, K = a.shape
    K2, N = w.shape
    assert K == K2
    tm = _pick_tile(M, tm, 16)      # bf16 sublane packing base
    tn = _pick_tile(N, tn, 128)
    tk = _pick_tile(K, tk, 128)
    gm, gn, gk = M // tm, N // tn, K // tk
    multi_k = gk > 1

    in_specs = [
        pl.BlockSpec((tm, tk), lambda i, j, k: (i, k)),
        pl.BlockSpec((tk, tn), lambda i, j, k: (k, j)),
    ]
    args = [a, w]
    if bias is not None:
        in_specs.append(pl.BlockSpec((1, tn), lambda i, j, k: (0, j)))
        args.append(bias.reshape(1, N).astype(jnp.float32))
    if residual is not None:
        in_specs.append(pl.BlockSpec((tm, tn), lambda i, j, k: (i, j)))
        args.append(residual)

    kernel = functools.partial(_matmul_kernel, activation=activation,
                               has_bias=bias is not None,
                               has_res=residual is not None,
                               multi_k=multi_k)
    scratch = [pltpu.VMEM((tm, tn), jnp.float32)] if multi_k else []
    return pl.pallas_call(
        kernel,
        out_shape=jax.ShapeDtypeStruct((M, N), a.dtype),
        grid_spec=pltpu.PrefetchScalarGridSpec(
            num_scalar_prefetch=0,
            grid=(gm, gn, gk),
            in_specs=in_specs,
            out_specs=pl.BlockSpec((tm, tn), lambda i, j, k: (i, j)),
            scratch_shapes=scratch,
        ),
        compiler_params=pltpu.CompilerParams(
            dimension_semantics=("parallel", "parallel", "arbitrary")),
    )(*args)


def ln_matmul(x, gamma, beta, w, bias=None, activation=None, tm=128, tn=512):
    """Fused LayerNorm + matmul.  x: (M, K); gamma/beta: (1, K); w: (K, N).

    LN is computed once per row tile (cached in a bf16 VMEM scratch) and reused
    for every output-column tile, so the column axis must stay "arbitrary".
    """
    M, K = x.shape
    K2, N = w.shape
    assert K == K2
    tm = _pick_tile(M, tm, 16)
    tn = _pick_tile(N, tn, 128)
    gm, gn = M // tm, N // tn

    in_specs = [
        pl.BlockSpec((tm, K), lambda i, j: (i, 0)),   # constant in j -> one DMA per i
        pl.BlockSpec((1, K), lambda i, j: (0, 0)),
        pl.BlockSpec((1, K), lambda i, j: (0, 0)),
        pl.BlockSpec((K, tn), lambda i, j: (0, j)),
    ]
    args = [x, gamma, beta, w]
    if bias is not None:
        in_specs.append(pl.BlockSpec((1, tn), lambda i, j: (0, j)))
        args.append(bias.reshape(1, N).astype(jnp.float32))

    kernel = functools.partial(_ln_matmul_kernel, activation=activation,
                               has_bias=bias is not None)
    return pl.pallas_call(
        kernel,
        out_shape=jax.ShapeDtypeStruct((M, N), x.dtype),
        grid_spec=pltpu.PrefetchScalarGridSpec(
            num_scalar_prefetch=0,
            grid=(gm, gn),
            in_specs=in_specs,
            out_specs=pl.BlockSpec((tm, tn), lambda i, j: (i, j)),
            scratch_shapes=[pltpu.VMEM((tm, K), x.dtype)],
        ),
        compiler_params=pltpu.CompilerParams(
            dimension_semantics=("parallel", "arbitrary")),
    )(*args)


def shared_qk_attention_proj(qkv, wo, bo, residual, *, batch, seq, heads, dh,
                             q_tile=256):
    """Shared-QK full attention with fused out-projection and residual.

    qkv:      (B*T, 2*D) flat [qk|v] bf16 slab (from the LN+QKV kernel)
    wo, bo:   (D, D) bf16 / (D,) f32 output projection
    residual: (B*T, D) bf16 (x1 stream)
    returns   y1 = x1 + (attention(qkv) @ wo + bo), shape (B*T, D), bf16.
    """
    BT, two_d = qkv.shape
    D = heads * dh
    assert BT == batch * seq and two_d == 2 * D
    tq = _pick_tile(seq, q_tile, 16)
    nq = seq // tq

    kernel = functools.partial(_sharedqk_attn_proj_kernel, heads=heads, dh=dh,
                               scale=dh ** -0.5, q_tile=tq)
    row_map = lambda b, qi: (b * nq + qi, 0)   # block units of tq rows
    return pl.pallas_call(
        kernel,
        out_shape=jax.ShapeDtypeStruct((BT, D), qkv.dtype),
        grid_spec=pltpu.PrefetchScalarGridSpec(
            num_scalar_prefetch=0,
            grid=(batch, nq),
            in_specs=[
                pl.BlockSpec((tq, D), row_map),                 # q tile (qk half only)
                pl.BlockSpec((seq, two_d), lambda b, qi: (b, 0)),  # full kv slab of b
                pl.BlockSpec((D, D), lambda b, qi: (0, 0)),     # wo
                pl.BlockSpec((1, D), lambda b, qi: (0, 0)),     # bo
                pl.BlockSpec((tq, D), row_map),                 # x1 residual tile
            ],
            out_specs=pl.BlockSpec((tq, D), row_map),
            scratch_shapes=[pltpu.VMEM((tq, D), jnp.float32)],
        ),
        compiler_params=pltpu.CompilerParams(
            dimension_semantics=("parallel", "arbitrary")),
    )(qkv, qkv, wo, bo.reshape(1, D).astype(jnp.float32), residual)


# ----------------------------------------------------------------------------
# Parameters & full forward pass
# ----------------------------------------------------------------------------

def init_params(key, cfg):
    D = cfg["dim"]
    F = cfg["ff_mult"] * D
    keys = jax.random.split(key, 3 + cfg["depth"])

    def dense(k, shape, scale=0.02, dtype=jnp.bfloat16):
        return (scale * jax.random.normal(k, shape, dtype=jnp.float32)).astype(dtype)

    params = {
        "token_emb": dense(keys[0], (cfg["num_tokens"], D), dtype=jnp.float32),
        "pos_emb": dense(keys[1], (cfg["max_seq_len"], D), dtype=jnp.float32),
        "w_cls": dense(keys[2], (D, cfg["num_labels"]), dtype=jnp.float32),
        "b_cls": jnp.zeros((cfg["num_labels"],), jnp.float32),
        "layers": [],
    }
    for li in range(cfg["depth"]):
        lk = jax.random.split(keys[3 + li], 5)
        params["layers"].append({
            "ln1_g": jnp.ones((1, D), jnp.float32),
            "ln1_b": jnp.zeros((1, D), jnp.float32),
            # fused [ wqk | wv ] (both Linear(dim, dim, bias=False))
            "w_qkv": jnp.concatenate(
                [dense(lk[0], (D, D)), dense(lk[1], (D, D))], axis=1),
            "wo": dense(lk[2], (D, D)),          # to_out
            "bo": jnp.zeros((D,), jnp.float32),
            "ln2_g": jnp.ones((1, D), jnp.float32),
            "ln2_b": jnp.zeros((1, D), jnp.float32),
            "w1": dense(lk[3], (D, F)),
            "b1": jnp.zeros((F,), jnp.float32),
            "w2": dense(lk[4], (F, D)),
            "b2": jnp.zeros((D,), jnp.float32),
        })
    return params


def reformer_classification_forward(params, input_ids, cfg):
    B, T = input_ids.shape
    D = cfg["dim"]
    H = cfg["heads"]
    DH = D // H

    tok = jnp.take(params["token_emb"], input_ids, axis=0)       # (B, T, D) f32
    pos = params["pos_emb"][:T][None, :, :]                      # (1, T, D)
    x = (tok + pos).astype(jnp.bfloat16).reshape(B * T, D)       # flat bf16 slab

    # Reformer: duplicate stream for reversible blocks: cat([x, x], dim=-1)
    x1, x2 = x, x
    for lp in params["layers"]:
        # f branch: fused LN + [QK|V] projection, then shared-QK full attention
        # with the output projection and the x1 residual fused into its epilogue.
        qkv = ln_matmul(x2, lp["ln1_g"], lp["ln1_b"], lp["w_qkv"])        # (B*T, 2D)
        y1 = shared_qk_attention_proj(qkv, lp["wo"], lp["bo"], x1,
                                      batch=B, seq=T, heads=H, dh=DH)     # (B*T, D)

        # g branch: fused LN + FFN1 (+GELU), FFN2 with x2 residual fused.
        f1 = ln_matmul(y1, lp["ln2_g"], lp["ln2_b"], lp["w1"], bias=lp["b1"],
                       activation="gelu")                                 # (B*T, 4D)
        y2 = matmul_bias(f1, lp["w2"], bias=lp["b2"], residual=x2)        # (B*T, D)

        x1, x2 = y1, y2

    xr = 0.5 * (x1.astype(jnp.float32) + x2.astype(jnp.float32))  # stack.chunk.mean
    cls = xr.reshape(B, T, D)[:, 0]                 # (B, D); final dropout = identity
    # Classification head: (B, num_labels) is far below tile granularity -> plain XLA.
    logits = cls @ params["w_cls"] + params["b_cls"]
    return logits


# ----------------------------------------------------------------------------
# Demo
# ----------------------------------------------------------------------------

if __name__ == "__main__":
    # Scaled-down ReformerConfig (same structure: dim divisible by heads, ff_mult=4)
    cfg = dict(num_tokens=512, dim=128, depth=2, heads=4, max_seq_len=128,
               ff_mult=4, num_labels=2)
    B, T = 2, 64

    key = jax.random.PRNGKey(0)
    pkey, dkey = jax.random.split(key)
    params = init_params(pkey, cfg)
    input_ids = jax.random.randint(dkey, (B, T), 0, cfg["num_tokens"], dtype=jnp.int32)

    fwd = jax.jit(functools.partial(reformer_classification_forward, cfg=cfg))
    logits = fwd(params, input_ids)
    logits = jax.block_until_ready(logits)
    assert logits.shape == (B, cfg["num_labels"])
    assert bool(jnp.all(jnp.isfinite(logits)))
    print("KERNEL_OK")
</pallas_src>

<mosaic_0001>
module attributes {stable_mosaic.version = 11 : i64} {
  func.func @_ln_matmul_kernel(%arg0: i32, %arg1: i32, %arg2: memref<128x128xbf16, #tpu.memory_space<vmem>>, %arg3: memref<1x128xf32, #tpu.memory_space<vmem>>, %arg4: memref<1x128xf32, #tpu.memory_space<vmem>>, %arg5: memref<128x256xbf16, #tpu.memory_space<vmem>>, %arg6: memref<128x256xbf16, #tpu.memory_space<vmem>>, %arg7: memref<128x128xbf16, #tpu.memory_space<vmem>>) attributes {dimension_semantics = [#tpu.dimension_semantics<parallel>, #tpu.dimension_semantics<arbitrary>], iteration_bounds = array<i64: 1, 1>, scalar_prefetch = 0 : i64, scratch_operands = 1 : i64, tpu.core_type = #tpu.core_type<tc>, window_params = [{transform_indices = @transform_0, window_bounds = array<i64: 128, 128>}, {pipeline_mode = #tpu.pipeline_mode<synchronous>, transform_indices = @transform_1, window_bounds = array<i64: 1, 128>}, {pipeline_mode = #tpu.pipeline_mode<synchronous>, transform_indices = @transform_2, window_bounds = array<i64: 1, 128>}, {transform_indices = @transform_3, window_bounds = array<i64: 128, 256>}, {transform_indices = @transform_4, window_bounds = array<i64: 128, 256>}]} {
    %c0_i32 = arith.constant 0 : i32
    %0 = arith.cmpi eq, %arg1, %c0_i32 : i32
    %1 = arith.extui %0 : i1 to i32
    %c0_i32_0 = arith.constant 0 : i32
    %2 = arith.cmpi ne, %1, %c0_i32_0 : i32
    scf.if %2 {
      %c0_6 = arith.constant 0 : index
      %c0_7 = arith.constant 0 : index
      %8 = vector.load %arg2[%c0_6, %c0_7] : memref<128x128xbf16, #tpu.memory_space<vmem>>, vector<128x128xbf16>
      %9 = arith.extf %8 : vector<128x128xbf16> to vector<128x128xf32>
      %cst_8 = arith.constant dense<0.000000e+00> : vector<128xf32>
      %10 = vector.multi_reduction <add>, %9, %cst_8 [1] : vector<128x128xf32> to vector<128xf32>
      %11 = vector.shape_cast %10 : vector<128xf32> to vector<128x1xf32>
      %cst_9 = arith.constant 1.280000e+02 : f32
      %12 = vector.broadcast %cst_9 : f32 to vector<128x1xf32>
      %13 = arith.divf %11, %12 : vector<128x1xf32>
      %14 = arith.mulf %9, %9 : vector<128x128xf32>
      %cst_10 = arith.constant dense<0.000000e+00> : vector<128xf32>
      %15 = vector.multi_reduction <add>, %14, %cst_10 [1] : vector<128x128xf32> to vector<128xf32>
      %16 = vector.shape_cast %15 : vector<128xf32> to vector<128x1xf32>
      %cst_11 = arith.constant 1.280000e+02 : f32
      %17 = vector.broadcast %cst_11 : f32 to vector<128x1xf32>
      %18 = arith.divf %16, %17 : vector<128x1xf32>
      %19 = arith.mulf %13, %13 : vector<128x1xf32>
      %20 = arith.subf %18, %19 : vector<128x1xf32>
      %cst_12 = arith.constant 0.000000e+00 : f32
      %21 = vector.broadcast %cst_12 : f32 to vector<128x1xf32>
      %22 = arith.maximumf %20, %21 : vector<128x1xf32>
      %23 = vector.broadcast %13 : vector<128x1xf32> to vector<128x128xf32>
      %24 = arith.subf %9, %23 : vector<128x128xf32>
      %cst_13 = arith.constant 9.99999974E-6 : f32
      %25 = vector.broadcast %cst_13 : f32 to vector<128x1xf32>
      %26 = arith.addf %22, %25 : vector<128x1xf32>
      %27 = math.rsqrt %26 : vector<128x1xf32>
      %28 = vector.broadcast %27 : vector<128x1xf32> to vector<128x128xf32>
      %29 = arith.mulf %24, %28 : vector<128x128xf32>
      %c0_14 = arith.constant 0 : index
      %c0_15 = arith.constant 0 : index
      %30 = vector.load %arg3[%c0_14, %c0_15] : memref<1x128xf32, #tpu.memory_space<vmem>>, vector<1x128xf32>
      %31 = vector.broadcast %30 : vector<1x128xf32> to vector<128x128xf32>
      %32 = arith.mulf %29, %31 : vector<128x128xf32>
      %c0_16 = arith.constant 0 : index
      %c0_17 = arith.constant 0 : index
      %33 = vector.load %arg4[%c0_16, %c0_17] : memref<1x128xf32, #tpu.memory_space<vmem>>, vector<1x128xf32>
      %34 = vector.broadcast %33 : vector<1x128xf32> to vector<128x128xf32>
      %35 = arith.addf %32, %34 : vector<128x128xf32>
      %36 = arith.truncf %35 : vector<128x128xf32> to vector<128x128xbf16>
      %c0_18 = arith.constant 0 : index
      %c0_19 = arith.constant 0 : index
      %37 = vector.load %arg7[%c0_18, %c0_19] : memref<128x128xbf16, #tpu.memory_space<vmem>>, vector<128x128xbf16>
      tpu.vector_store %arg7[%c0_18, %c0_19], %36 {strides = array<i32>} : memref<128x128xbf16, #tpu.memory_space<vmem>>, vector<128x128xbf16>,
    } else {
    }
    %c0 = arith.constant 0 : index
    %c0_1 = arith.constant 0 : index
    %3 = vector.load %arg7[%c0, %c0_1] : memref<128x128xbf16, #tpu.memory_space<vmem>>, vector<128x128xbf16>
    %c0_2 = arith.constant 0 : index
    %c0_3 = arith.constant 0 : index
    %4 = vector.load %arg5[%c0_2, %c0_3] : memref<128x256xbf16, #tpu.memory_space<vmem>>, vector<128x256xbf16>
    %cst = arith.constant dense<0.000000e+00> : vector<128x256xf32>
    %5 = tpu.matmul %3, %4, %cst {dimension_numbers = #tpu.dot_dimension_numbers<[1], [0], [0], [1], [0, 0, 1, 1], [], []>} : vector<128x128xbf16>, vector<128x256xbf16>, vector<128x256xf32> -> vector<128x256xf32>
    %6 = arith.truncf %5 : vector<128x256xf32> to vector<128x256xbf16>
    %c0_4 = arith.constant 0 : index
    %c0_5 = arith.constant 0 : index
    %7 = vector.load %arg6[%c0_4, %c0_5] : memref<128x256xbf16, #tpu.memory_space<vmem>>, vector<128x256xbf16>
    tpu.vector_store %arg6[%c0_4, %c0_5], %6 {strides = array<i32>} : memref<128x256xbf16, #tpu.memory_space<vmem>>, vector<128x256xbf16>,
    return
  }
  func.func @transform_0(%arg0: i32, %arg1: i32) -> (i32, i32) {
    %c0_i32 = arith.constant 0 : i32
    %c0_i32_0 = arith.constant 0 : i32
    return %arg0, %c0_i32 : i32, i32
  }
  func.func @transform_1(%arg0: i32, %arg1: i32) -> (i32, i32) {
    %c0_i32 = arith.constant 0 : i32
    %c0_i32_0 = arith.constant 0 : i32
    %c0_i32_1 = arith.constant 0 : i32
    return %c0_i32, %c0_i32_0 : i32, i32
  }
  func.func @transform_2(%arg0: i32, %arg1: i32) -> (i32, i32) {
    %c0_i32 = arith.constant 0 : i32
    %c0_i32_0 = arith.constant 0 : i32
    %c0_i32_1 = arith.constant 0 : i32
    return %c0_i32, %c0_i32_0 : i32, i32
  }
  func.func @transform_3(%arg0: i32, %arg1: i32) -> (i32, i32) {
    %c0_i32 = arith.constant 0 : i32
    %c0_i32_0 = arith.constant 0 : i32
    return %c0_i32, %arg1 : i32, i32
  }
  func.func @transform_4(%arg0: i32, %arg1: i32) -> (i32, i32) {
    %c0_i32 = arith.constant 0 : i32
    return %arg0, %arg1 : i32, i32
  }
}

module attributes {stable_mosaic.version = 11 : i64} {
  func.func @_sharedqk_attn_proj_kernel(%arg0: i32, %arg1: i32, %arg2: memref<64x128xbf16, #tpu.memory_space<vmem>>, %arg3: memref<64x256xbf16, #tpu.memory_space<vmem>>, %arg4: memref<128x128xbf16, #tpu.memory_space<vmem>>, %arg5: memref<1x128xf32, #tpu.memory_space<vmem>>, %arg6: memref<64x128xbf16, #tpu.memory_space<vmem>>, %arg7: memref<64x128xbf16, #tpu.memory_space<vmem>>, %arg8: memref<64x128xf32, #tpu.memory_space<vmem>>) attributes {dimension_semantics = [#tpu.dimension_semantics<parallel>, #tpu.dimension_semantics<arbitrary>], iteration_bounds = array<i64: 2, 1>, scalar_prefetch = 0 : i64, scratch_operands = 1 : i64, tpu.core_type = #tpu.core_type<tc>, window_params = [{transform_indices = @transform_0, window_bounds = array<i64: 64, 128>}, {transform_indices = @transform_1, window_bounds = array<i64: 64, 256>}, {pipeline_mode = #tpu.pipeline_mode<synchronous>, transform_indices = @transform_2, window_bounds = array<i64: 128, 128>}, {pipeline_mode = #tpu.pipeline_mode<synchronous>, transform_indices = @transform_3, window_bounds = array<i64: 1, 128>}, {transform_indices = @transform_4, window_bounds = array<i64: 64, 128>}, {transform_indices = @transform_5, window_bounds = array<i64: 64, 128>}]} {
    %c0 = arith.constant 0 : index
    %c0_0 = arith.constant 0 : index
    %0 = vector.load %arg6[%c0, %c0_0] : memref<64x128xbf16, #tpu.memory_space<vmem>>, vector<64x128xbf16>
    %1 = arith.extf %0 : vector<64x128xbf16> to vector<64x128xf32>
    %c0_1 = arith.constant 0 : index
    %c0_2 = arith.constant 0 : index
    %2 = vector.load %arg5[%c0_1, %c0_2] : memref<1x128xf32, #tpu.memory_space<vmem>>, vector<1x128xf32>
    %3 = vector.broadcast %2 : vector<1x128xf32> to vector<64x128xf32>
    %4 = arith.addf %1, %3 : vector<64x128xf32>
    %c0_3 = arith.constant 0 : index
    %c0_4 = arith.constant 0 : index
    %5 = vector.load %arg8[%c0_3, %c0_4] : memref<64x128xf32, #tpu.memory_space<vmem>>, vector<64x128xf32>
    tpu.vector_store %arg8[%c0_3, %c0_4], %4 {strides = array<i32>} : memref<64x128xf32, #tpu.memory_space<vmem>>, vector<64x128xf32>,
    %6 = tpu.iota {dimensions = array<i32: 0>} : vector<64x64xi32>
    %c64_i32 = arith.constant 64 : i32
    %7 = arith.muli %arg1, %c64_i32 : i32
    %8 = vector.broadcast %7 : i32 to vector<64x64xi32>
    %9 = arith.addi %6, %8 : vector<64x64xi32>
    %10 = tpu.iota {dimensions = array<i32: 1>} : vector<64x64xi32>
    %11 = arith.cmpi eq, %9, %10 : vector<64x64xi32>
    %c0_5 = arith.constant 0 : index
    %c0_6 = arith.constant 0 : index
    %12 = vector.load %arg2[%c0_5, %c0_6] : memref<64x128xbf16, #tpu.memory_space<vmem>>, vector<64x32xbf16>
    %13 = arith.extf %12 : vector<64x32xbf16> to vector<64x32xf32>
    %cst = arith.constant 0.176776692 : f32
    %14 = vector.broadcast %cst : f32 to vector<64x32xf32>
    %15 = arith.mulf %13, %14 : vector<64x32xf32>
    %16 = arith.truncf %15 : vector<64x32xf32> to vector<64x32xbf16>
    %c0_7 = arith.constant 0 : index
    %c0_8 = arith.constant 0 : index
    %17 = vector.load %arg3[%c0_7, %c0_8] : memref<64x256xbf16, #tpu.memory_space<vmem>>, vector<64x32xbf16>
    %18 = arith.extf %17 : vector<64x32xbf16> to vector<64x32xf32>
    %19 = arith.mulf %18, %18 : vector<64x32xf32>
    %cst_9 = arith.constant dense<0.000000e+00> : vector<64xf32>
    %20 = vector.multi_reduction <add>, %19, %cst_9 [1] : vector<64x32xf32> to vector<64xf32>
    %21 = vector.shape_cast %20 : vector<64xf32> to vector<64x1xf32>
    %cst_10 = arith.constant 1.000000e-24 : f32
    %22 = vector.broadcast %cst_10 : f32 to vector<64x1xf32>
    %23 = arith.maximumf %21, %22 : vector<64x1xf32>
    %24 = math.rsqrt %23 : vector<64x1xf32>
    %25 = vector.broadcast %24 : vector<64x1xf32> to vector<64x32xf32>
    %26 = arith.mulf %18, %25 : vector<64x32xf32>
    %27 = arith.truncf %26 : vector<64x32xf32> to vector<64x32xbf16>
    %cst_11 = arith.constant dense<0.000000e+00> : vector<64x64xf32>
    %28 = tpu.matmul %16, %27, %cst_11 {dimension_numbers = #tpu.dot_dimension_numbers<[1], [1], [0], [0], [0, 0, 1, 0], [], []>} : vector<64x32xbf16>, vector<64x32xbf16>, vector<64x64xf32> -> vector<64x64xf32>
    %cst_12 = arith.constant -5.000000e+04 : f32
    %29 = vector.broadcast %cst_12 : f32 to vector<64x64xf32>
    %30 = arith.select %11, %29, %28 : vector<64x64xi1>, vector<64x64xf32>
    %cst_13 = arith.constant dense<0xFF800000> : vector<64xf32>
    %31 = vector.multi_reduction <maximumf>, %30, %cst_13 [1] : vector<64x64xf32> to vector<64xf32>
    %32 = vector.shape_cast %31 : vector<64xf32> to vector<64x1xf32>
    %33 = vector.broadcast %32 : vector<64x1xf32> to vector<64x64xf32>
    %34 = arith.subf %30, %33 : vector<64x64xf32>
    %35 = math.exp %34 : vector<64x64xf32>
    %cst_14 = arith.constant dense<0.000000e+00> : vector<64xf32>
    %36 = vector.multi_reduction <add>, %35, %cst_14 [1] : vector<64x64xf32> to vector<64xf32>
    %37 = vector.shape_cast %36 : vector<64xf32> to vector<64x1xf32>
    %38 = tpu.reciprocal %37 {approx = true} : vector<64x1xf32> -> vector<64x1xf32>
    %c0_15 = arith.constant 0 : index
    %c128 = arith.constant 128 : index
    %39 = vector.load %arg3[%c0_15, %c128] : memref<64x256xbf16, #tpu.memory_space<vmem>>, vector<64x32xbf16>
    %40 = arith.truncf %35 : vector<64x64xf32> to vector<64x64xbf16>
    %cst_16 = arith.constant dense<0.000000e+00> : vector<64x32xf32>
    %41 = tpu.matmul %40, %39, %cst_16 {dimension_numbers = #tpu.dot_dimension_numbers<[1], [0], [0], [1], [0, 0, 1, 1], [], []>} : vector<64x64xbf16>, vector<64x32xbf16>, vector<64x32xf32> -> vector<64x32xf32>
    %42 = vector.broadcast %38 : vector<64x1xf32> to vector<64x32xf32>
    %43 = arith.mulf %41, %42 : vector<64x32xf32>
    %c0_17 = arith.constant 0 : index
    %c0_18 = arith.constant 0 : index
    %44 = vector.load %arg8[%c0_17, %c0_18] : memref<64x128xf32, #tpu.memory_space<vmem>>, vector<64x128xf32>
    %45 = arith.truncf %43 : vector<64x32xf32> to vector<64x32xbf16>
    %c0_19 = arith.constant 0 : index
    %c0_20 = arith.constant 0 : index
    %46 = vector.load %arg4[%c0_19, %c0_20] : memref<128x128xbf16, #tpu.memory_space<vmem>>, vector<32x128xbf16>
    %cst_21 = arith.constant dense<0.000000e+00> : vector<64x128xf32>
    %47 = tpu.matmul %45, %46, %cst_21 {dimension_numbers = #tpu.dot_dimension_numbers<[1], [0], [0], [1], [0, 0, 1, 1], [], []>} : vector<64x32xbf16>, vector<32x128xbf16>, vector<64x128xf32> -> vector<64x128xf32>
    %48 = arith.addf %44, %47 : vector<64x128xf32>
    %c0_22 = arith.constant 0 : index
    %c0_23 = arith.constant 0 : index
    %49 = vector.load %arg8[%c0_22, %c0_23] : memref<64x128xf32, #tpu.memory_space<vmem>>, vector<64x128xf32>
    tpu.vector_store %arg8[%c0_22, %c0_23], %48 {strides = array<i32>} : memref<64x128xf32, #tpu.memory_space<vmem>>, vector<64x128xf32>,
    %c0_24 = arith.constant 0 : index
    %c32 = arith.constant 32 : index
    %50 = vector.load %arg2[%c0_24, %c32] : memref<64x128xbf16, #tpu.memory_space<vmem>>, vector<64x32xbf16>
    %51 = arith.extf %50 : vector<64x32xbf16> to vector<64x32xf32>
    %cst_25 = arith.constant 0.176776692 : f32
    %52 = vector.broadcast %cst_25 : f32 to vector<64x32xf32>
    %53 = arith.mulf %51, %52 : vector<64x32xf32>
    %54 = arith.truncf %53 : vector<64x32xf32> to vector<64x32xbf16>
    %c0_26 = arith.constant 0 : index
    %c32_27 = arith.constant 32 : index
    %55 = vector.load %arg3[%c0_26, %c32_27] : memref<64x256xbf16, #tpu.memory_space<vmem>>, vector<64x32xbf16>
    %56 = arith.extf %55 : vector<64x32xbf16> to vector<64x32xf32>
    %57 = arith.mulf %56, %56 : vector<64x32xf32>
    %cst_28 = arith.constant dense<0.000000e+00> : vector<64xf32>
    %58 = vector.multi_reduction <add>, %57, %cst_28 [1] : vector<64x32xf32> to vector<64xf32>
    %59 = vector.shape_cast %58 : vector<64xf32> to vector<64x1xf32>
    %cst_29 = arith.constant 1.000000e-24 : f32
    %60 = vector.broadcast %cst_29 : f32 to vector<64x1xf32>
    %61 = arith.maximumf %59, %60 : vector<64x1xf32>
    %62 = math.rsqrt %61 : vector<64x1xf32>
    %63 = vector.broadcast %62 : vector<64x1xf32> to vector<64x32xf32>
    %64 = arith.mulf %56, %63 : vector<64x32xf32>
    %65 = arith.truncf %64 : vector<64x32xf32> to vector<64x32xbf16>
    %cst_30 = arith.constant dense<0.000000e+00> : vector<64x64xf32>
    %66 = tpu.matmul %54, %65, %cst_30 {dimension_numbers = #tpu.dot_dimension_numbers<[1], [1], [0], [0], [0, 0, 1, 0], [], []>} : vector<64x32xbf16>, vector<64x32xbf16>, vector<64x64xf32> -> vector<64x64xf32>
    %cst_31 = arith.constant -5.000000e+04 : f32
    %67 = vector.broadcast %cst_31 : f32 to vector<64x64xf32>
    %68 = arith.select %11, %67, %66 : vector<64x64xi1>, vector<64x64xf32>
    %cst_32 = arith.constant dense<0xFF800000> : vector<64xf32>
    %69 = vector.multi_reduction <maximumf>, %68, %cst_32 [1] : vector<64x64xf32> to vector<64xf32>
    %70 = vector.shape_cast %69 : vector<64xf32> to vector<64x1xf32>
    %71 = vector.broadcast %70 : vector<64x1xf32> to vector<64x64xf32>
    %72 = arith.subf %68, %71 : vector<64x64xf32>
    %73 = math.exp %72 : vector<64x64xf32>
    %cst_33 = arith.constant dense<0.000000e+00> : vector<64xf32>
    %74 = vector.multi_reduction <add>, %73, %cst_33 [1] : vector<64x64xf32> to vector<64xf32>
    %75 = vector.shape_cast %74 : vector<64xf32> to vector<64x1xf32>
    %76 = tpu.reciprocal %75 {approx = true} : vector<64x1xf32> -> vector<64x1xf32>
    %c0_34 = arith.constant 0 : index
    %c160 = arith.constant 160 : index
    %77 = vector.load %arg3[%c0_34, %c160] : memref<64x256xbf16, #tpu.memory_space<vmem>>, vector<64x32xbf16>
    %78 = arith.truncf %73 : vector<64x64xf32> to vector<64x64xbf16>
    %cst_35 = arith.constant dense<0.000000e+00> : vector<64x32xf32>
    %79 = tpu.matmul %78, %77, %cst_35 {dimension_numbers = #tpu.dot_dimension_numbers<[1], [0], [0], [1], [0, 0, 1, 1], [], []>} : vector<64x64xbf16>, vector<64x32xbf16>, vector<64x32xf32> -> vector<64x32xf32>
    %80 = vector.broadcast %76 : vector<64x1xf32> to vector<64x32xf32>
    %81 = arith.mulf %79, %80 : vector<64x32xf32>
    %c0_36 = arith.constant 0 : index
    %c0_37 = arith.constant 0 : index
    %82 = vector.load %arg8[%c0_36, %c0_37] : memref<64x128xf32, #tpu.memory_space<vmem>>, vector<64x128xf32>
    %83 = arith.truncf %81 : vector<64x32xf32> to vector<64x32xbf16>
    %c32_38 = arith.constant 32 : index
    %c0_39 = arith.constant 0 : index
    %84 = vector.load %arg4[%c32_38, %c0_39] : memref<128x128xbf16, #tpu.memory_space<vmem>>, vector<32x128xbf16>
    %cst_40 = arith.constant dense<0.000000e+00> : vector<64x128xf32>
    %85 = tpu.matmul %83, %84, %cst_40 {dimension_numbers = #tpu.dot_dimension_numbers<[1], [0], [0], [1], [0, 0, 1, 1], [], []>} : vector<64x32xbf16>, vector<32x128xbf16>, vector<64x128xf32> -> vector<64x128xf32>
    %86 = arith.addf %82, %85 : vector<64x128xf32>
    %c0_41 = arith.constant 0 : index
    %c0_42 = arith.constant 0 : index
    %87 = vector.load %arg8[%c0_41, %c0_42] : memref<64x128xf32, #tpu.memory_space<vmem>>, vector<64x128xf32>
    tpu.vector_store %arg8[%c0_41, %c0_42], %86 {strides = array<i32>} : memref<64x128xf32, #tpu.memory_space<vmem>>, vector<64x128xf32>,
    %c0_43 = arith.constant 0 : index
    %c64 = arith.constant 64 : index
    %88 = vector.load %arg2[%c0_43, %c64] : memref<64x128xbf16, #tpu.memory_space<vmem>>, vector<64x32xbf16>
    %89 = arith.extf %88 : vector<64x32xbf16> to vector<64x32xf32>
    %cst_44 = arith.constant 0.176776692 : f32
    %90 = vector.broadcast %cst_44 : f32 to vector<64x32xf32>
    %91 = arith.mulf %89, %90 : vector<64x32xf32>
    %92 = arith.truncf %91 : vector<64x32xf32> to vector<64x32xbf16>
    %c0_45 = arith.constant 0 : index
    %c64_46 = arith.constant 64 : index
    %93 = vector.load %arg3[%c0_45, %c64_46] : memref<64x256xbf16, #tpu.memory_space<vmem>>, vector<64x32xbf16>
    %94 = arith.extf %93 : vector<64x32xbf16> to vector<64x32xf32>
    %95 = arith.mulf %94, %94 : vector<64x32xf32>
    %cst_47 = arith.constant dense<0.000000e+00> : vector<64xf32>
    %96 = vector.multi_reduction <add>, %95, %cst_47 [1] : vector<64x32xf32> to vector<64xf32>
    %97 = vector.shape_cast %96 : vector<64xf32> to vector<64x1xf32>
    %cst_48 = arith.constant 1.000000e-24 : f32
    %98 = vector.broadcast %cst_48 : f32 to vector<64x1xf32>
    %99 = arith.maximumf %97, %98 : vector<64x1xf32>
    %100 = math.rsqrt %99 : vector<64x1xf32>
    %101 = vector.broadcast %100 : vector<64x1xf32> to vector<64x32xf32>
    %102 = arith.mulf %94, %101 : vector<64x32xf32>
    %103 = arith.truncf %102 : vector<64x32xf32> to vector<64x32xbf16>
    %cst_49 = arith.constant dense<0.000000e+00> : vector<64x64xf32>
    %104 = tpu.matmul %92, %103, %cst_49 {dimension_numbers = #tpu.dot_dimension_numbers<[1], [1], [0], [0], [0, 0, 1, 0], [], []>} : vector<64x32xbf16>, vector<64x32xbf16>, vector<64x64xf32> -> vector<64x64xf32>
    %cst_50 = arith.constant -5.000000e+04 : f32
    %105 = vector.broadcast %cst_50 : f32 to vector<64x64xf32>
    %106 = arith.select %11, %105, %104 : vector<64x64xi1>, vector<64x64xf32>
    %cst_51 = arith.constant dense<0xFF800000> : vector<64xf32>
    %107 = vector.multi_reduction <maximumf>, %106, %cst_51 [1] : vector<64x64xf32> to vector<64xf32>
    %108 = vector.shape_cast %107 : vector<64xf32> to vector<64x1xf32>
    %109 = vector.broadcast %108 : vector<64x1xf32> to vector<64x64xf32>
    %110 = arith.subf %106, %109 : vector<64x64xf32>
    %111 = math.exp %110 : vector<64x64xf32>
    %cst_52 = arith.constant dense<0.000000e+00> : vector<64xf32>
    %112 = vector.multi_reduction <add>, %111, %cst_52 [1] : vector<64x64xf32> to vector<64xf32>
    %113 = vector.shape_cast %112 : vector<64xf32> to vector<64x1xf32>
    %114 = tpu.reciprocal %113 {approx = true} : vector<64x1xf32> -> vector<64x1xf32>
    %c0_53 = arith.constant 0 : index
    %c192 = arith.constant 192 : index
    %115 = vector.load %arg3[%c0_53, %c192] : memref<64x256xbf16, #tpu.memory_space<vmem>>, vector<64x32xbf16>
    %116 = arith.truncf %111 : vector<64x64xf32> to vector<64x64xbf16>
    %cst_54 = arith.constant dense<0.000000e+00> : vector<64x32xf32>
    %117 = tpu.matmul %116, %115, %cst_54 {dimension_numbers = #tpu.dot_dimension_numbers<[1], [0], [0], [1], [0, 0, 1, 1], [], []>} : vector<64x64xbf16>, vector<64x32xbf16>, vector<64x32xf32> -> vector<64x32xf32>
    %118 = vector.broadcast %114 : vector<64x1xf32> to vector<64x32xf32>
    %119 = arith.mulf %117, %118 : vector<64x32xf32>
    %c0_55 = arith.constant 0 : index
    %c0_56 = arith.constant 0 : index
    %120 = vector.load %arg8[%c0_55, %c0_56] : memref<64x128xf32, #tpu.memory_space<vmem>>, vector<64x128xf32>
    %121 = arith.truncf %119 : vector<64x32xf32> to vector<64x32xbf16>
    %c64_57 = arith.constant 64 : index
    %c0_58 = arith.constant 0 : index
    %122 = vector.load %arg4[%c64_57, %c0_58] : memref<128x128xbf16, #tpu.memory_space<vmem>>, vector<32x128xbf16>
    %cst_59 = arith.constant dense<0.000000e+00> : vector<64x128xf32>
    %123 = tpu.matmul %121, %122, %cst_59 {dimension_numbers = #tpu.dot_dimension_numbers<[1], [0], [0], [1], [0, 0, 1, 1], [], []>} : vector<64x32xbf16>, vector<32x128xbf16>, vector<64x128xf32> -> vector<64x128xf32>
    %124 = arith.addf %120, %123 : vector<64x128xf32>
    %c0_60 = arith.constant 0 : index
    %c0_61 = arith.constant 0 : index
    %125 = vector.load %arg8[%c0_60, %c0_61] : memref<64x128xf32, #tpu.memory_space<vmem>>, vector<64x128xf32>
    tpu.vector_store %arg8[%c0_60, %c0_61], %124 {strides = array<i32>} : memref<64x128xf32, #tpu.memory_space<vmem>>, vector<64x128xf32>,
    %c0_62 = arith.constant 0 : index
    %c96 = arith.constant 96 : index
    %126 = vector.load %arg2[%c0_62, %c96] : memref<64x128xbf16, #tpu.memory_space<vmem>>, vector<64x32xbf16>
    %127 = arith.extf %126 : vector<64x32xbf16> to vector<64x32xf32>
    %cst_63 = arith.constant 0.176776692 : f32
    %128 = vector.broadcast %cst_63 : f32 to vector<64x32xf32>
    %129 = arith.mulf %127, %128 : vector<64x32xf32>
    %130 = arith.truncf %129 : vector<64x32xf32> to vector<64x32xbf16>
    %c0_64 = arith.constant 0 : index
    %c96_65 = arith.constant 96 : index
    %131 = vector.load %arg3[%c0_64, %c96_65] : memref<64x256xbf16, #tpu.memory_space<vmem>>, vector<64x32xbf16>
    %132 = arith.extf %131 : vector<64x32xbf16> to vector<64x32xf32>
    %133 = arith.mulf %132, %132 : vector<64x32xf32>
    %cst_66 = arith.constant dense<0.000000e+00> : vector<64xf32>
    %134 = vector.multi_reduction <add>, %133, %cst_66 [1] : vector<64x32xf32> to vector<64xf32>
    %135 = vector.shape_cast %134 : vector<64xf32> to vector<64x1xf32>
    %cst_67 = arith.constant 1.000000e-24 : f32
    %136 = vector.broadcast %cst_67 : f32 to vector<64x1xf32>
    %137 = arith.maximumf %135, %136 : vector<64x1xf32>
    %138 = math.rsqrt %137 : vector<64x1xf32>
    %139 = vector.broadcast %138 : vector<64x1xf32> to vector<64x32xf32>
    %140 = arith.mulf %132, %139 : vector<64x32xf32>
    %141 = arith.truncf %140 : vector<64x32xf32> to vector<64x32xbf16>
    %cst_68 = arith.constant dense<0.000000e+00> : vector<64x64xf32>
    %142 = tpu.matmul %130, %141, %cst_68 {dimension_numbers = #tpu.dot_dimension_numbers<[1], [1], [0], [0], [0, 0, 1, 0], [], []>} : vector<64x32xbf16>, vector<64x32xbf16>, vector<64x64xf32> -> vector<64x64xf32>
    %cst_69 = arith.constant -5.000000e+04 : f32
    %143 = vector.broadcast %cst_69 : f32 to vector<64x64xf32>
    %144 = arith.select %11, %143, %142 : vector<64x64xi1>, vector<64x64xf32>
    %cst_70 = arith.constant dense<0xFF800000> : vector<64xf32>
    %145 = vector.multi_reduction <maximumf>, %144, %cst_70 [1] : vector<64x64xf32> to vector<64xf32>
    %146 = vector.shape_cast %145 : vector<64xf32> to vector<64x1xf32>
    %147 = vector.broadcast %146 : vector<64x1xf32> to vector<64x64xf32>
    %148 = arith.subf %144, %147 : vector<64x64xf32>
    %149 = math.exp %148 : vector<64x64xf32>
    %cst_71 = arith.constant dense<0.000000e+00> : vector<64xf32>
    %150 = vector.multi_reduction <add>, %149, %cst_71 [1] : vector<64x64xf32> to vector<64xf32>
    %151 = vector.shape_cast %150 : vector<64xf32> to vector<64x1xf32>
    %152 = tpu.reciprocal %151 {approx = true} : vector<64x1xf32> -> vector<64x1xf32>
    %c0_72 = arith.constant 0 : index
    %c224 = arith.constant 224 : index
    %153 = vector.load %arg3[%c0_72, %c224] : memref<64x256xbf16, #tpu.memory_space<vmem>>, vector<64x32xbf16>
    %154 = arith.truncf %149 : vector<64x64xf32> to vector<64x64xbf16>
    %cst_73 = arith.constant dense<0.000000e+00> : vector<64x32xf32>
    %155 = tpu.matmul %154, %153, %cst_73 {dimension_numbers = #tpu.dot_dimension_numbers<[1], [0], [0], [1], [0, 0, 1, 1], [], []>} : vector<64x64xbf16>, vector<64x32xbf16>, vector<64x32xf32> -> vector<64x32xf32>
    %156 = vector.broadcast %152 : vector<64x1xf32> to vector<64x32xf32>
    %157 = arith.mulf %155, %156 : vector<64x32xf32>
    %c0_74 = arith.constant 0 : index
    %c0_75 = arith.constant 0 : index
    %158 = vector.load %arg8[%c0_74, %c0_75] : memref<64x128xf32, #tpu.memory_space<vmem>>, vector<64x128xf32>
    %159 = arith.truncf %157 : vector<64x32xf32> to vector<64x32xbf16>
    %c96_76 = arith.constant 96 : index
    %c0_77 = arith.constant 0 : index
    %160 = vector.load %arg4[%c96_76, %c0_77] : memref<128x128xbf16, #tpu.memory_space<vmem>>, vector<32x128xbf16>
    %cst_78 = arith.constant dense<0.000000e+00> : vector<64x128xf32>
    %161 = tpu.matmul %159, %160, %cst_78 {dimension_numbers = #tpu.dot_dimension_numbers<[1], [0], [0], [1], [0, 0, 1, 1], [], []>} : vector<64x32xbf16>, vector<32x128xbf16>, vector<64x128xf32> -> vector<64x128xf32>
    %162 = arith.addf %158, %161 : vector<64x128xf32>
    %c0_79 = arith.constant 0 : index
    %c0_80 = arith.constant 0 : index
    %163 = vector.load %arg8[%c0_79, %c0_80] : memref<64x128xf32, #tpu.memory_space<vmem>>, vector<64x128xf32>
    tpu.vector_store %arg8[%c0_79, %c0_80], %162 {strides = array<i32>} : memref<64x128xf32, #tpu.memory_space<vmem>>, vector<64x128xf32>,
    %c0_81 = arith.constant 0 : index
    %c0_82 = arith.constant 0 : index
    %164 = vector.load %arg8[%c0_81, %c0_82] : memref<64x128xf32, #tpu.memory_space<vmem>>, vector<64x128xf32>
    %165 = arith.truncf %164 : vector<64x128xf32> to vector<64x128xbf16>
    %c0_83 = arith.constant 0 : index
    %c0_84 = arith.constant 0 : index
    %166 = vector.load %arg7[%c0_83, %c0_84] : memref<64x128xbf16, #tpu.memory_space<vmem>>, vector<64x128xbf16>
    tpu.vector_store %arg7[%c0_83, %c0_84], %165 {strides = array<i32>} : memref<64x128xbf16, #tpu.memory_space<vmem>>, vector<64x128xbf16>,
    return
  }
  func.func @transform_0(%arg0: i32, %arg1: i32) -> (i32, i32) {
    %c1_i32 = arith.constant 1 : i32
    %0 = arith.muli %arg0, %c1_i32 : i32
    %1 = arith.addi %0, %arg1 : i32
    %c0_i32 = arith.constant 0 : i32
    %c0_i32_0 = arith.constant 0 : i32
    return %1, %c0_i32 : i32, i32
  }
  func.func @transform_1(%arg0: i32, %arg1: i32) -> (i32, i32) {
    %c0_i32 = arith.constant 0 : i32
    %c0_i32_0 = arith.constant 0 : i32
    return %arg0, %c0_i32 : i32, i32
  }
  func.func @transform_2(%arg0: i32, %arg1: i32) -> (i32, i32) {
    %c0_i32 = arith.constant 0 : i32
    %c0_i32_0 = arith.constant 0 : i32
    %c0_i32_1 = arith.constant 0 : i32
    return %c0_i32, %c0_i32_0 : i32, i32
  }
  func.func @transform_3(%arg0: i32, %arg1: i32) -> (i32, i32) {
    %c0_i32 = arith.constant 0 : i32
    %c0_i32_0 = arith.constant 0 : i32
    %c0_i32_1 = arith.constant 0 : i32
    return %c0_i32, %c0_i32_0 : i32, i32
  }
  func.func @transform_4(%arg0: i32, %arg1: i32) -> (i32, i32) {
    %c1_i32 = arith.constant 1 : i32
    %0 = arith.muli %arg0, %c1_i32 : i32
    %1 = arith.addi %0, %arg1 : i32
    %c0_i32 = arith.constant 0 : i32
    %c0_i32_0 = arith.constant 0 : i32
    return %1, %c0_i32 : i32, i32
  }
  func.func @transform_5(%arg0: i32, %arg1: i32) -> (i32, i32) {
    %c1_i32 = arith.constant 1 : i32
    %0 = arith.muli %arg0, %c1_i32 : i32
    %1 = arith.addi %0, %arg1 : i32
    %c0_i32 = arith.constant 0 : i32
    %c0_i32_0 = arith.constant 0 : i32
    return %1, %c0_i32 : i32, i32
  }
}

module attributes {stable_mosaic.version = 11 : i64} {
  func.func @_ln_matmul_kernel(%arg0: i32, %arg1: i32, %arg2: memref<128x128xbf16, #tpu.memory_space<vmem>>, %arg3: memref<1x128xf32, #tpu.memory_space<vmem>>, %arg4: memref<1x128xf32, #tpu.memory_space<vmem>>, %arg5: memref<128x512xbf16, #tpu.memory_space<vmem>>, %arg6: memref<1x512xf32, #tpu.memory_space<vmem>>, %arg7: memref<128x512xbf16, #tpu.memory_space<vmem>>, %arg8: memref<128x128xbf16, #tpu.memory_space<vmem>>) attributes {dimension_semantics = [#tpu.dimension_semantics<parallel>, #tpu.dimension_semantics<arbitrary>], iteration_bounds = array<i64: 1, 1>, scalar_prefetch = 0 : i64, scratch_operands = 1 : i64, tpu.core_type = #tpu.core_type<tc>, window_params = [{transform_indices = @transform_0, window_bounds = array<i64: 128, 128>}, {pipeline_mode = #tpu.pipeline_mode<synchronous>, transform_indices = @transform_1, window_bounds = array<i64: 1, 128>}, {pipeline_mode = #tpu.pipeline_mode<synchronous>, transform_indices = @transform_2, window_bounds = array<i64: 1, 128>}, {transform_indices = @transform_3, window_bounds = array<i64: 128, 512>}, {transform_indices = @transform_4, window_bounds = array<i64: 1, 512>}, {transform_indices = @transform_5, window_bounds = array<i64: 128, 512>}]} {
    %c0_i32 = arith.constant 0 : i32
    %0 = arith.cmpi eq, %arg1, %c0_i32 : i32
    %1 = arith.extui %0 : i1 to i32
    %c0_i32_0 = arith.constant 0 : i32
    %2 = arith.cmpi ne, %1, %c0_i32_0 : i32
    scf.if %2 {
      %c0_12 = arith.constant 0 : index
      %c0_13 = arith.constant 0 : index
      %24 = vector.load %arg2[%c0_12, %c0_13] : memref<128x128xbf16, #tpu.memory_space<vmem>>, vector<128x128xbf16>
      %25 = arith.extf %24 : vector<128x128xbf16> to vector<128x128xf32>
      %cst_14 = arith.constant dense<0.000000e+00> : vector<128xf32>
      %26 = vector.multi_reduction <add>, %25, %cst_14 [1] : vector<128x128xf32> to vector<128xf32>
      %27 = vector.shape_cast %26 : vector<128xf32> to vector<128x1xf32>
      %cst_15 = arith.constant 1.280000e+02 : f32
      %28 = vector.broadcast %cst_15 : f32 to vector<128x1xf32>
      %29 = arith.divf %27, %28 : vector<128x1xf32>
      %30 = arith.mulf %25, %25 : vector<128x128xf32>
      %cst_16 = arith.constant dense<0.000000e+00> : vector<128xf32>
      %31 = vector.multi_reduction <add>, %30, %cst_16 [1] : vector<128x128xf32> to vector<128xf32>
      %32 = vector.shape_cast %31 : vector<128xf32> to vector<128x1xf32>
      %cst_17 = arith.constant 1.280000e+02 : f32
      %33 = vector.broadcast %cst_17 : f32 to vector<128x1xf32>
      %34 = arith.divf %32, %33 : vector<128x1xf32>
      %35 = arith.mulf %29, %29 : vector<128x1xf32>
      %36 = arith.subf %34, %35 : vector<128x1xf32>
      %cst_18 = arith.constant 0.000000e+00 : f32
      %37 = vector.broadcast %cst_18 : f32 to vector<128x1xf32>
      %38 = arith.maximumf %36, %37 : vector<128x1xf32>
      %39 = vector.broadcast %29 : vector<128x1xf32> to vector<128x128xf32>
      %40 = arith.subf %25, %39 : vector<128x128xf32>
      %cst_19 = arith.constant 9.99999974E-6 : f32
      %41 = vector.broadcast %cst_19 : f32 to vector<128x1xf32>
      %42 = arith.addf %38, %41 : vector<128x1xf32>
      %43 = math.rsqrt %42 : vector<128x1xf32>
      %44 = vector.broadcast %43 : vector<128x1xf32> to vector<128x128xf32>
      %45 = arith.mulf %40, %44 : vector<128x128xf32>
      %c0_20 = arith.constant 0 : index
      %c0_21 = arith.constant 0 : index
      %46 = vector.load %arg3[%c0_20, %c0_21] : memref<1x128xf32, #tpu.memory_space<vmem>>, vector<1x128xf32>
      %47 = vector.broadcast %46 : vector<1x128xf32> to vector<128x128xf32>
      %48 = arith.mulf %45, %47 : vector<128x128xf32>
      %c0_22 = arith.constant 0 : index
      %c0_23 = arith.constant 0 : index
      %49 = vector.load %arg4[%c0_22, %c0_23] : memref<1x128xf32, #tpu.memory_space<vmem>>, vector<1x128xf32>
      %50 = vector.broadcast %49 : vector<1x128xf32> to vector<128x128xf32>
      %51 = arith.addf %48, %50 : vector<128x128xf32>
      %52 = arith.truncf %51 : vector<128x128xf32> to vector<128x128xbf16>
      %c0_24 = arith.constant 0 : index
      %c0_25 = arith.constant 0 : index
      %53 = vector.load %arg8[%c0_24, %c0_25] : memref<128x128xbf16, #tpu.memory_space<vmem>>, vector<128x128xbf16>
      tpu.vector_store %arg8[%c0_24, %c0_25], %52 {strides = array<i32>} : memref<128x128xbf16, #tpu.memory_space<vmem>>, vector<128x128xbf16>,
    } else {
    }
    %c0 = arith.constant 0 : index
    %c0_1 = arith.constant 0 : index
    %3 = vector.load %arg8[%c0, %c0_1] : memref<128x128xbf16, #tpu.memory_space<vmem>>, vector<128x128xbf16>
    %c0_2 = arith.constant 0 : index
    %c0_3 = arith.constant 0 : index
    %4 = vector.load %arg5[%c0_2, %c0_3] : memref<128x512xbf16, #tpu.memory_space<vmem>>, vector<128x512xbf16>
    %cst = arith.constant dense<0.000000e+00> : vector<128x512xf32>
    %5 = tpu.matmul %3, %4, %cst {dimension_numbers = #tpu.dot_dimension_numbers<[1], [0], [0], [1], [0, 0, 1, 1], [], []>} : vector<128x128xbf16>, vector<128x512xbf16>, vector<128x512xf32> -> vector<128x512xf32>
    %c0_4 = arith.constant 0 : index
    %c0_5 = arith.constant 0 : index
    %6 = vector.load %arg6[%c0_4, %c0_5] : memref<1x512xf32, #tpu.memory_space<vmem>>, vector<1x512xf32>
    %7 = vector.broadcast %6 : vector<1x512xf32> to vector<128x512xf32>
    %8 = arith.addf %5, %7 : vector<128x512xf32>
    %cst_6 = arith.constant 5.000000e-01 : f32
    %9 = vector.broadcast %cst_6 : f32 to vector<128x512xf32>
    %10 = arith.mulf %9, %8 : vector<128x512xf32>
    %cst_7 = arith.constant 4.471500e-02 : f32
    %11 = vector.broadcast %cst_7 : f32 to vector<128x512xf32>
    %12 = arith.mulf %11, %8 : vector<128x512xf32>
    %13 = arith.mulf %12, %8 : vector<128x512xf32>
    %14 = arith.mulf %13, %8 : vector<128x512xf32>
    %15 = arith.addf %8, %14 : vector<128x512xf32>
    %cst_8 = arith.constant 0.797884583 : f32
    %16 = vector.broadcast %cst_8 : f32 to vector<128x512xf32>
    %17 = arith.mulf %16, %15 : vector<128x512xf32>
    %18 = math.tanh %17 : vector<128x512xf32>
    %cst_9 = arith.constant 1.000000e+00 : f32
    %19 = vector.broadcast %cst_9 : f32 to vector<128x512xf32>
    %20 = arith.addf %19, %18 : vector<128x512xf32>
    %21 = arith.mulf %10, %20 : vector<128x512xf32>
    %22 = arith.truncf %21 : vector<128x512xf32> to vector<128x512xbf16>
    %c0_10 = arith.constant 0 : index
    %c0_11 = arith.constant 0 : index
    %23 = vector.load %arg7[%c0_10, %c0_11] : memref<128x512xbf16, #tpu.memory_space<vmem>>, vector<128x512xbf16>
    tpu.vector_store %arg7[%c0_10, %c0_11], %22 {strides = array<i32>} : memref<128x512xbf16, #tpu.memory_space<vmem>>, vector<128x512xbf16>,
    return
  }
  func.func @transform_0(%arg0: i32, %arg1: i32) -> (i32, i32) {
    %c0_i32 = arith.constant 0 : i32
    %c0_i32_0 = arith.constant 0 : i32
    return %arg0, %c0_i32 : i32, i32
  }
  func.func @transform_1(%arg0: i32, %arg1: i32) -> (i32, i32) {
    %c0_i32 = arith.constant 0 : i32
    %c0_i32_0 = arith.constant 0 : i32
    %c0_i32_1 = arith.constant 0 : i32
    return %c0_i32, %c0_i32_0 : i32, i32
  }
  func.func @transform_2(%arg0: i32, %arg1: i32) -> (i32, i32) {
    %c0_i32 = arith.constant 0 : i32
    %c0_i32_0 = arith.constant 0 : i32
    %c0_i32_1 = arith.constant 0 : i32
    return %c0_i32, %c0_i32_0 : i32, i32
  }
  func.func @transform_3(%arg0: i32, %arg1: i32) -> (i32, i32) {
    %c0_i32 = arith.constant 0 : i32
    %c0_i32_0 = arith.constant 0 : i32
    return %c0_i32, %arg1 : i32, i32
  }
  func.func @transform_4(%arg0: i32, %arg1: i32) -> (i32, i32) {
    %c0_i32 = arith.constant 0 : i32
    %c0_i32_0 = arith.constant 0 : i32
    return %c0_i32, %arg1 : i32, i32
  }
  func.func @transform_5(%arg0: i32, %arg1: i32) -> (i32, i32) {
    %c0_i32 = arith.constant 0 : i32
    return %arg0, %arg1 : i32, i32
  }
}

module attributes {stable_mosaic.version = 11 : i64} {
  func.func @_matmul_kernel(%arg0: i32, %arg1: i32, %arg2: i32, %arg3: memref<128x512xbf16, #tpu.memory_space<vmem>>, %arg4: memref<512x128xbf16, #tpu.memory_space<vmem>>, %arg5: memref<1x128xf32, #tpu.memory_space<vmem>>, %arg6: memref<128x128xbf16, #tpu.memory_space<vmem>>, %arg7: memref<128x128xbf16, #tpu.memory_space<vmem>>) attributes {dimension_semantics = [#tpu.dimension_semantics<parallel>, #tpu.dimension_semantics<parallel>, #tpu.dimension_semantics<arbitrary>], iteration_bounds = array<i64: 1, 1, 1>, scalar_prefetch = 0 : i64, scratch_operands = 0 : i64, tpu.core_type = #tpu.core_type<tc>, window_params = [{transform_indices = @transform_0, window_bounds = array<i64: 128, 512>}, {transform_indices = @transform_1, window_bounds = array<i64: 512, 128>}, {transform_indices = @transform_2, window_bounds = array<i64: 1, 128>}, {transform_indices = @transform_3, window_bounds = array<i64: 128, 128>}, {transform_indices = @transform_4, window_bounds = array<i64: 128, 128>}]} {
    %c0 = arith.constant 0 : index
    %c0_0 = arith.constant 0 : index
    %0 = vector.load %arg3[%c0, %c0_0] : memref<128x512xbf16, #tpu.memory_space<vmem>>, vector<128x512xbf16>
    %c0_1 = arith.constant 0 : index
    %c0_2 = arith.constant 0 : index
    %1 = vector.load %arg4[%c0_1, %c0_2] : memref<512x128xbf16, #tpu.memory_space<vmem>>, vector<512x128xbf16>
    %cst = arith.constant dense<0.000000e+00> : vector<128x128xf32>
    %2 = tpu.matmul %0, %1, %cst {dimension_numbers = #tpu.dot_dimension_numbers<[1], [0], [0], [1], [0, 0, 1, 1], [], []>} : vector<128x512xbf16>, vector<512x128xbf16>, vector<128x128xf32> -> vector<128x128xf32>
    %c0_3 = arith.constant 0 : index
    %c0_4 = arith.constant 0 : index
    %3 = vector.load %arg5[%c0_3, %c0_4] : memref<1x128xf32, #tpu.memory_space<vmem>>, vector<1x128xf32>
    %4 = vector.broadcast %3 : vector<1x128xf32> to vector<128x128xf32>
    %5 = arith.addf %2, %4 : vector<128x128xf32>
    %c0_5 = arith.constant 0 : index
    %c0_6 = arith.constant 0 : index
    %6 = vector.load %arg6[%c0_5, %c0_6] : memref<128x128xbf16, #tpu.memory_space<vmem>>, vector<128x128xbf16>
    %7 = arith.extf %6 : vector<128x128xbf16> to vector<128x128xf32>
    %8 = arith.addf %5, %7 : vector<128x128xf32>
    %9 = arith.truncf %8 : vector<128x128xf32> to vector<128x128xbf16>
    %c0_7 = arith.constant 0 : index
    %c0_8 = arith.constant 0 : index
    %10 = vector.load %arg7[%c0_7, %c0_8] : memref<128x128xbf16, #tpu.memory_space<vmem>>, vector<128x128xbf16>
    tpu.vector_store %arg7[%c0_7, %c0_8], %9 {strides = array<i32>} : memref<128x128xbf16, #tpu.memory_space<vmem>>, vector<128x128xbf16>,
    return
  }
  func.func @transform_0(%arg0: i32, %arg1: i32, %arg2: i32) -> (i32, i32) {
    %c0_i32 = arith.constant 0 : i32
    return %arg0, %arg2 : i32, i32
  }
  func.func @transform_1(%arg0: i32, %arg1: i32, %arg2: i32) -> (i32, i32) {
    %c0_i32 = arith.constant 0 : i32
    return %arg2, %arg1 : i32, i32
  }
  func.func @transform_2(%arg0: i32, %arg1: i32, %arg2: i32) -> (i32, i32) {
    %c0_i32 = arith.constant 0 : i32
    %c0_i32_0 = arith.constant 0 : i32
    return %c0_i32, %arg1 : i32, i32
  }
  func.func @transform_3(%arg0: i32, %arg1: i32, %arg2: i32) -> (i32, i32) {
    %c0_i32 = arith.constant 0 : i32
    return %arg0, %arg1 : i32, i32
  }
  func.func @transform_4(%arg0: i32, %arg1: i32, %arg2: i32) -> (i32, i32) {
    %c0_i32 = arith.constant 0 : i32
    return %arg0, %arg1 : i32, i32
  }
}

</mosaic_0001>

<bundles_post_ra>
// kernel: reformer_classification_forward.8
= control target key start
LH: loop header
LB: loop body
LE: loop exit
PB: predicated region body
PF: predicated region fallthrough
CT: control target
= control target key end

     0   :  { %v1051_v56 = vmov 0   ;;  %s1423_s0 = inlined_call_operand.vmem [shape: bf16[128,128], index: 0, kind: input, shape index: {}]   ;;  %s1424_s3 = inlined_call_operand.vmem [shape: bf16[128,256], index: 3, kind: input, shape index: {}]   ;;  %s1425_s1 = inlined_call_operand.vmem [shape: f32[1,128], index: 1, kind: input, shape index: {}]   ;;  %s1426_s2 = inlined_call_operand.vmem [shape: f32[1,128], index: 2, kind: input, shape index: {}]   ;;  %s1427_s4 = inlined_call_operand.vmem [shape: bf16[128,256], index: 4, kind: output, shape index: {}]  }
   0x1   :  { %v959_v0 = vld [vmem:[%s1423_s0 + $0x20] sm:$0xff]   ;;  %v956_v10 = vld [vmem:[%s1423_s0 + $0x8] sm:$0xff]   ;;  %v957_v18 = vld [vmem:[%s1423_s0 + $0x10] sm:$0xff]   ;;  %597 = vmatprep.mubr.bf16.mxu0 %v1051_v56  ;;  %637 = vmatprep.mubr.bf16.mxu1 %v1051_v56 }
   0x2   :  { %v885_v1 = vld [vmem:[%s1423_s0] sm:$0xff]   ;;  %v1083_v2 = vunpack.c.l.bf16 %v959_v0  ;;  %v1089_v4 = vunpack.c.h.bf16 %v959_v0  ;;  %v1106_v11 = vunpack.c.h.bf16 %v956_v10  ;;  %v1108_v12 = vunpack.c.l.bf16 %v956_v10  ;;  %v960_v13 = vld [vmem:[%s1423_s0 + $0x28] sm:$0xff]   ;;  %v987_v21 = vld [vmem:[%s1424_s3 + $0x74] ss:$8 sps:$4 sm:$0xff]  }
   0x3   :  { %v1085_v3 = vunpack.c.l.bf16 %v885_v1  ;;  %v1091_v5 = vunpack.c.h.bf16 %v885_v1  ;;  %v1115_v14 = vunpack.c.h.bf16 %v960_v13  ;;  %v1117_v15 = vunpack.c.l.bf16 %v960_v13  ;;  %v989_v22 = vld [vmem:[%s1424_s3 + $0x70] ss:$8 sps:$4 sm:$0xff]   ;;  %565 = vmatprep.subr.bf16.mxu0 %v987_v21  ;;  %970 = vmatprep.subr.bf16.mxu1 %v987_v21  ;;  %v990_v26 = vld [vmem:[%s1424_s3 + $0x64] ss:$8 sps:$4 sm:$0xff]   ;;  %v992_v27 = vld [vmem:[%s1424_s3 + $0x60] ss:$8 sps:$4 sm:$0xff]  }
   0x4   :  { %70 = vadd.xlane.f32.xlu1 %v1083_v2  ;;  %v112_v8 = vmul.f32 %v1089_v4, %v1089_v4  ;;  %v111_v9 = vmul.f32 %v1083_v2, %v1083_v2  ;;  %v106_v16 = vmul.f32 %v1106_v11, %v1106_v11  ;;  %v105_v17 = vmul.f32 %v1108_v12, %v1108_v12  ;;  %v961_v23 = vld [vmem:[%s1423_s0 + $0x30] sm:$0xff]   ;;  %v996_v34 = vld [vmem:[%s1424_s3 + $0x44] ss:$8 sps:$4 sm:$0xff]   ;;  %v998_v35 = vld [vmem:[%s1424_s3 + $0x40] ss:$8 sps:$4 sm:$0xff]  }
   0x5   :  { %54 = vadd.xlane.f32.xlu0 %v1085_v3  ;;  %v104_v6 = vmul.f32 %v1091_v5, %v1091_v5  ;;  %v103_v7 = vmul.f32 %v1085_v3, %v1085_v3  ;;  %v114_v19 = vmul.f32 %v1115_v14, %v1115_v14  ;;  %v113_v20 = vmul.f32 %v1117_v15, %v1117_v15  ;;  %v993_v30 = vld [vmem:[%s1424_s3 + $0x54] ss:$8 sps:$4 sm:$0xff]   ;;  %v995_v31 = vld [vmem:[%s1424_s3 + $0x50] ss:$8 sps:$4 sm:$0xff]   ;;  %v1002_v44 = vld [vmem:[%s1424_s3 + $0x24] ss:$8 sps:$4 sm:$0xff]  }
   0x6   :  { %566 = vmatpush1.bf16.msra.mxu0 %v989_v22  ;;  %978 = vmatpush1.bf16.msra.mxu1 %v989_v22  ;;  %v1141_v24 = vunpack.c.h.bf16 %v957_v18  ;;  %v1143_v25 = vunpack.c.l.bf16 %v957_v18  ;;  %v1153_v28 = vunpack.c.h.bf16 %v961_v23  ;;  %v1155_v29 = vunpack.c.l.bf16 %v961_v23  ;;  %v958_v38 = vld [vmem:[%s1423_s0 + $0x18] sm:$0xff]   ;;  %v1004_v45 = vld [vmem:[%s1424_s3 + $0x20] ss:$8 sps:$4 sm:$0xff]   ;;  %v1008_v52 = vld [vmem:[%s1424_s3 + $0x4] ss:$8 sps:$4 sm:$0xff]  }
   0x7   :  { %567 = vmatprep.subr.bf16.mxu0 %v990_v26  ;;  %971 = vmatprep.subr.bf16.mxu1 %v990_v26  ;;  %v999_v39 = vld [vmem:[%s1424_s3 + $0x34] ss:$8 sps:$4 sm:$0xff]   ;;  %v1001_v40 = vld [vmem:[%s1424_s3 + $0x30] ss:$8 sps:$4 sm:$0xff]   ;;  %v1188_v41 = vunpack.c.h.bf16 %v958_v38  ;;  %v1190_v42 = vunpack.c.l.bf16 %v958_v38  ;;  %v1010_v53 = vld [vmem:[%s1424_s3] ss:$8 sps:$4 sm:$0xff]  }
   0x8   :  { %72 = vadd.xlane.f32.xlu1 %v1089_v4  ;;  %v108_v32 = vmul.f32 %v1141_v24, %v1141_v24  ;;  %v107_v33 = vmul.f32 %v1143_v25, %v1143_v25  ;;  %v116_v36 = vmul.f32 %v1153_v28, %v1153_v28  ;;  %v115_v37 = vmul.f32 %v1155_v29, %v1155_v29  ;;  %v962_v43 = vld [vmem:[%s1423_s0 + $0x38] sm:$0xff]  }
   0x9   :  { %56 = vadd.xlane.f32.xlu0 %v1091_v5  ;;  %v1203_v46 = vunpack.c.h.bf16 %v962_v43  ;;  %v1205_v47 = vunpack.c.l.bf16 %v962_v43  ;;  %v1005_v48 = vld [vmem:[%s1424_s3 + $0x14] ss:$8 sps:$4 sm:$0xff]   ;;  %v1007_v49 = vld [vmem:[%s1424_s3 + $0x10] ss:$8 sps:$4 sm:$0xff]   ;;  %v110_v50 = vmul.f32 %v1188_v41, %v1188_v41  ;;  %v109_v51 = vmul.f32 %v1190_v42, %v1190_v42 }
   0xa   :  { %568 = vmatpush1.bf16.msra.mxu0 %v992_v27  ;;  %979 = vmatpush1.bf16.msra.mxu1 %v992_v27 }
   0xb   :  { %569 = vmatprep.subr.bf16.mxu0 %v993_v30  ;;  %972 = vmatprep.subr.bf16.mxu1 %v993_v30  ;;  %v118_v54 = vmul.f32 %v1203_v46, %v1203_v46  ;;  %v117_v55 = vmul.f32 %v1205_v47, %v1205_v47 }
   0xc   :  { %121 = vadd.xlane.f32.xlu1 %v104_v6 }
   0xd   :  { %119 = vadd.xlane.f32.xlu0 %v103_v7 }
   0xe   :  { %570 = vmatpush1.bf16.msra.mxu0 %v995_v31  ;;  %980 = vmatpush1.bf16.msra.mxu1 %v995_v31 }
   0xf   :  { %571 = vmatprep.subr.bf16.mxu0 %v996_v34  ;;  %973 = vmatprep.subr.bf16.mxu1 %v996_v34 }
  0x10   :  { %137 = vadd.xlane.f32.xlu1 %v112_v8 }
  0x11   :  { %135 = vadd.xlane.f32.xlu0 %v111_v9 }
  0x12   :  { %572 = vmatpush1.bf16.msra.mxu0 %v998_v35  ;;  %981 = vmatpush1.bf16.msra.mxu1 %v998_v35 }
  0x13   :  { %573 = vmatprep.subr.bf16.mxu0 %v999_v39  ;;  %974 = vmatprep.subr.bf16.mxu1 %v999_v39 }
  0x14   :  { %60 = vadd.xlane.f32.xlu1 %v1106_v11 }
  0x15   :  { %58 = vadd.xlane.f32.xlu0 %v1108_v12 }
  0x16   :  { %574 = vmatpush1.bf16.msra.mxu0 %v1001_v40  ;;  %982 = vmatpush1.bf16.msra.mxu1 %v1001_v40 }
  0x17   :  { %575 = vmatprep.subr.bf16.mxu0 %v1002_v44  ;;  %975 = vmatprep.subr.bf16.mxu1 %v1002_v44 }
  0x18   :  { %76 = vadd.xlane.f32.xlu1 %v1115_v14 }
  0x19   :  { %74 = vadd.xlane.f32.xlu0 %v1117_v15 }
  0x1a   :  { %576 = vmatpush1.bf16.msra.mxu0 %v1004_v45  ;;  %983 = vmatpush1.bf16.msra.mxu1 %v1004_v45 }
  0x1b   :  { %577 = vmatprep.subr.bf16.mxu0 %v1005_v48  ;;  %976 = vmatprep.subr.bf16.mxu1 %v1005_v48 }
  0x1c   :  { %125 = vadd.xlane.f32.xlu1 %v106_v16 }
  0x1d   :  { %123 = vadd.xlane.f32.xlu0 %v105_v17 }
  0x1e   :  { %578 = vmatpush1.bf16.msra.mxu0 %v1007_v49  ;;  %984 = vmatpush1.bf16.msra.mxu1 %v1007_v49 }
  0x1f   :  { %579 = vmatprep.subr.bf16.mxu0 %v1008_v52  ;;  %977 = vmatprep.subr.bf16.mxu1 %v1008_v52 }
  0x20   :  { %141 = vadd.xlane.f32.xlu1 %v114_v19 }
  0x21   :  { %139 = vadd.xlane.f32.xlu0 %v113_v20 }
  0x22   :  { %580 = vmatpush1.bf16.msra.mxu0 %v1010_v53  ;;  %985 = vmatpush1.bf16.msra.mxu1 %v1010_v53 }
  0x24   :  { %64 = vadd.xlane.f32.xlu1 %v1141_v24 }
  0x25   :  { %62 = vadd.xlane.f32.xlu0 %v1143_v25 }
  0x28   :  { %80 = vadd.xlane.f32.xlu1 %v1153_v28 }
  0x29   :  { %78 = vadd.xlane.f32.xlu0 %v1155_v29 }
  0x2c   :  { %129 = vadd.xlane.f32.xlu1 %v108_v32 }
  0x2d   :  { %127 = vadd.xlane.f32.xlu0 %v107_v33 }
  0x30   :  { %145 = vadd.xlane.f32.xlu1 %v116_v36 }
  0x31   :  { %143 = vadd.xlane.f32.xlu0 %v115_v37 }
  0x34   :  { %68 = vadd.xlane.f32.xlu1 %v1188_v41 }
  0x35   :  { %66 = vadd.xlane.f32.xlu0 %v1190_v42 }
  0x38   :  { %84 = vadd.xlane.f32.xlu1 %v1203_v46 }
  0x39   :  { %82 = vadd.xlane.f32.xlu0 %v1205_v47 }
  0x3c   :  { %133 = vadd.xlane.f32.xlu1 %v110_v50 }
  0x3d   :  { %131 = vadd.xlane.f32.xlu0 %v109_v51 }
  0x40   :  { %149 = vadd.xlane.f32.xlu1 %v118_v54 }
  0x41   :  { %147 = vadd.xlane.f32.xlu0 %v117_v55 }
  0x8d   :  { %v71_v57 = vpop.xlane.xlu1 %70 }
  0x8e   :  { %v55_v58 = vpop.xlane.xlu0 %54  ;;  %v1235_v63 = vmul.f32 0.0078125, %v71_v57 }
  0x8f   :  { %v1231_v61 = vmul.f32 0.0078125, %v55_v58 }
  0x90   :  { %v175_v17 = vmul.f32 %v1235_v63, %v1235_v63 }
  0x91   :  { %v73_v59 = vpop.xlane.xlu1 %72  ;;  %v167_v7 = vmul.f32 %v1231_v61, %v1231_v61 }
  0x92   :  { %v57_v60 = vpop.xlane.xlu0 %56  ;;  %v1237_v0 = vmul.f32 0.0078125, %v73_v59 }
  0x93   :  { %v1233_v62 = vmul.f32 0.0078125, %v57_v60 }
  0x94   :  { %v176_v18 = vmul.f32 %v1237_v0, %v1237_v0 }
  0x95   :  { %v122_v1 = vpop.xlane.xlu1 %121  ;;  %v168_v8 = vmul.f32 %v1233_v62, %v1233_v62  ;;  %v216_v58 = vsub.f32 %v1091_v5, %v1233_v62 }
  0x96   :  { %v120_v6 = vpop.xlane.xlu0 %119  ;;  %v152_v9 = vmul.f32 0.0078125, %v122_v1 }
  0x97   :  { %v151_v10 = vmul.f32 0.0078125, %v120_v6 }
  0x98   :  { %v184_v13 = vsub.f32 %v152_v9, %v168_v8 }
  0x99   :  { %v183_v16 = vsub.f32 %v151_v10, %v167_v7  ;;  %v138_v19 = vpop.xlane.xlu1 %137 }
  0x9a   :  { %v136_v20 = vpop.xlane.xlu0 %135  ;;  %v200_v21 = vmax.f32 %v184_v13, 0.0  ;;  %v160_v23 = vmul.f32 0.0078125, %v138_v19  ;;  %v215_v13 = vsub.f32 %v1085_v3, %v1231_v61 }
  0x9b   :  { %v199_v22 = vmax.f32 %v183_v16, 0.0  ;;  %v159_v26 = vmul.f32 0.0078125, %v136_v20  ;;  %v1268_v16 = vld [vmem:[%s1425_s1] ss:$0 sm:$0xff] }
  0x9c   :  { %v232_v27 = vadd.f32 1e-05, %v200_v21  ;;  %v192_v31 = vsub.f32 %v160_v23, %v176_v18  ;;  %v1275_v21 = vld [vmem:[%s1426_s2] ss:$0 sm:$0xff] }
  0x9d   :  { %v231_v30 = vadd.f32 1e-05, %v199_v22  ;;  %v191_v32 = vsub.f32 %v159_v26, %v175_v17  ;;  %v61_v33 = vpop.xlane.xlu1 %60  ;;  %v224_v26 = vsub.f32 %v1089_v4, %v1237_v0 }
  0x9e   :  { %v59_v34 = vpop.xlane.xlu0 %58  ;;  %1019 = vrsqrt.f32 %v232_v27  ;;  %v208_v35 = vmax.f32 %v192_v31, 0.0  ;;  %v1247_v43 = vmul.f32 0.0078125, %v61_v33 }
  0x9f   :  { %v207_v36 = vmax.f32 %v191_v32, 0.0  ;;  %1021 = vrsqrt.f32 %v231_v30  ;;  %v1249_v44 = vmul.f32 0.0078125, %v59_v34  ;;  %v223_v32 = vsub.f32 %v1083_v2, %v1235_v63 }
  0xa0   :  { %v240_v37 = vadd.f32 1e-05, %v208_v35  ;;  %v170_v50 = vmul.f32 %v1247_v43, %v1247_v43 }
  0xa1   :  { %v239_v38 = vadd.f32 1e-05, %v207_v36  ;;  %v77_v39 = vpop.xlane.xlu1 %76  ;;  %v169_v51 = vmul.f32 %v1249_v44, %v1249_v44 }
  0xa2   :  { %v75_v40 = vpop.xlane.xlu0 %74  ;;  %1023 = vrsqrt.f32 %v240_v37  ;;  %v1251_v45 = vmul.f32 0.0078125, %v77_v39 }
  0xa3   :  { %1025 = vrsqrt.f32 %v239_v38  ;;  %v1257_v54 = vmul.f32 0.0078125, %v75_v40 }
  0xa4   :  { %v178_v59 = vmul.f32 %v1251_v45, %v1251_v45 }
  0xa5   :  { %v126_v48 = vpop.xlane.xlu1 %125  ;;  %v177_v5 = vmul.f32 %v1257_v54, %v1257_v54 }
  0xa6   :  { %v124_v49 = vpop.xlane.xlu0 %123  ;;  %v154_v52 = vmul.f32 0.0078125, %v126_v48 }
  0xa7   :  { %v153_v53 = vmul.f32 0.0078125, %v124_v49 }
  0xa8   :  { %v186_v55 = vsub.f32 %v154_v52, %v170_v50 }
  0xa9   :  { %v185_v57 = vsub.f32 %v153_v53, %v169_v51  ;;  %v142_v60 = vpop.xlane.xlu1 %141 }
  0xaa   :  { %v140_v1 = vpop.xlane.xlu0 %139  ;;  %v202_v6 = vmax.f32 %v186_v55, 0.0  ;;  %v162_v8 = vmul.f32 0.0078125, %v142_v60 }
  0xab   :  { %v201_v7 = vmax.f32 %v185_v57, 0.0  ;;  %v161_v9 = vmul.f32 0.0078125, %v140_v1  ;;  %v1020_v10 = vpop.eup %1019 }
  0xac   :  { %v1022_v62 = vpop.eup %1021  ;;  %v264_v17 = vmul.f32 %v1020_v10, %v216_v58  ;;  %v234_v18 = vadd.f32 1e-05, %v202_v6  ;;  %v194_v20 = vsub.f32 %v162_v8, %v178_v59 }
  0xad   :  { %v233_v19 = vadd.f32 1e-05, %v201_v7  ;;  %v263_v22 = vmul.f32 %v1022_v62, %v215_v13  ;;  %v193_v3 = vsub.f32 %v161_v9, %v177_v5  ;;  %v65_v61 = vpop.xlane.xlu1 %64  ;;  %v218_v13 = vsub.f32 %v1106_v11, %v1247_v43 }
  0xae   :  { %v63_v23 = vpop.xlane.xlu0 %62  ;;  %v287_v27 = vmul.f32 %v1268_v16, %v264_v17  ;;  %1027 = vrsqrt.f32 %v234_v18  ;;  %v210_v30 = vmax.f32 %v194_v20, 0.0  ;;  %v1286_v50 = vmul.f32 0.0078125, %v65_v61 }
  0xaf   :  { %v1024_v31 = vpop.eup %1023  ;;  %v286_v33 = vmul.f32 %v1268_v16, %v263_v22  ;;  %1029 = vrsqrt.f32 %v233_v19  ;;  %v209_v34 = vmax.f32 %v193_v3, 0.0  ;;  %v1288_v2 = vmul.f32 0.0078125, %v63_v23 }
  0xb0   :  { %v1026_v35 = vpop.eup %1025  ;;  %v310_v36 = vadd.f32 %v1275_v21, %v287_v27  ;;  %v272_v37 = vmul.f32 %v1024_v31, %v224_v26  ;;  %v242_v38 = vadd.f32 1e-05, %v210_v30  ;;  %v172_v59 = vmul.f32 %v1286_v50, %v1286_v50 }
  0xb1   :  { %v309_v39 = vadd.f32 %v1275_v21, %v286_v33  ;;  %v271_v4 = vmul.f32 %v1026_v35, %v223_v32  ;;  %v241_v0 = vadd.f32 1e-05, %v209_v34  ;;  %v81_v40 = vpop.xlane.xlu1 %80  ;;  %v171_v60 = vmul.f32 %v1288_v2, %v1288_v2 }
  0xb2   :  { %v79_v48 = vpop.xlane.xlu0 %78  ;;  %v295_v49 = vmul.f32 %v1268_v16, %v272_v37  ;;  %1031 = vrsqrt.f32 %v242_v38  ;;  %v1293_v55 = vmul.f32 0.0078125, %v81_v40  ;;  %v217_v61 = vsub.f32 %v1108_v12, %v1249_v44 }
  0xb3   :  { %v919_v63 = vpack.c.bf16 %v310_v36, %v309_v39  ;;  %v294_v51 = vmul.f32 %v1268_v16, %v271_v4  ;;  %1033 = vrsqrt.f32 %v241_v0  ;;  %v1299_v8 = vmul.f32 0.0078125, %v79_v48 }
  0xb4   :  { %v318_v52 = vadd.f32 %v1275_v21, %v295_v49  ;;  %v180_v5 = vmul.f32 %v1293_v55, %v1293_v55  ;;  %v226_v36 = vsub.f32 %v1115_v14, %v1251_v45  ;;  %v225_v38 = vsub.f32 %v1117_v15, %v1257_v54 }
  0xb5   :  { %920 = vst [vmem:[#allocation2] sm:$0xff] %v919_v63   ;;  %v317_v53 = vadd.f32 %v1275_v21, %v294_v51  ;;  %v130_v57 = vpop.xlane.xlu1 %129  ;;  %v179_v23 = vmul.f32 %v1299_v8, %v1299_v8 }
  0xb6   :  { %v128_v58 = vpop.xlane.xlu0 %127  ;;  %v156_v1 = vmul.f32 0.0078125, %v130_v57 }
  0xb7   :  { %v155_v6 = vmul.f32 0.0078125, %v128_v58  ;;  %v939_v7 = vpack.c.bf16 %v318_v52, %v317_v53 }
  0xb8   :  { %v188_v9 = vsub.f32 %v156_v1, %v172_v59 }
  0xb9   :  { %v187_v10 = vsub.f32 %v155_v6, %v171_v60  ;;  %966 = vst [vmem:[#allocation2 + $0x20] sm:$0xff] %v939_v7   ;;  %v146_v62 = vpop.xlane.xlu1 %145 }
  0xba   :  { %v144_v17 = vpop.xlane.xlu0 %143  ;;  %v204_v18 = vmax.f32 %v188_v9, 0.0  ;;  %v164_v20 = vmul.f32 0.0078125, %v146_v62 }
  0xbb   :  { %v203_v19 = vmax.f32 %v187_v10, 0.0  ;;  %v163_v22 = vmul.f32 0.0078125, %v144_v17  ;;  %v1028_v3 = vpop.eup %1027 }
  0xbc   :  { %v1030_v26 = vpop.eup %1029  ;;  %v266_v27 = vmul.f32 %v1028_v3, %v218_v13  ;;  %v236_v30 = vadd.f32 1e-05, %v204_v18  ;;  %v196_v43 = vsub.f32 %v164_v20, %v180_v5  ;;  %v1011_v35 = vld [vmem:[#allocation2] sm:$0xff]  }
  0xbd   :  { %v235_v11 = vadd.f32 1e-05, %v203_v19  ;;  %v265_v31 = vmul.f32 %v1030_v26, %v217_v61  ;;  %v195_v32 = vsub.f32 %v163_v22, %v179_v23  ;;  %v69_v33 = vpop.xlane.xlu1 %68  ;;  %598 = vmatmul.mubr.bf16.vlgmr.msra.gmra.mxu0 %v1011_v35  ;;  %v220_v22 = vsub.f32 %v1141_v24, %v1286_v50 }
  0xbe   :  { %v67_v34 = vpop.xlane.xlu0 %66  ;;  %v289_v37 = vmul.f32 %v1268_v16, %v266_v27  ;;  %1035 = vrsqrt.f32 %v236_v30  ;;  %v212_v12 = vmax.f32 %v196_v43, 0.0  ;;  %607 = vmatprep.mubr.bf16.mxu0 %v1051_v56  ;;  %v1319_v54 = vmul.f32 0.0078125, %v69_v33 }
  0xbf   :  { %v1032_v44 = vpop.eup %1031  ;;  %v288_v39 = vmul.f32 %v1268_v16, %v265_v31  ;;  %1037 = vrsqrt.f32 %v235_v11  ;;  %v211_v4 = vmax.f32 %v195_v32, 0.0  ;;  %v1321_v57 = vmul.f32 0.0078125, %v67_v34 }
  0xc0   :  { %v1034_v0 = vpop.eup %1033  ;;  %v312_v40 = vadd.f32 %v1275_v21, %v289_v37  ;;  %v274_v48 = vmul.f32 %v1032_v44, %v226_v36  ;;  %v244_v49 = vadd.f32 1e-05, %v212_v12  ;;  %v1012_v53 = vld [vmem:[#allocation2 + $0x20] sm:$0xff]   ;;  %v174_v10 = vmul.f32 %v1319_v54, %v1319_v54 }
  0xc1   :  { %v311_v14 = vadd.f32 %v1275_v21, %v288_v39  ;;  %v273_v45 = vmul.f32 %v1034_v0, %v225_v38  ;;  %v243_v63 = vadd.f32 1e-05, %v211_v4  ;;  %v85_v51 = vpop.xlane.xlu1 %84  ;;  %638 = vmatmul.mubr.bf16.vlgmr.msra.gmra.mxu1 %v1012_v53  ;;  %v173_v13 = vmul.f32 %v1321_v57, %v1321_v57 }
  0xc2   :  { %v83_v52 = vpop.xlane.xlu0 %82  ;;  %v297_v15 = vmul.f32 %v1268_v16, %v274_v48  ;;  %1039 = vrsqrt.f32 %v244_v49  ;;  %647 = vmatprep.mubr.bf16.mxu1 %v1051_v56  ;;  %v1327_v6 = vmul.f32 0.0078125, %v85_v51  ;;  %v219_v31 = vsub.f32 %v1143_v25, %v1288_v2 }
  0xc3   :  { %v924_v58 = vpack.c.bf16 %v312_v40, %v311_v14  ;;  %v296_v59 = vmul.f32 %v1268_v16, %v273_v45  ;;  %1041 = vrsqrt.f32 %v243_v63  ;;  %v1333_v18 = vmul.f32 0.0078125, %v83_v52 }
  0xc4   :  { %v320_v60 = vadd.f32 %v1275_v21, %v297_v15  ;;  %v182_v3 = vmul.f32 %v1327_v6, %v1327_v6  ;;  %v228_v44 = vsub.f32 %v1153_v28, %v1293_v55  ;;  %v227_v25 = vsub.f32 %v1155_v29, %v1299_v8 }
  0xc5   :  { %963 = vst [vmem:[#allocation2 + $0x8] sm:$0xff] %v924_v58   ;;  %v319_v1 = vadd.f32 %v1275_v21, %v296_v59  ;;  %v134_v7 = vpop.xlane.xlu1 %133  ;;  %v181_v32 = vmul.f32 %v1333_v18, %v1333_v18  ;;  %v222_v58 = vsub.f32 %v1188_v41, %v1319_v54 }
  0xc6   :  { %v132_v9 = vpop.xlane.xlu0 %131  ;;  %v158_v5 = vmul.f32 0.0078125, %v134_v7 }
  0xc7   :  { %v157_v62 = vmul.f32 0.0078125, %v132_v9  ;;  %v944_v17 = vpack.c.bf16 %v320_v60, %v319_v1  ;;  %v221_v60 = vsub.f32 %v1190_v42, %v1321_v57 }
  0xc8   :  { %v190_v19 = vsub.f32 %v158_v5, %v174_v10 }
  0xc9   :  { %v189_v20 = vsub.f32 %v157_v62, %v173_v13  ;;  %967 = vst [vmem:[#allocation2 + $0x28] sm:$0xff] %v944_v17   ;;  %v150_v61 = vpop.xlane.xlu1 %149  ;;  %v230_v13 = vsub.f32 %v1203_v46, %v1327_v6  ;;  %v229_v17 = vsub.f32 %v1205_v47, %v1333_v18 }
  0xca   :  { %v148_v23 = vpop.xlane.xlu0 %147  ;;  %v206_v26 = vmax.f32 %v190_v19, 0.0  ;;  %v166_v30 = vmul.f32 0.0078125, %v150_v61 }
  0xcb   :  { %v205_v27 = vmax.f32 %v189_v20, 0.0  ;;  %v165_v11 = vmul.f32 0.0078125, %v148_v23  ;;  %v1036_v43 = vpop.eup %1035 }
  0xcc   :  { %v1038_v33 = vpop.eup %1037  ;;  %v268_v34 = vmul.f32 %v1036_v43, %v220_v22  ;;  %v238_v35 = vadd.f32 1e-05, %v206_v26  ;;  %v198_v50 = vsub.f32 %v166_v30, %v182_v3  ;;  %v1013_v12 = vld [vmem:[#allocation2 + $0x8] sm:$0xff]  }
  0xcd   :  { %v237_v24 = vadd.f32 1e-05, %v205_v27  ;;  %v267_v36 = vmul.f32 %v1038_v33, %v219_v31  ;;  %v197_v37 = vsub.f32 %v165_v11, %v181_v32  ;;  %608 = vmatmul.mubr.bf16.gmra.mxu0 %v1013_v12 }
  0xce   :  { %v291_v38 = vmul.f32 %v1268_v16, %v268_v34  ;;  %1043 = vrsqrt.f32 %v238_v35  ;;  %v214_v39 = vmax.f32 %v198_v50, 0.0  ;;  %617 = vmatprep.mubr.bf16.mxu0 %v1051_v56 }
  0xcf   :  { %v1040_v4 = vpop.eup %1039  ;;  %v290_v2 = vmul.f32 %v1268_v16, %v267_v36  ;;  %1045 = vrsqrt.f32 %v237_v24  ;;  %v213_v0 = vmax.f32 %v197_v37, 0.0 }
  0xd0   :  { %v1042_v40 = vpop.eup %1041  ;;  %v314_v48 = vadd.f32 %v1275_v21, %v291_v38  ;;  %v276_v49 = vmul.f32 %v1040_v4, %v228_v44  ;;  %v246_v14 = vadd.f32 1e-05, %v214_v39  ;;  %v1014_v63 = vld [vmem:[#allocation2 + $0x28] sm:$0xff]  }
  0xd1   :  { %v313_v28 = vadd.f32 %v1275_v21, %v290_v2  ;;  %v275_v55 = vmul.f32 %v1042_v40, %v227_v25  ;;  %v245_v45 = vadd.f32 1e-05, %v213_v0  ;;  %648 = vmatmul.mubr.bf16.gmra.mxu1 %v1014_v63 }
  0xd2   :  { %v299_v51 = vmul.f32 %v1268_v16, %v276_v49  ;;  %1047 = vrsqrt.f32 %v246_v14  ;;  %657 = vmatprep.mubr.bf16.mxu1 %v1051_v56 }
  0xd3   :  { %v929_v29 = vpack.c.bf16 %v314_v48, %v313_v28  ;;  %v298_v8 = vmul.f32 %v1268_v16, %v275_v55  ;;  %1049 = vrsqrt.f32 %v245_v45 }
  0xd4   :  { %v322_v52 = vadd.f32 %v1275_v21, %v299_v51 }
  0xd5   :  { %964 = vst [vmem:[#allocation2 + $0x10] sm:$0xff] %v929_v29   ;;  %v321_v53 = vadd.f32 %v1275_v21, %v298_v8 }
  0xd7   :  { %v949_v15 = vpack.c.bf16 %v322_v52, %v321_v53 }
  0xd9   :  { %968 = vst [vmem:[#allocation2 + $0x30] sm:$0xff] %v949_v15  }
  0xdb   :  { %v1044_v59 = vpop.eup %1043 }
  0xdc   :  { %v1046_v1 = vpop.eup %1045  ;;  %v270_v7 = vmul.f32 %v1044_v59, %v222_v58  ;;  %v1015_v9 = vld [vmem:[#allocation2 + $0x10] sm:$0xff]  }
  0xdd   :  { %v269_v10 = vmul.f32 %v1046_v1, %v221_v60  ;;  %618 = vmatmul.mubr.bf16.gmra.mxu0 %v1015_v9 }
  0xde   :  { %v293_v5 = vmul.f32 %v1268_v16, %v270_v7  ;;  %627 = vmatprep.mubr.bf16.mxu0 %v1051_v56 }
  0xdf   :  { %v1048_v62 = vpop.eup %1047  ;;  %v292_v41 = vmul.f32 %v1268_v16, %v269_v10 }
  0xe0   :  { %v1050_v54 = vpop.eup %1049  ;;  %v316_v42 = vadd.f32 %v1275_v21, %v293_v5  ;;  %v278_v57 = vmul.f32 %v1048_v62, %v230_v13  ;;  %v1016_v19 = vld [vmem:[#allocation2 + $0x30] sm:$0xff]  }
  0xe1   :  { %v315_v20 = vadd.f32 %v1275_v21, %v292_v41  ;;  %v277_v22 = vmul.f32 %v1050_v54, %v229_v17  ;;  %658 = vmatmul.mubr.bf16.gmra.mxu1 %v1016_v19 }
  0xe2   :  { %v301_v46 = vmul.f32 %v1268_v16, %v278_v57  ;;  %667 = vmatprep.mubr.bf16.mxu1 %v1051_v56 }
  0xe3   :  { %v934_v6 = vpack.c.bf16 %v316_v42, %v315_v20  ;;  %v300_v3 = vmul.f32 %v1268_v16, %v277_v22 }
  0xe4   :  { %v324_v47 = vadd.f32 %v1275_v21, %v301_v46 }
  0xe5   :  { %965 = vst [vmem:[#allocation2 + $0x18] sm:$0xff] %v934_v6   ;;  %v323_v18 = vadd.f32 %v1275_v21, %v300_v3 }
  0xe7   :  { %v954_v61 = vpack.c.bf16 %v324_v47, %v323_v18 }
  0xe9   :  { %969 = vst [vmem:[#allocation2 + $0x38] sm:$0xff] %v954_v61  }
  0xec   :  { %v1017_v23 = vld [vmem:[#allocation2 + $0x18] sm:$0xff]  }
  0xed   :  { %628 = vmatmul.mubr.bf16.gmra.mxu0 %v1017_v23 }
  0xf0   :  { %v1018_v26 = vld [vmem:[#allocation2 + $0x38] sm:$0xff]  }
  0xf1   :  { %668 = vmatmul.mubr.bf16.gmra.mxu1 %v1018_v26 }
 0x17d   :  { %v599_v27 = vpop.f32.mrf.mxu0 }
 0x17f   :  { %v601_v30 = vpop.f32.mrf.mxu0 }
 0x180   :  { %v868_v11 = vpack.c.bf16 %v601_v30, %v599_v27 }
 0x181   :  { %v603_v43 = vpop.f32.mrf.mxu0  ;;  %v639_v31 = vpop.f32.mrf.mxu1 }
 0x182   :  { %774 = vst [vmem:[%s1427_s4] sm:$0xff] %v868_v11 }
 0x183   :  { %v605_v56 = vpop.f32.mrf.mxu0  ;;  %v641_v16 = vpop.f32.mrf.mxu1 }
 0x184   :  { %v869_v32 = vpack.c.bf16 %v605_v56, %v603_v43  ;;  %v876_v33 = vpack.c.bf16 %v641_v16, %v639_v31 }
 0x185   :  { %v643_v21 = vpop.f32.mrf.mxu1 }
 0x186   :  { %775 = vst [vmem:[%s1427_s4 + $0x8] sm:$0xff] %v869_v32  ;;  %782 = vst [vmem:[%s1427_s4 + $0x40] sm:$0xff] %v876_v33 }
 0x187   :  { %v645_v34 = vpop.f32.mrf.mxu1 }
 0x188   :  { %v877_v35 = vpack.c.bf16 %v645_v34, %v643_v21 }
 0x18a   :  { %783 = vst [vmem:[%s1427_s4 + $0x48] sm:$0xff] %v877_v35 }
 0x18d   :  { %v609_v24 = vpop.f32.mrf.mxu0 }
 0x18f   :  { %v611_v50 = vpop.f32.mrf.mxu0 }
 0x190   :  { %v870_v36 = vpack.c.bf16 %v611_v50, %v609_v24 }
 0x191   :  { %v613_v37 = vpop.f32.mrf.mxu0  ;;  %v649_v12 = vpop.f32.mrf.mxu1 }
 0x192   :  { %776 = vst [vmem:[%s1427_s4 + $0x10] sm:$0xff] %v870_v36 }
 0x193   :  { %v615_v44 = vpop.f32.mrf.mxu0  ;;  %v651_v38 = vpop.f32.mrf.mxu1 }
 0x194   :  { %v871_v39 = vpack.c.bf16 %v615_v44, %v613_v37  ;;  %v878_v4 = vpack.c.bf16 %v651_v38, %v649_v12 }
 0x195   :  { %v653_v25 = vpop.f32.mrf.mxu1 }
 0x196   :  { %777 = vst [vmem:[%s1427_s4 + $0x18] sm:$0xff] %v871_v39  ;;  %784 = vst [vmem:[%s1427_s4 + $0x50] sm:$0xff] %v878_v4 }
 0x197   :  { %v655_v2 = vpop.f32.mrf.mxu1 }
 0x198   :  { %v879_v0 = vpack.c.bf16 %v655_v2, %v653_v25 }
 0x19a   :  { %785 = vst [vmem:[%s1427_s4 + $0x58] sm:$0xff] %v879_v0 }
 0x19d   :  { %v619_v40 = vpop.f32.mrf.mxu0 }
 0x19f   :  { %v621_v48 = vpop.f32.mrf.mxu0 }
 0x1a0   :  { %v872_v49 = vpack.c.bf16 %v621_v48, %v619_v40 }
 0x1a1   :  { %v623_v14 = vpop.f32.mrf.mxu0  ;;  %v659_v28 = vpop.f32.mrf.mxu1 }
 0x1a2   :  { %778 = vst [vmem:[%s1427_s4 + $0x20] sm:$0xff] %v872_v49 }
 0x1a3   :  { %v625_v55 = vpop.f32.mrf.mxu0  ;;  %v661_v45 = vpop.f32.mrf.mxu1 }
 0x1a4   :  { %v873_v63 = vpack.c.bf16 %v625_v55, %v623_v14  ;;  %v880_v51 = vpack.c.bf16 %v661_v45, %v659_v28 }
 0x1a5   :  { %v663_v29 = vpop.f32.mrf.mxu1 }
 0x1a6   :  { %779 = vst [vmem:[%s1427_s4 + $0x28] sm:$0xff] %v873_v63  ;;  %786 = vst [vmem:[%s1427_s4 + $0x60] sm:$0xff] %v880_v51 }
 0x1a7   :  { %v665_v8 = vpop.f32.mrf.mxu1 }
 0x1a8   :  { %v881_v52 = vpack.c.bf16 %v665_v8, %v663_v29 }
 0x1aa   :  { %787 = vst [vmem:[%s1427_s4 + $0x68] sm:$0xff] %v881_v52 }
 0x1ad   :  { %v629_v53 = vpop.f32.mrf.mxu0 }
 0x1af   :  { %v631_v15 = vpop.f32.mrf.mxu0 }
 0x1b0   :  { %v874_v58 = vpack.c.bf16 %v631_v15, %v629_v53 }
 0x1b1   :  { %v633_v59 = vpop.f32.mrf.mxu0  ;;  %v669_v60 = vpop.f32.mrf.mxu1 }
 0x1b2   :  { %780 = vst [vmem:[%s1427_s4 + $0x30] sm:$0xff] %v874_v58 }
 0x1b3   :  { %v635_v1 = vpop.f32.mrf.mxu0  ;;  %v671_v7 = vpop.f32.mrf.mxu1 }
 0x1b4   :  { %v875_v9 = vpack.c.bf16 %v635_v1, %v633_v59  ;;  %v882_v10 = vpack.c.bf16 %v671_v7, %v669_v60 }
 0x1b5   :  { %v673_v13 = vpop.f32.mrf.mxu1 }
 0x1b6   :  { %781 = vst [vmem:[%s1427_s4 + $0x38] sm:$0xff] %v875_v9  ;;  %788 = vst [vmem:[%s1427_s4 + $0x70] sm:$0xff] %v882_v10 }
 0x1b7   :  { %v675_v5 = vpop.f32.mrf.mxu1 }
 0x1b8   :  { %v883_v62 = vpack.c.bf16 %v675_v5, %v673_v13 }
 0x1ba   :  { %789 = vst [vmem:[%s1427_s4 + $0x78] sm:$0xff] %v883_v62 }

// kernel: reformer_classification_forward.11
= control target key start
LH: loop header
LB: loop body
LE: loop exit
PB: predicated region body
PF: predicated region fallthrough
CT: control target
= control target key end

     0   :  { %s1476_s1 = inlined_call_operand.vmem [shape: bf16[512,128], index: 1, kind: input, shape index: {}]   ;;  %s1477_s0 = inlined_call_operand.vmem [shape: bf16[128,512], index: 0, kind: input, shape index: {}]   ;;  %s1478_s2 = inlined_call_operand.vmem [shape: f32[1,128], index: 2, kind: input, shape index: {}]   ;;  %s1479_s3 = inlined_call_operand.vmem [shape: bf16[128,128], index: 3, kind: input, shape index: {}]   ;;  %s1480_s4 = inlined_call_operand.vmem [shape: bf16[128,128], index: 4, kind: output, shape index: {}]  }
   0x1   :  { %v1110_v0 = vld [vmem:[%s1476_s1 + $0x78] sm:$0xff]   ;;  %v1114_v4 = vld [vmem:[%s1476_s1 + $0x70] sm:$0xff]   ;;  %v1118_v8 = vld [vmem:[%s1476_s1 + $0x68] sm:$0xff]  }
   0x2   :  { %v1111_v1 = vld [vmem:[%s1476_s1 + $0xf8] sm:$0xff]   ;;  %982 = vmatprep.subr.bf16.mxu0 %v1110_v0  ;;  %v1115_v5 = vld [vmem:[%s1476_s1 + $0xf0] sm:$0xff]   ;;  %v1119_v9 = vld [vmem:[%s1476_s1 + $0xe8] sm:$0xff]  }
   0x3   :  { %v1112_v2 = vld [vmem:[%s1476_s1 + $0x38] sm:$0xff]   ;;  %1046 = vmatprep.subr.bf16.mxu1 %v1111_v1  ;;  %v1116_v6 = vld [vmem:[%s1476_s1 + $0x30] sm:$0xff]   ;;  %v1120_v10 = vld [vmem:[%s1476_s1 + $0x28] sm:$0xff]  }
   0x4   :  { %v1113_v3 = vld [vmem:[%s1476_s1 + $0xb8] sm:$0xff]   ;;  %983 = vmatpush3.bf16.msra.mxu0 %v1112_v2  ;;  %v1117_v7 = vld [vmem:[%s1476_s1 + $0xb0] sm:$0xff]   ;;  %v1121_v11 = vld [vmem:[%s1476_s1 + $0xa8] sm:$0xff]  }
   0x5   :  { %1047 = vmatpush3.bf16.msra.mxu1 %v1113_v3  ;;  %984 = vmatprep.subr.bf16.mxu0 %v1114_v4  ;;  %v1122_v12 = vld [vmem:[%s1476_s1 + $0x60] sm:$0xff]   ;;  %v1126_v16 = vld [vmem:[%s1476_s1 + $0x58] sm:$0xff]   ;;  %v1130_v20 = vld [vmem:[%s1476_s1 + $0x50] sm:$0xff]  }
   0x6   :  { %1048 = vmatprep.subr.bf16.mxu1 %v1115_v5  ;;  %v1123_v13 = vld [vmem:[%s1476_s1 + $0xe0] sm:$0xff]   ;;  %v1127_v17 = vld [vmem:[%s1476_s1 + $0xd8] sm:$0xff]   ;;  %v1131_v21 = vld [vmem:[%s1476_s1 + $0xd0] sm:$0xff]  }
   0x7   :  { %v1124_v14 = vld [vmem:[%s1476_s1 + $0x20] sm:$0xff]   ;;  %v1128_v18 = vld [vmem:[%s1476_s1 + $0x18] sm:$0xff]   ;;  %v1132_v22 = vld [vmem:[%s1476_s1 + $0x10] sm:$0xff]  }
   0x8   :  { %985 = vmatpush3.bf16.msra.mxu0 %v1116_v6  ;;  %v1125_v15 = vld [vmem:[%s1476_s1 + $0xa0] sm:$0xff]   ;;  %v1129_v19 = vld [vmem:[%s1476_s1 + $0x98] sm:$0xff]   ;;  %v1133_v23 = vld [vmem:[%s1476_s1 + $0x90] sm:$0xff]  }
   0x9   :  { %1049 = vmatpush3.bf16.msra.mxu1 %v1117_v7  ;;  %986 = vmatprep.subr.bf16.mxu0 %v1118_v8  ;;  %v1134_v24 = vld [vmem:[%s1476_s1 + $0x48] sm:$0xff]   ;;  %v1138_v28 = vld [vmem:[%s1476_s1 + $0x40] sm:$0xff]  }
   0xa   :  { %1050 = vmatprep.subr.bf16.mxu1 %v1119_v9  ;;  %v1135_v25 = vld [vmem:[%s1476_s1 + $0xc8] sm:$0xff]   ;;  %v1139_v29 = vld [vmem:[%s1476_s1 + $0xc0] sm:$0xff]  }
   0xb   :  { %v1136_v26 = vld [vmem:[%s1476_s1 + $0x8] sm:$0xff]   ;;  %v1140_v30 = vld [vmem:[%s1476_s1] sm:$0xff]  }
   0xc   :  { %987 = vmatpush3.bf16.msra.mxu0 %v1120_v10  ;;  %v1137_v27 = vld [vmem:[%s1476_s1 + $0x88] sm:$0xff]   ;;  %v1141_v31 = vld [vmem:[%s1476_s1 + $0x80] sm:$0xff]  }
   0xd   :  { %1051 = vmatpush3.bf16.msra.mxu1 %v1121_v11  ;;  %988 = vmatprep.subr.bf16.mxu0 %v1122_v12  ;;  %v1142_v32 = vld [vmem:[%s1477_s0] ss:$16 sps:$4 sm:$0xff]   ;;  %v1144_v33 = vld [vmem:[%s1477_s0 + $0x4] ss:$16 sps:$4 sm:$0xff]   ;;  %v1145_v34 = vld [vmem:[%s1477_s0 + $0x8] ss:$16 sps:$4 sm:$0xff]  }
   0xe   :  { %1052 = vmatprep.subr.bf16.mxu1 %v1123_v13  ;;  %v1147_v35 = vld [vmem:[%s1477_s0 + $0xc] ss:$16 sps:$4 sm:$0xff]   ;;  %505 = vmatprep.mubr.bf16.mxu0 %v1144_v33  ;;  %v1148_v36 = vld [vmem:[%s1477_s0 + $0x24] ss:$16 sps:$4 sm:$0xff]   ;;  %v1152_v38 = vld [vmem:[%s1477_s0 + $0x20] ss:$16 sps:$4 sm:$0xff]  }
   0xf   :  { %602 = vmatprep.mubr.bf16.mxu1 %v1147_v35  ;;  %v1150_v37 = vld [vmem:[%s1477_s0 + $0x2c] ss:$16 sps:$4 sm:$0xff]   ;;  %v1153_v39 = vld [vmem:[%s1477_s0 + $0x28] ss:$16 sps:$4 sm:$0xff]   ;;  %v1154_v40 = vld [vmem:[%s1477_s0 + $0x44] ss:$16 sps:$4 sm:$0xff]  }
  0x10   :  { %989 = vmatpush3.bf16.msra.mxu0 %v1124_v14  ;;  %v1156_v41 = vld [vmem:[%s1477_s0 + $0x4c] ss:$16 sps:$4 sm:$0xff]   ;;  %v1158_v42 = vld [vmem:[%s1477_s0 + $0x40] ss:$16 sps:$4 sm:$0xff]   ;;  %v1159_v43 = vld [vmem:[%s1477_s0 + $0x48] ss:$16 sps:$4 sm:$0xff]  }
  0x11   :  { %1053 = vmatpush3.bf16.msra.mxu1 %v1125_v15  ;;  %990 = vmatprep.subr.bf16.mxu0 %v1126_v16  ;;  %v1160_v44 = vld [vmem:[%s1477_s0 + $0x64] ss:$16 sps:$4 sm:$0xff]   ;;  %v1162_v45 = vld [vmem:[%s1477_s0 + $0x6c] ss:$16 sps:$4 sm:$0xff]   ;;  %v1164_v46 = vld [vmem:[%s1477_s0 + $0x60] ss:$16 sps:$4 sm:$0xff]  }
  0x12   :  { %1054 = vmatprep.subr.bf16.mxu1 %v1127_v17  ;;  %v1165_v47 = vld [vmem:[%s1477_s0 + $0x68] ss:$16 sps:$4 sm:$0xff]   ;;  %v1166_v48 = vld [vmem:[%s1477_s0 + $0x84] ss:$16 sps:$4 sm:$0xff]   ;;  %v1168_v49 = vld [vmem:[%s1477_s0 + $0x8c] ss:$16 sps:$4 sm:$0xff]  }
  0x13   :  { %v1170_v50 = vld [vmem:[%s1477_s0 + $0x80] ss:$16 sps:$4 sm:$0xff]   ;;  %v1171_v51 = vld [vmem:[%s1477_s0 + $0x88] ss:$16 sps:$4 sm:$0xff]   ;;  %v1172_v52 = vld [vmem:[%s1477_s0 + $0xa4] ss:$16 sps:$4 sm:$0xff]  }
  0x14   :  { %991 = vmatpush3.bf16.msra.mxu0 %v1128_v18  ;;  %v1174_v53 = vld [vmem:[%s1477_s0 + $0xac] ss:$16 sps:$4 sm:$0xff]   ;;  %v1176_v54 = vld [vmem:[%s1477_s0 + $0xa0] ss:$16 sps:$4 sm:$0xff]   ;;  %v1177_v55 = vld [vmem:[%s1477_s0 + $0xa8] ss:$16 sps:$4 sm:$0xff]  }
  0x15   :  { %1055 = vmatpush3.bf16.msra.mxu1 %v1129_v19  ;;  %992 = vmatprep.subr.bf16.mxu0 %v1130_v20  ;;  %v1178_v56 = vld [vmem:[%s1477_s0 + $0xc4] ss:$16 sps:$4 sm:$0xff]   ;;  %v1180_v57 = vld [vmem:[%s1477_s0 + $0xcc] ss:$16 sps:$4 sm:$0xff]   ;;  %v1182_v58 = vld [vmem:[%s1477_s0 + $0xc0] ss:$16 sps:$4 sm:$0xff]  }
  0x16   :  { %1056 = vmatprep.subr.bf16.mxu1 %v1131_v21  ;;  %v1183_v59 = vld [vmem:[%s1477_s0 + $0xc8] ss:$16 sps:$4 sm:$0xff]   ;;  %v1184_v60 = vld [vmem:[%s1477_s0 + $0xe4] ss:$16 sps:$4 sm:$0xff]   ;;  %v1186_v61 = vld [vmem:[%s1477_s0 + $0xec] ss:$16 sps:$4 sm:$0xff]  }
  0x17   :  { %v1188_v62 = vld [vmem:[%s1477_s0 + $0xe0] ss:$16 sps:$4 sm:$0xff]   ;;  %v1189_v63 = vld [vmem:[%s1477_s0 + $0xe8] ss:$16 sps:$4 sm:$0xff]  }
  0x18   :  { %993 = vmatpush3.bf16.msra.mxu0 %v1132_v22  ;;  %v1410_v2 = vld [vmem:[%s1478_s2] ss:$0 sm:$0xff] }
  0x19   :  { %1057 = vmatpush3.bf16.msra.mxu1 %v1133_v23  ;;  %994 = vmatprep.subr.bf16.mxu0 %v1134_v24  ;;  %v897_v8 = vld [vmem:[%s1479_s3] sm:$0xff]  }
  0x1a   :  { %1058 = vmatprep.subr.bf16.mxu1 %v1135_v25  ;;  %v898_v14 = vunpack.c.l.bf16 %v897_v8  ;;  %v899_v19 = vunpack.c.h.bf16 %v897_v8 }
  0x1c   :  { %995 = vmatpush3.bf16.msra.mxu0 %v1136_v26 }
  0x1d   :  { %1059 = vmatpush3.bf16.msra.mxu1 %v1137_v27  ;;  %996 = vmatprep.subr.bf16.mxu0 %v1138_v28 }
  0x1e   :  { %1060 = vmatprep.subr.bf16.mxu1 %v1139_v29  ;;  %v968_v29 = vld [vmem:[%s1479_s3 + $0x8] sm:$0xff]  }
  0x20   :  { %997 = vmatpush3.bf16.msra.mxu0 %v1140_v30 }
  0x21   :  { %1061 = vmatpush3.bf16.msra.mxu1 %v1141_v31 }
  0x23   :  { %506 = vmatmul.mubr.bf16.vlgmr.msra.gmra.mxu0 %v1142_v32 }
  0x24   :  { %603 = vmatmul.mubr.bf16.vlgmr.msra.gmra.mxu1 %v1145_v34  ;;  %513 = vmatprep.mubr.bf16.mxu0 %v1148_v36  ;;  %v902_v36 = vunpack.c.l.bf16 %v968_v29 }
  0x25   :  { %610 = vmatprep.mubr.bf16.mxu1 %v1150_v37 }
  0x2b   :  { %514 = vmatmul.mubr.bf16.gmra.mxu0 %v1152_v38 }
  0x2c   :  { %611 = vmatmul.mubr.bf16.gmra.mxu1 %v1153_v39  ;;  %521 = vmatprep.mubr.bf16.mxu0 %v1154_v40 }
  0x2d   :  { %618 = vmatprep.mubr.bf16.mxu1 %v1156_v41  ;;  %v903_v41 = vunpack.c.h.bf16 %v968_v29 }
  0x33   :  { %522 = vmatmul.mubr.bf16.gmra.mxu0 %v1158_v42 }
  0x34   :  { %619 = vmatmul.mubr.bf16.gmra.mxu1 %v1159_v43  ;;  %529 = vmatprep.mubr.bf16.mxu0 %v1160_v44 }
  0x35   :  { %626 = vmatprep.mubr.bf16.mxu1 %v1162_v45 }
  0x3b   :  { %530 = vmatmul.mubr.bf16.gmra.mxu0 %v1164_v46 }
  0x3c   :  { %627 = vmatmul.mubr.bf16.gmra.mxu1 %v1165_v47  ;;  %537 = vmatprep.mubr.bf16.mxu0 %v1166_v48 }
  0x3d   :  { %634 = vmatprep.mubr.bf16.mxu1 %v1168_v49 }
  0x43   :  { %538 = vmatmul.mubr.bf16.gmra.mxu0 %v1170_v50 }
  0x44   :  { %635 = vmatmul.mubr.bf16.gmra.mxu1 %v1171_v51  ;;  %545 = vmatprep.mubr.bf16.mxu0 %v1172_v52  ;;  %v969_v51 = vld [vmem:[%s1479_s3 + $0x10] sm:$0xff]  }
  0x45   :  { %642 = vmatprep.mubr.bf16.mxu1 %v1174_v53 }
  0x4b   :  { %546 = vmatmul.mubr.bf16.gmra.mxu0 %v1176_v54 }
  0x4c   :  { %643 = vmatmul.mubr.bf16.gmra.mxu1 %v1177_v55  ;;  %553 = vmatprep.mubr.bf16.mxu0 %v1178_v56 }
  0x4d   :  { %650 = vmatprep.mubr.bf16.mxu1 %v1180_v57 }
  0x53   :  { %554 = vmatmul.mubr.bf16.gmra.mxu0 %v1182_v58  ;;  %v906_v58 = vunpack.c.l.bf16 %v969_v51 }
  0x54   :  { %651 = vmatmul.mubr.bf16.gmra.mxu1 %v1183_v59  ;;  %561 = vmatprep.mubr.bf16.mxu0 %v1184_v60 }
  0x55   :  { %658 = vmatprep.mubr.bf16.mxu1 %v1186_v61 }
  0x5b   :  { %562 = vmatmul.mubr.bf16.gmra.mxu0 %v1188_v62 }
  0x5c   :  { %659 = vmatmul.mubr.bf16.gmra.mxu1 %v1189_v63  ;;  %v907_v63 = vunpack.c.h.bf16 %v969_v51 }
  0xe3   :  { %v998_v0 = vpop.f32.mrf.mxu0 }
  0xe4   :  { %v1062_v1 = vpop.f32.mrf.mxu1 }
  0xe5   :  { %v999_v3 = vpop.f32.mrf.mxu0 }
  0xe6   :  { %v1000_v4 = vadd.f32 %v999_v3, %v998_v0  ;;  %v1063_v5 = vpop.f32.mrf.mxu1 }
  0xe7   :  { %v1001_v6 = vpop.f32.mrf.mxu0  ;;  %v1064_v11 = vadd.f32 %v1063_v5, %v1062_v1 }
  0xe8   :  { %v508_v7 = vadd.f32 %v1000_v4, %v1410_v2  ;;  %v1065_v9 = vpop.f32.mrf.mxu1 }
  0xe9   :  { %v1002_v10 = vpop.f32.mrf.mxu0 }
  0xea   :  { %v1003_v12 = vadd.f32 %v1002_v10, %v1001_v6  ;;  %v1066_v13 = vpop.f32.mrf.mxu1  ;;  %v605_v16 = vadd.f32 %v1064_v11, %v508_v7  ;;  %v970_v10 = vld [vmem:[%s1479_s3 + $0x18] sm:$0xff]  }
  0xeb   :  { %v1004_v15 = vpop.f32.mrf.mxu0  ;;  %v1067_v18 = vadd.f32 %v1066_v13, %v1065_v9 }
  0xec   :  { %v511_v17 = vadd.f32 %v1003_v12, %v1410_v2  ;;  %v1068_v20 = vpop.f32.mrf.mxu1  ;;  %v699_v26 = vadd.f32 %v898_v14, %v605_v16 }
  0xed   :  { %v1005_v21 = vpop.f32.mrf.mxu0 }
  0xee   :  { %v608_v22 = vadd.f32 %v1067_v18, %v511_v17  ;;  %v1006_v23 = vadd.f32 %v1005_v21, %v1004_v15  ;;  %v1069_v24 = vpop.f32.mrf.mxu1  ;;  %v910_v17 = vunpack.c.l.bf16 %v970_v10 }
  0xef   :  { %v1007_v25 = vpop.f32.mrf.mxu0  ;;  %v1070_v33 = vadd.f32 %v1069_v24, %v1068_v20 }
  0xf0   :  { %v700_v27 = vadd.f32 %v899_v19, %v608_v22  ;;  %v516_v28 = vadd.f32 %v1006_v23, %v1410_v2  ;;  %v1071_v30 = vpop.f32.mrf.mxu1  ;;  %v911_v22 = vunpack.c.h.bf16 %v970_v10 }
  0xf1   :  { %v1008_v31 = vpop.f32.mrf.mxu0 }
  0xf2   :  { %v931_v32 = vpack.c.bf16 %v700_v27, %v699_v26  ;;  %v1009_v34 = vadd.f32 %v1008_v31, %v1007_v25  ;;  %v1072_v35 = vpop.f32.mrf.mxu1  ;;  %v613_v38 = vadd.f32 %v1070_v33, %v516_v28 }
  0xf3   :  { %v1010_v37 = vpop.f32.mrf.mxu0  ;;  %v1073_v40 = vadd.f32 %v1072_v35, %v1071_v30 }
  0xf4   :  { %932 = vst [vmem:[%s1480_s4] sm:$0xff] %v931_v32   ;;  %v519_v39 = vadd.f32 %v1009_v34, %v1410_v2  ;;  %v1074_v42 = vpop.f32.mrf.mxu1  ;;  %v701_v48 = vadd.f32 %v902_v36, %v613_v38  ;;  %v971_v32 = vld [vmem:[%s1479_s3 + $0x20] sm:$0xff]  }
  0xf5   :  { %v1011_v43 = vpop.f32.mrf.mxu0 }
  0xf6   :  { %v616_v44 = vadd.f32 %v1073_v40, %v519_v39  ;;  %v1012_v45 = vadd.f32 %v1011_v43, %v1010_v37  ;;  %v1075_v46 = vpop.f32.mrf.mxu1  ;;  %v914_v39 = vunpack.c.l.bf16 %v971_v32 }
  0xf7   :  { %v1013_v47 = vpop.f32.mrf.mxu0  ;;  %v1076_v55 = vadd.f32 %v1075_v46, %v1074_v42 }
  0xf8   :  { %v702_v49 = vadd.f32 %v903_v41, %v616_v44  ;;  %v524_v50 = vadd.f32 %v1012_v45, %v1410_v2  ;;  %v1077_v52 = vpop.f32.mrf.mxu1  ;;  %v915_v44 = vunpack.c.h.bf16 %v971_v32 }
  0xf9   :  { %v1014_v53 = vpop.f32.mrf.mxu0 }
  0xfa   :  { %v936_v54 = vpack.c.bf16 %v702_v49, %v701_v48  ;;  %v1015_v56 = vadd.f32 %v1014_v53, %v1013_v47  ;;  %v1078_v57 = vpop.f32.mrf.mxu1  ;;  %v621_v60 = vadd.f32 %v1076_v55, %v524_v50 }
  0xfb   :  { %v1016_v59 = vpop.f32.mrf.mxu0  ;;  %v1079_v62 = vadd.f32 %v1078_v57, %v1077_v52 }
  0xfc   :  { %975 = vst [vmem:[%s1480_s4 + $0x8] sm:$0xff] %v936_v54   ;;  %v527_v61 = vadd.f32 %v1015_v56, %v1410_v2  ;;  %v1080_v0 = vpop.f32.mrf.mxu1  ;;  %v703_v7 = vadd.f32 %v906_v58, %v621_v60  ;;  %v972_v54 = vld [vmem:[%s1479_s3 + $0x28] sm:$0xff]  }
  0xfd   :  { %v1017_v1 = vpop.f32.mrf.mxu0 }
  0xfe   :  { %v624_v3 = vadd.f32 %v1079_v62, %v527_v61  ;;  %v1018_v4 = vadd.f32 %v1017_v1, %v1016_v59  ;;  %v1081_v5 = vpop.f32.mrf.mxu1  ;;  %v918_v61 = vunpack.c.l.bf16 %v972_v54 }
  0xff   :  { %v1019_v6 = vpop.f32.mrf.mxu0  ;;  %v1082_v14 = vadd.f32 %v1081_v5, %v1080_v0 }
 0x100   :  { %v704_v8 = vadd.f32 %v907_v63, %v624_v3  ;;  %v532_v9 = vadd.f32 %v1018_v4, %v1410_v2  ;;  %v1083_v11 = vpop.f32.mrf.mxu1  ;;  %v919_v3 = vunpack.c.h.bf16 %v972_v54 }
 0x101   :  { %v1020_v12 = vpop.f32.mrf.mxu0 }
 0x102   :  { %v941_v13 = vpack.c.bf16 %v704_v8, %v703_v7  ;;  %v1021_v15 = vadd.f32 %v1020_v12, %v1019_v6  ;;  %v1084_v16 = vpop.f32.mrf.mxu1  ;;  %v629_v19 = vadd.f32 %v1082_v14, %v532_v9 }
 0x103   :  { %v1022_v18 = vpop.f32.mrf.mxu0  ;;  %v1085_v21 = vadd.f32 %v1084_v16, %v1083_v11 }
 0x104   :  { %976 = vst [vmem:[%s1480_s4 + $0x10] sm:$0xff] %v941_v13   ;;  %v535_v20 = vadd.f32 %v1021_v15, %v1410_v2  ;;  %v1086_v23 = vpop.f32.mrf.mxu1  ;;  %v705_v29 = vadd.f32 %v910_v17, %v629_v19  ;;  %v973_v13 = vld [vmem:[%s1479_s3 + $0x30] sm:$0xff]  }
 0x105   :  { %v1023_v24 = vpop.f32.mrf.mxu0 }
 0x106   :  { %v632_v25 = vadd.f32 %v1085_v21, %v535_v20  ;;  %v1024_v26 = vadd.f32 %v1023_v24, %v1022_v18  ;;  %v1087_v27 = vpop.f32.mrf.mxu1  ;;  %v922_v20 = vunpack.c.l.bf16 %v973_v13 }
 0x107   :  { %v1025_v28 = vpop.f32.mrf.mxu0  ;;  %v1088_v36 = vadd.f32 %v1087_v27, %v1086_v23 }
 0x108   :  { %v706_v30 = vadd.f32 %v911_v22, %v632_v25  ;;  %v540_v31 = vadd.f32 %v1024_v26, %v1410_v2  ;;  %v1089_v33 = vpop.f32.mrf.mxu1  ;;  %v923_v25 = vunpack.c.h.bf16 %v973_v13 }
 0x109   :  { %v1026_v34 = vpop.f32.mrf.mxu0 }
 0x10a   :  { %v946_v35 = vpack.c.bf16 %v706_v30, %v705_v29  ;;  %v1027_v37 = vadd.f32 %v1026_v34, %v1025_v28  ;;  %v1090_v38 = vpop.f32.mrf.mxu1  ;;  %v637_v41 = vadd.f32 %v1088_v36, %v540_v31 }
 0x10b   :  { %v1028_v40 = vpop.f32.mrf.mxu0  ;;  %v1091_v43 = vadd.f32 %v1090_v38, %v1089_v33 }
 0x10c   :  { %977 = vst [vmem:[%s1480_s4 + $0x18] sm:$0xff] %v946_v35   ;;  %v543_v42 = vadd.f32 %v1027_v37, %v1410_v2  ;;  %v1092_v45 = vpop.f32.mrf.mxu1  ;;  %v707_v51 = vadd.f32 %v914_v39, %v637_v41  ;;  %v974_v35 = vld [vmem:[%s1479_s3 + $0x38] sm:$0xff]  }
 0x10d   :  { %v1029_v46 = vpop.f32.mrf.mxu0 }
 0x10e   :  { %v640_v47 = vadd.f32 %v1091_v43, %v543_v42  ;;  %v1030_v48 = vadd.f32 %v1029_v46, %v1028_v40  ;;  %v1093_v49 = vpop.f32.mrf.mxu1  ;;  %v926_v42 = vunpack.c.l.bf16 %v974_v35  ;;  %v927_v46 = vunpack.c.h.bf16 %v974_v35 }
 0x10f   :  { %v1031_v50 = vpop.f32.mrf.mxu0  ;;  %v1094_v58 = vadd.f32 %v1093_v49, %v1092_v45 }
 0x110   :  { %v708_v52 = vadd.f32 %v915_v44, %v640_v47  ;;  %v548_v53 = vadd.f32 %v1030_v48, %v1410_v2  ;;  %v1095_v55 = vpop.f32.mrf.mxu1 }
 0x111   :  { %v1032_v56 = vpop.f32.mrf.mxu0 }
 0x112   :  { %v951_v57 = vpack.c.bf16 %v708_v52, %v707_v51  ;;  %v1033_v59 = vadd.f32 %v1032_v56, %v1031_v50  ;;  %v1096_v60 = vpop.f32.mrf.mxu1  ;;  %v645_v63 = vadd.f32 %v1094_v58, %v548_v53 }
 0x113   :  { %v1034_v62 = vpop.f32.mrf.mxu0  ;;  %v1097_v1 = vadd.f32 %v1096_v60, %v1095_v55 }
 0x114   :  { %978 = vst [vmem:[%s1480_s4 + $0x20] sm:$0xff] %v951_v57   ;;  %v551_v0 = vadd.f32 %v1033_v59, %v1410_v2  ;;  %v1098_v4 = vpop.f32.mrf.mxu1  ;;  %v709_v10 = vadd.f32 %v918_v61, %v645_v63 }
 0x115   :  { %v1035_v5 = vpop.f32.mrf.mxu0 }
 0x116   :  { %v648_v6 = vadd.f32 %v1097_v1, %v551_v0  ;;  %v1036_v7 = vadd.f32 %v1035_v5, %v1034_v62  ;;  %v1099_v8 = vpop.f32.mrf.mxu1 }
 0x117   :  { %v1037_v9 = vpop.f32.mrf.mxu0  ;;  %v1100_v17 = vadd.f32 %v1099_v8, %v1098_v4 }
 0x118   :  { %v710_v11 = vadd.f32 %v919_v3, %v648_v6  ;;  %v556_v12 = vadd.f32 %v1036_v7, %v1410_v2  ;;  %v1101_v14 = vpop.f32.mrf.mxu1 }
 0x119   :  { %v1038_v15 = vpop.f32.mrf.mxu0 }
 0x11a   :  { %v956_v16 = vpack.c.bf16 %v710_v11, %v709_v10  ;;  %v1039_v18 = vadd.f32 %v1038_v15, %v1037_v9  ;;  %v1102_v19 = vpop.f32.mrf.mxu1  ;;  %v653_v22 = vadd.f32 %v1100_v17, %v556_v12 }
 0x11b   :  { %v1040_v21 = vpop.f32.mrf.mxu0  ;;  %v1103_v24 = vadd.f32 %v1102_v19, %v1101_v14 }
 0x11c   :  { %979 = vst [vmem:[%s1480_s4 + $0x28] sm:$0xff] %v956_v16   ;;  %v559_v23 = vadd.f32 %v1039_v18, %v1410_v2  ;;  %v1104_v26 = vpop.f32.mrf.mxu1  ;;  %v711_v32 = vadd.f32 %v922_v20, %v653_v22 }
 0x11d   :  { %v1041_v27 = vpop.f32.mrf.mxu0 }
 0x11e   :  { %v656_v28 = vadd.f32 %v1103_v24, %v559_v23  ;;  %v1042_v29 = vadd.f32 %v1041_v27, %v1040_v21  ;;  %v1105_v30 = vpop.f32.mrf.mxu1 }
 0x11f   :  { %v1043_v31 = vpop.f32.mrf.mxu0  ;;  %v1106_v39 = vadd.f32 %v1105_v30, %v1104_v26 }
 0x120   :  { %v712_v33 = vadd.f32 %v923_v25, %v656_v28  ;;  %v564_v34 = vadd.f32 %v1042_v29, %v1410_v2  ;;  %v1107_v36 = vpop.f32.mrf.mxu1 }
 0x121   :  { %v1044_v37 = vpop.f32.mrf.mxu0 }
 0x122   :  { %v961_v38 = vpack.c.bf16 %v712_v33, %v711_v32  ;;  %v1045_v40 = vadd.f32 %v1044_v37, %v1043_v31  ;;  %v1108_v41 = vpop.f32.mrf.mxu1  ;;  %v661_v43 = vadd.f32 %v1106_v39, %v564_v34 }
 0x123   :  { %v1109_v45 = vadd.f32 %v1108_v41, %v1107_v36 }
 0x124   :  { %980 = vst [vmem:[%s1480_s4 + $0x30] sm:$0xff] %v961_v38   ;;  %v567_v44 = vadd.f32 %v1045_v40, %v1410_v2  ;;  %v713_v48 = vadd.f32 %v926_v42, %v661_v43 }
 0x126   :  { %v664_v47 = vadd.f32 %v1109_v45, %v567_v44 }
 0x128   :  { %v714_v49 = vadd.f32 %v927_v46, %v664_v47 }
 0x12a   :  { %v966_v50 = vpack.c.bf16 %v714_v49, %v713_v48 }
 0x12c   :  { %981 = vst [vmem:[%s1480_s4 + $0x38] sm:$0xff] %v966_v50  }

// kernel: reformer_classification_forward.10
= control target key start
LH: loop header
LB: loop body
LE: loop exit
PB: predicated region body
PF: predicated region fallthrough
CT: control target
= control target key end

     0   :  { %s3158_s0 = inlined_call_operand.vmem [shape: bf16[128,128], index: 0, kind: input, shape index: {}]   ;;  %s3159_s3 = inlined_call_operand.vmem [shape: bf16[128,512], index: 3, kind: input, shape index: {}]   ;;  %s3160_s1 = inlined_call_operand.vmem [shape: f32[1,128], index: 1, kind: input, shape index: {}]   ;;  %s3161_s2 = inlined_call_operand.vmem [shape: f32[1,128], index: 2, kind: input, shape index: {}]   ;;  %s3162_s4 = inlined_call_operand.vmem [shape: f32[1,512], index: 4, kind: input, shape index: {}]   ;;  %s3163_s5 = inlined_call_operand.vmem [shape: bf16[128,512], index: 5, kind: output, shape index: {}]  }
   0x1   :  { %v1855_v0 = vld [vmem:[%s3158_s0] sm:$0xff]   ;;  %v1926_v4 = vld [vmem:[%s3158_s0 + $0x8] sm:$0xff]   ;;  %v1927_v9 = vld [vmem:[%s3158_s0 + $0x10] sm:$0xff]  }
   0x2   :  { %v2191_v1 = vunpack.c.l.bf16 %v1855_v0  ;;  %v2193_v2 = vunpack.c.h.bf16 %v1855_v0  ;;  %v2204_v6 = vunpack.c.l.bf16 %v1926_v4  ;;  %v2206_v7 = vunpack.c.h.bf16 %v1926_v4  ;;  %v1928_v14 = vld [vmem:[%s3158_s0 + $0x18] sm:$0xff]   ;;  %v1941_v18 = vld [vmem:[%s3159_s3 + $0xe4] ss:$16 sps:$4 sm:$0xff]   ;;  %v1945_v22 = vld [vmem:[%s3159_s3 + $0xe0] ss:$16 sps:$4 sm:$0xff]  }
   0x3   :  { %v2217_v11 = vunpack.c.l.bf16 %v1927_v9  ;;  %v2219_v12 = vunpack.c.h.bf16 %v1927_v9  ;;  %v2230_v16 = vunpack.c.l.bf16 %v1928_v14  ;;  %v2232_v17 = vunpack.c.h.bf16 %v1928_v14  ;;  %v1929_v19 = vld [vmem:[%s3158_s0 + $0x20] sm:$0xff]   ;;  %v1943_v20 = vld [vmem:[%s3159_s3 + $0xec] ss:$16 sps:$4 sm:$0xff]   ;;  %686 = vmatprep.subr.bf16.mxu0 %v1941_v18  ;;  %v1946_v23 = vld [vmem:[%s3159_s3 + $0xe8] ss:$16 sps:$4 sm:$0xff]  }
   0x4   :  { %57 = vadd.xlane.f32.xlu0 %v2191_v1  ;;  %v106_v3 = vmul.f32 %v2191_v1, %v2191_v1  ;;  %v107_v5 = vmul.f32 %v2193_v2, %v2193_v2  ;;  %v108_v8 = vmul.f32 %v2204_v6, %v2204_v6  ;;  %v109_v10 = vmul.f32 %v2206_v7, %v2206_v7  ;;  %v1947_v25 = vld [vmem:[%s3159_s3 + $0xc4] ss:$16 sps:$4 sm:$0xff]   ;;  %v1949_v26 = vld [vmem:[%s3159_s3 + $0xcc] ss:$16 sps:$4 sm:$0xff]   ;;  %v1951_v27 = vld [vmem:[%s3159_s3 + $0xc0] ss:$16 sps:$4 sm:$0xff]  }
   0x5   :  { %v110_v13 = vmul.f32 %v2217_v11, %v2217_v11  ;;  %v111_v15 = vmul.f32 %v2219_v12, %v2219_v12  ;;  %v112_v21 = vmul.f32 %v2230_v16, %v2230_v16  ;;  %799 = vmatprep.subr.bf16.mxu1 %v1943_v20  ;;  %v113_v24 = vmul.f32 %v2232_v17, %v2232_v17  ;;  %v1952_v28 = vld [vmem:[%s3159_s3 + $0xc8] ss:$16 sps:$4 sm:$0xff]   ;;  %v1953_v31 = vld [vmem:[%s3159_s3 + $0xa4] ss:$16 sps:$4 sm:$0xff]   ;;  %v1955_v32 = vld [vmem:[%s3159_s3 + $0xac] ss:$16 sps:$4 sm:$0xff]  }
   0x6   :  { %122 = vadd.xlane.f32.xlu1 %v106_v3  ;;  %687 = vmatpush1.bf16.msra.mxu0 %v1945_v22  ;;  %v2267_v29 = vunpack.c.l.bf16 %v1929_v19  ;;  %v2269_v30 = vunpack.c.h.bf16 %v1929_v19  ;;  %v1930_v33 = vld [vmem:[%s3158_s0 + $0x28] sm:$0xff]   ;;  %v1957_v34 = vld [vmem:[%s3159_s3 + $0xa0] ss:$16 sps:$4 sm:$0xff]   ;;  %v1959_v38 = vld [vmem:[%s3159_s3 + $0x84] ss:$16 sps:$4 sm:$0xff]  }
   0x7   :  { %800 = vmatpush1.bf16.msra.mxu1 %v1946_v23  ;;  %688 = vmatprep.subr.bf16.mxu0 %v1947_v25  ;;  %v1958_v35 = vld [vmem:[%s3159_s3 + $0xa8] ss:$16 sps:$4 sm:$0xff]   ;;  %v1961_v39 = vld [vmem:[%s3159_s3 + $0x8c] ss:$16 sps:$4 sm:$0xff]   ;;  %v1963_v40 = vld [vmem:[%s3159_s3 + $0x80] ss:$16 sps:$4 sm:$0xff]   ;;  %v2304_v42 = vunpack.c.l.bf16 %v1930_v33  ;;  %v2306_v43 = vunpack.c.h.bf16 %v1930_v33 }
   0x8   :  { %59 = vadd.xlane.f32.xlu0 %v2193_v2  ;;  %801 = vmatprep.subr.bf16.mxu1 %v1949_v26  ;;  %v114_v36 = vmul.f32 %v2267_v29, %v2267_v29  ;;  %v115_v37 = vmul.f32 %v2269_v30, %v2269_v30  ;;  %v1964_v41 = vld [vmem:[%s3159_s3 + $0x88] ss:$16 sps:$4 sm:$0xff]   ;;  %v1965_v44 = vld [vmem:[%s3159_s3 + $0x64] ss:$16 sps:$4 sm:$0xff]   ;;  %v1967_v45 = vld [vmem:[%s3159_s3 + $0x6c] ss:$16 sps:$4 sm:$0xff]  }
   0x9   :  { %v1969_v46 = vld [vmem:[%s3159_s3 + $0x60] ss:$16 sps:$4 sm:$0xff]   ;;  %v1970_v47 = vld [vmem:[%s3159_s3 + $0x68] ss:$16 sps:$4 sm:$0xff]   ;;  %v116_v48 = vmul.f32 %v2304_v42, %v2304_v42  ;;  %v117_v50 = vmul.f32 %v2306_v43, %v2306_v43  ;;  %v1971_v51 = vld [vmem:[%s3159_s3 + $0x44] ss:$16 sps:$4 sm:$0xff]  }
   0xa   :  { %124 = vadd.xlane.f32.xlu1 %v107_v5  ;;  %689 = vmatpush1.bf16.msra.mxu0 %v1951_v27  ;;  %v1931_v49 = vld [vmem:[%s3158_s0 + $0x30] sm:$0xff]   ;;  %v1973_v52 = vld [vmem:[%s3159_s3 + $0x4c] ss:$16 sps:$4 sm:$0xff]   ;;  %v1976_v54 = vld [vmem:[%s3159_s3 + $0x48] ss:$16 sps:$4 sm:$0xff]  }
   0xb   :  { %802 = vmatpush1.bf16.msra.mxu1 %v1952_v28  ;;  %690 = vmatprep.subr.bf16.mxu0 %v1953_v31  ;;  %v1975_v53 = vld [vmem:[%s3159_s3 + $0x40] ss:$16 sps:$4 sm:$0xff]   ;;  %v2341_v55 = vunpack.c.l.bf16 %v1931_v49  ;;  %v2343_v56 = vunpack.c.h.bf16 %v1931_v49  ;;  %v1977_v57 = vld [vmem:[%s3159_s3 + $0x24] ss:$16 sps:$4 sm:$0xff]   ;;  %v1979_v58 = vld [vmem:[%s3159_s3 + $0x2c] ss:$16 sps:$4 sm:$0xff]  }
   0xc   :  { %61 = vadd.xlane.f32.xlu0 %v2204_v6  ;;  %803 = vmatprep.subr.bf16.mxu1 %v1955_v32  ;;  %v1981_v59 = vld [vmem:[%s3159_s3 + $0x20] ss:$16 sps:$4 sm:$0xff]   ;;  %v1982_v60 = vld [vmem:[%s3159_s3 + $0x28] ss:$16 sps:$4 sm:$0xff]   ;;  %v1983_v0 = vld [vmem:[%s3159_s3 + $0x4] ss:$16 sps:$4 sm:$0xff]  }
   0xd   :  { %v118_v61 = vmul.f32 %v2341_v55, %v2341_v55  ;;  %v1932_v62 = vld [vmem:[%s3158_s0 + $0x38] sm:$0xff]   ;;  %v119_v63 = vmul.f32 %v2343_v56, %v2343_v56  ;;  %v1987_v4 = vld [vmem:[%s3159_s3] ss:$16 sps:$4 sm:$0xff]  }
   0xe   :  { %63 = vadd.xlane.f32.xlu1 %v2206_v7  ;;  %691 = vmatpush1.bf16.msra.mxu0 %v1957_v34  ;;  %v1985_v3 = vld [vmem:[%s3159_s3 + $0xc] ss:$16 sps:$4 sm:$0xff]   ;;  %v1988_v5 = vld [vmem:[%s3159_s3 + $0x8] ss:$16 sps:$4 sm:$0xff]   ;;  %v2380_v9 = vunpack.c.h.bf16 %v1932_v62 }
   0xf   :  { %804 = vmatpush1.bf16.msra.mxu1 %v1958_v35  ;;  %692 = vmatprep.subr.bf16.mxu0 %v1959_v38 }
  0x10   :  { %126 = vadd.xlane.f32.xlu0 %v108_v8  ;;  %805 = vmatprep.subr.bf16.mxu1 %v1961_v39  ;;  %v2378_v8 = vunpack.c.l.bf16 %v1932_v62  ;;  %v121_v14 = vmul.f32 %v2380_v9, %v2380_v9 }
  0x12   :  { %128 = vadd.xlane.f32.xlu1 %v109_v10  ;;  %693 = vmatpush1.bf16.msra.mxu0 %v1963_v40  ;;  %v2157_v10 = vmov 0  }
  0x13   :  { %806 = vmatpush1.bf16.msra.mxu1 %v1964_v41  ;;  %694 = vmatprep.subr.bf16.mxu0 %v1965_v44 }
  0x14   :  { %65 = vadd.xlane.f32.xlu0 %v2217_v11  ;;  %807 = vmatprep.subr.bf16.mxu1 %v1967_v45 }
  0x15   :  { %718 = vmatprep.mubr.bf16.mxu0 %v2157_v10  ;;  %831 = vmatprep.mubr.bf16.mxu1 %v2157_v10 }
  0x16   :  { %67 = vadd.xlane.f32.xlu1 %v2219_v12  ;;  %695 = vmatpush1.bf16.msra.mxu0 %v1969_v46 }
  0x17   :  { %808 = vmatpush1.bf16.msra.mxu1 %v1970_v47  ;;  %696 = vmatprep.subr.bf16.mxu0 %v1971_v51 }
  0x18   :  { %130 = vadd.xlane.f32.xlu0 %v110_v13  ;;  %809 = vmatprep.subr.bf16.mxu1 %v1973_v52  ;;  %v120_v13 = vmul.f32 %v2378_v8, %v2378_v8 }
  0x1a   :  { %132 = vadd.xlane.f32.xlu1 %v111_v15  ;;  %697 = vmatpush1.bf16.msra.mxu0 %v1975_v53 }
  0x1b   :  { %810 = vmatpush1.bf16.msra.mxu1 %v1976_v54  ;;  %698 = vmatprep.subr.bf16.mxu0 %v1977_v57 }
  0x1c   :  { %69 = vadd.xlane.f32.xlu0 %v2230_v16  ;;  %811 = vmatprep.subr.bf16.mxu1 %v1979_v58 }
  0x1e   :  { %71 = vadd.xlane.f32.xlu1 %v2232_v17  ;;  %699 = vmatpush1.bf16.msra.mxu0 %v1981_v59 }
  0x1f   :  { %812 = vmatpush1.bf16.msra.mxu1 %v1982_v60  ;;  %700 = vmatprep.subr.bf16.mxu0 %v1983_v0 }
  0x20   :  { %134 = vadd.xlane.f32.xlu0 %v112_v21  ;;  %813 = vmatprep.subr.bf16.mxu1 %v1985_v3 }
  0x22   :  { %136 = vadd.xlane.f32.xlu1 %v113_v24  ;;  %701 = vmatpush1.bf16.msra.mxu0 %v1987_v4 }
  0x23   :  { %814 = vmatpush1.bf16.msra.mxu1 %v1988_v5 }
  0x24   :  { %73 = vadd.xlane.f32.xlu0 %v2267_v29 }
  0x26   :  { %75 = vadd.xlane.f32.xlu1 %v2269_v30 }
  0x28   :  { %138 = vadd.xlane.f32.xlu0 %v114_v36 }
  0x2a   :  { %140 = vadd.xlane.f32.xlu1 %v115_v37 }
  0x2c   :  { %77 = vadd.xlane.f32.xlu0 %v2304_v42 }
  0x2e   :  { %79 = vadd.xlane.f32.xlu1 %v2306_v43 }
  0x30   :  { %142 = vadd.xlane.f32.xlu0 %v116_v48 }
  0x32   :  { %144 = vadd.xlane.f32.xlu1 %v117_v50 }
  0x34   :  { %81 = vadd.xlane.f32.xlu0 %v2341_v55 }
  0x36   :  { %83 = vadd.xlane.f32.xlu1 %v2343_v56 }
  0x38   :  { %146 = vadd.xlane.f32.xlu0 %v118_v61 }
  0x3a   :  { %148 = vadd.xlane.f32.xlu1 %v119_v63 }
  0x3c   :  { %85 = vadd.xlane.f32.xlu0 %v2378_v8 }
  0x3e   :  { %87 = vadd.xlane.f32.xlu1 %v2380_v9 }
  0x40   :  { %150 = vadd.xlane.f32.xlu0 %v120_v13 }
  0x42   :  { %152 = vadd.xlane.f32.xlu1 %v121_v14 }
  0x8d   :  { %v58_v15 = vpop.xlane.xlu0 %57 }
  0x8e   :  { %v90_v18 = vmul.f32 0.0078125, %v58_v15 }
  0x8f   :  { %v123_v19 = vpop.xlane.xlu1 %122 }
  0x90   :  { %v170_v20 = vmul.f32 %v90_v18, %v90_v18  ;;  %v154_v21 = vmul.f32 0.0078125, %v123_v19  ;;  %v218_v62 = vsub.f32 %v2191_v1, %v90_v18 }
  0x91   :  { %v60_v22 = vpop.xlane.xlu0 %59 }
  0x92   :  { %v186_v23 = vsub.f32 %v154_v21, %v170_v20  ;;  %v91_v24 = vmul.f32 0.0078125, %v60_v22  ;;  %v2412_v21 = vld [vmem:[%s3160_s1] ss:$0 sm:$0xff] }
  0x93   :  { %v125_v25 = vpop.xlane.xlu1 %124 }
  0x94   :  { %v202_v26 = vmax.f32 %v186_v23, 0.0  ;;  %v171_v27 = vmul.f32 %v91_v24, %v91_v24  ;;  %v155_v28 = vmul.f32 0.0078125, %v125_v25  ;;  %v219_v18 = vsub.f32 %v2193_v2, %v91_v24 }
  0x95   :  { %v62_v31 = vpop.xlane.xlu0 %61 }
  0x96   :  { %v234_v32 = vadd.f32 1e-05, %v202_v26  ;;  %v187_v33 = vsub.f32 %v155_v28, %v171_v27  ;;  %v2390_v34 = vmul.f32 0.0078125, %v62_v31 }
  0x97   :  { %v64_v35 = vpop.xlane.xlu1 %63 }
  0x98   :  { %1997 = vrsqrt.f32 %v234_v32  ;;  %v203_v36 = vmax.f32 %v187_v33, 0.0  ;;  %v172_v37 = vmul.f32 %v2390_v34, %v2390_v34  ;;  %v2394_v38 = vmul.f32 0.0078125, %v64_v35  ;;  %v2423_v35 = vld [vmem:[%s3161_s2] ss:$0 sm:$0xff] }
  0x99   :  { %v127_v39 = vpop.xlane.xlu0 %126 }
  0x9a   :  { %v235_v40 = vadd.f32 1e-05, %v203_v36  ;;  %v156_v41 = vmul.f32 0.0078125, %v127_v39  ;;  %v173_v45 = vmul.f32 %v2394_v38, %v2394_v38 }
  0x9b   :  { %v129_v44 = vpop.xlane.xlu1 %128 }
  0x9c   :  { %1999 = vrsqrt.f32 %v235_v40  ;;  %v188_v46 = vsub.f32 %v156_v41, %v172_v37  ;;  %v157_v47 = vmul.f32 0.0078125, %v129_v44  ;;  %v220_v40 = vsub.f32 %v2204_v6, %v2390_v34 }
  0x9d   :  { %v66_v48 = vpop.xlane.xlu0 %65 }
  0x9e   :  { %v204_v49 = vmax.f32 %v188_v46, 0.0  ;;  %v189_v50 = vsub.f32 %v157_v47, %v173_v45  ;;  %v2398_v51 = vmul.f32 0.0078125, %v66_v48 }
  0x9f   :  { %v68_v52 = vpop.xlane.xlu1 %67 }
  0xa0   :  { %v236_v53 = vadd.f32 1e-05, %v204_v49  ;;  %v205_v54 = vmax.f32 %v189_v50, 0.0  ;;  %v174_v57 = vmul.f32 %v2398_v51, %v2398_v51  ;;  %v2402_v58 = vmul.f32 0.0078125, %v68_v52 }
  0xa1   :  { %v131_v59 = vpop.xlane.xlu0 %130  ;;  %v221_v50 = vsub.f32 %v2206_v7, %v2394_v38 }
  0xa2   :  { %2001 = vrsqrt.f32 %v236_v53  ;;  %v237_v60 = vadd.f32 1e-05, %v205_v54  ;;  %v158_v61 = vmul.f32 0.0078125, %v131_v59  ;;  %v175_v0 = vmul.f32 %v2402_v58, %v2402_v58 }
  0xa3   :  { %v133_v63 = vpop.xlane.xlu1 %132 }
  0xa4   :  { %2003 = vrsqrt.f32 %v237_v60  ;;  %v190_v3 = vsub.f32 %v158_v61, %v174_v57  ;;  %v159_v4 = vmul.f32 0.0078125, %v133_v63 }
  0xa5   :  { %v1998_v5 = vpop.eup %1997  ;;  %v70_v13 = vpop.xlane.xlu0 %69 }
  0xa6   :  { %v266_v14 = vmul.f32 %v1998_v5, %v218_v62  ;;  %v206_v15 = vmax.f32 %v190_v3, 0.0  ;;  %v191_v19 = vsub.f32 %v159_v4, %v175_v0  ;;  %v2407_v20 = vmul.f32 0.0078125, %v70_v13 }
  0xa7   :  { %v72_v1 = vpop.xlane.xlu1 %71  ;;  %v222_v13 = vsub.f32 %v2217_v11, %v2398_v51 }
  0xa8   :  { %v238_v22 = vadd.f32 1e-05, %v206_v15  ;;  %v207_v23 = vmax.f32 %v191_v19, 0.0  ;;  %v176_v26 = vmul.f32 %v2407_v20, %v2407_v20  ;;  %v2417_v27 = vmul.f32 0.0078125, %v72_v1 }
  0xa9   :  { %v2000_v25 = vpop.eup %1999  ;;  %v135_v28 = vpop.xlane.xlu0 %134  ;;  %v289_v31 = vmul.f32 %v2412_v21, %v266_v14 }
  0xaa   :  { %v267_v32 = vmul.f32 %v2000_v25, %v219_v18  ;;  %2005 = vrsqrt.f32 %v238_v22  ;;  %v239_v33 = vadd.f32 1e-05, %v207_v23  ;;  %v160_v2 = vmul.f32 0.0078125, %v135_v28 }
  0xab   :  { %v137_v24 = vpop.xlane.xlu1 %136  ;;  %v177_v37 = vmul.f32 %v2417_v27, %v2417_v27  ;;  %v312_v45 = vadd.f32 %v2423_v35, %v289_v31 }
  0xac   :  { %v290_v36 = vmul.f32 %v2412_v21, %v267_v32  ;;  %2007 = vrsqrt.f32 %v239_v33  ;;  %v161_v39 = vmul.f32 0.0078125, %v137_v24  ;;  %v192_v41 = vsub.f32 %v160_v2, %v176_v26 }
  0xad   :  { %v74_v44 = vpop.xlane.xlu0 %73  ;;  %v223_v26 = vsub.f32 %v2219_v12, %v2402_v58 }
  0xae   :  { %v313_v46 = vadd.f32 %v2423_v35, %v290_v36  ;;  %v193_v47 = vsub.f32 %v161_v39, %v177_v37  ;;  %v2432_v48 = vmul.f32 0.0078125, %v74_v44  ;;  %v208_v52 = vmax.f32 %v192_v41, 0.0 }
  0xaf   :  { %v2002_v49 = vpop.eup %2001  ;;  %v76_v53 = vpop.xlane.xlu1 %75 }
  0xb0   :  { %v1889_v54 = vpack.c.bf16 %v313_v46, %v312_v45  ;;  %v268_v57 = vmul.f32 %v2002_v49, %v220_v40  ;;  %v209_v59 = vmax.f32 %v193_v47, 0.0  ;;  %v178_v6 = vmul.f32 %v2432_v48, %v2432_v48 }
  0xb1   :  { %v2004_v34 = vpop.eup %2003  ;;  %v240_v60 = vadd.f32 1e-05, %v208_v52  ;;  %v2438_v61 = vmul.f32 0.0078125, %v76_v53  ;;  %v139_v62 = vpop.xlane.xlu0 %138 }
  0xb2   :  { %1890 = vst [vmem:[#allocation2] sm:$0xff] %v1889_v54   ;;  %v291_v63 = vmul.f32 %v2412_v21, %v268_v57  ;;  %v269_v0 = vmul.f32 %v2004_v34, %v221_v50  ;;  %v241_v3 = vadd.f32 1e-05, %v209_v59  ;;  %v162_v4 = vmul.f32 0.0078125, %v139_v62 }
  0xb3   :  { %2009 = vrsqrt.f32 %v240_v60  ;;  %v141_v7 = vpop.xlane.xlu1 %140  ;;  %v179_v14 = vmul.f32 %v2438_v61, %v2438_v61  ;;  %v225_v34 = vsub.f32 %v2232_v17, %v2417_v27 }
  0xb4   :  { %v292_v38 = vmul.f32 %v2412_v21, %v269_v0  ;;  %2011 = vrsqrt.f32 %v241_v3  ;;  %v194_v5 = vsub.f32 %v162_v4, %v178_v6  ;;  %v163_v15 = vmul.f32 0.0078125, %v141_v7 }
  0xb5   :  { %v78_v19 = vpop.xlane.xlu0 %77  ;;  %v314_v1 = vadd.f32 %v2423_v35, %v291_v63  ;;  %v224_v6 = vsub.f32 %v2230_v16, %v2407_v20 }
  0xb6   :  { %v315_v18 = vadd.f32 %v2423_v35, %v292_v38  ;;  %v210_v22 = vmax.f32 %v194_v5, 0.0  ;;  %v2448_v23 = vmul.f32 0.0078125, %v78_v19  ;;  %v195_v28 = vsub.f32 %v163_v15, %v179_v14 }
  0xb7   :  { %v2006_v25 = vpop.eup %2005  ;;  %v80_v31 = vpop.xlane.xlu1 %79 }
  0xb8   :  { %v1894_v32 = vpack.c.bf16 %v315_v18, %v314_v1  ;;  %v270_v11 = vmul.f32 %v2006_v25, %v222_v13  ;;  %v242_v51 = vadd.f32 1e-05, %v210_v22  ;;  %v180_v33 = vmul.f32 %v2448_v23, %v2448_v23 }
  0xb9   :  { %v2008_v2 = vpop.eup %2007  ;;  %v211_v24 = vmax.f32 %v195_v28, 0.0  ;;  %v2454_v36 = vmul.f32 0.0078125, %v80_v31  ;;  %v143_v37 = vpop.xlane.xlu0 %142  ;;  %v1989_v12 = vld [vmem:[#allocation2] sm:$0xff]  }
  0xba   :  { %1933 = vst [vmem:[#allocation2 + $0x8] sm:$0xff] %v1894_v32   ;;  %v293_v39 = vmul.f32 %v2412_v21, %v270_v11  ;;  %v271_v40 = vmul.f32 %v2008_v2, %v223_v26  ;;  %2013 = vrsqrt.f32 %v242_v51  ;;  %v164_v41 = vmul.f32 0.0078125, %v143_v37  ;;  %719 = vmatmul.mubr.bf16.vlgmr.msra.gmra.mxu0 %v1989_v12  ;;  %832 = vmatmul.mubr.bf16.vlgmr.msra.gmra.mxu1 %v1989_v12 }
  0xbb   :  { %v243_v58 = vadd.f32 1e-05, %v211_v24  ;;  %v145_v44 = vpop.xlane.xlu1 %144  ;;  %v181_v46 = vmul.f32 %v2454_v36, %v2454_v36  ;;  %728 = vmatprep.mubr.bf16.mxu0 %v2157_v10  ;;  %841 = vmatprep.mubr.bf16.mxu1 %v2157_v10  ;;  %v226_v26 = vsub.f32 %v2267_v29, %v2432_v48  ;;  %v227_v29 = vsub.f32 %v2269_v30, %v2438_v61 }
  0xbc   :  { %v294_v45 = vmul.f32 %v2412_v21, %v271_v40  ;;  %v196_v47 = vsub.f32 %v164_v41, %v180_v33  ;;  %v165_v49 = vmul.f32 0.0078125, %v145_v44  ;;  %v316_v50 = vadd.f32 %v2423_v35, %v293_v39 }
  0xbd   :  { %2015 = vrsqrt.f32 %v243_v58  ;;  %v82_v52 = vpop.xlane.xlu0 %81 }
  0xbe   :  { %v317_v53 = vadd.f32 %v2423_v35, %v294_v45  ;;  %v212_v54 = vmax.f32 %v196_v47, 0.0  ;;  %v197_v57 = vsub.f32 %v165_v49, %v181_v46  ;;  %v2464_v59 = vmul.f32 0.0078125, %v82_v52 }
  0xbf   :  { %v84_v60 = vpop.xlane.xlu1 %83 }
  0xc0   :  { %v2010_v62 = vpop.eup %2009  ;;  %v1899_v63 = vpack.c.bf16 %v317_v53, %v316_v50  ;;  %v244_v0 = vadd.f32 1e-05, %v212_v54  ;;  %v213_v3 = vmax.f32 %v197_v57, 0.0  ;;  %v182_v4 = vmul.f32 %v2464_v59, %v2464_v59 }
  0xc1   :  { %v2012_v7 = vpop.eup %2011  ;;  %v272_v38 = vmul.f32 %v2010_v62, %v224_v6  ;;  %v2472_v5 = vmul.f32 0.0078125, %v84_v60  ;;  %v147_v13 = vpop.xlane.xlu0 %146  ;;  %v1990_v14 = vld [vmem:[#allocation2 + $0x8] sm:$0xff]   ;;  %v228_v54 = vsub.f32 %v2304_v42, %v2448_v23 }
  0xc2   :  { %1934 = vst [vmem:[#allocation2 + $0x10] sm:$0xff] %v1899_v63   ;;  %v273_v15 = vmul.f32 %v2012_v7, %v225_v34  ;;  %2017 = vrsqrt.f32 %v244_v0  ;;  %v245_v16 = vadd.f32 1e-05, %v213_v3  ;;  %v166_v20 = vmul.f32 0.0078125, %v147_v13  ;;  %729 = vmatmul.mubr.bf16.gmra.mxu0 %v1990_v14  ;;  %842 = vmatmul.mubr.bf16.gmra.mxu1 %v1990_v14 }
  0xc3   :  { %v295_v17 = vmul.f32 %v2412_v21, %v272_v38  ;;  %v183_v27 = vmul.f32 %v2472_v5, %v2472_v5  ;;  %v149_v19 = vpop.xlane.xlu1 %148  ;;  %738 = vmatprep.mubr.bf16.mxu0 %v2157_v10  ;;  %851 = vmatprep.mubr.bf16.mxu1 %v2157_v10  ;;  %v229_v63 = vsub.f32 %v2306_v43, %v2454_v36 }
  0xc4   :  { %v296_v1 = vmul.f32 %v2412_v21, %v273_v15  ;;  %2019 = vrsqrt.f32 %v245_v16  ;;  %v198_v18 = vsub.f32 %v166_v20, %v182_v4  ;;  %v167_v22 = vmul.f32 0.0078125, %v149_v19 }
  0xc5   :  { %v318_v25 = vadd.f32 %v2423_v35, %v295_v17  ;;  %v86_v28 = vpop.xlane.xlu0 %85  ;;  %v230_v16 = vsub.f32 %v2341_v55, %v2464_v59 }
  0xc6   :  { %v319_v31 = vadd.f32 %v2423_v35, %v296_v1  ;;  %v214_v32 = vmax.f32 %v198_v18, 0.0  ;;  %v199_v11 = vsub.f32 %v167_v22, %v183_v27  ;;  %v2484_v51 = vmul.f32 0.0078125, %v86_v28 }
  0xc7   :  { %v2014_v33 = vpop.eup %2013  ;;  %v88_v2 = vpop.xlane.xlu1 %87  ;;  %v231_v27 = vsub.f32 %v2343_v56, %v2472_v5 }
  0xc8   :  { %v1904_v24 = vpack.c.bf16 %v319_v31, %v318_v25  ;;  %v274_v37 = vmul.f32 %v2014_v33, %v226_v26  ;;  %v246_v39 = vadd.f32 1e-05, %v214_v32  ;;  %v215_v40 = vmax.f32 %v199_v11, 0.0 }
  0xc9   :  { %v184_v48 = vmul.f32 %v2484_v51, %v2484_v51  ;;  %v2490_v41 = vmul.f32 0.0078125, %v88_v2  ;;  %v151_v12 = vpop.xlane.xlu0 %150  ;;  %v1991_v58 = vld [vmem:[#allocation2 + $0x10] sm:$0xff]   ;;  %v232_v56 = vsub.f32 %v2378_v8, %v2484_v51 }
  0xca   :  { %v2016_v44 = vpop.eup %2015  ;;  %1935 = vst [vmem:[#allocation2 + $0x18] sm:$0xff] %v1904_v24   ;;  %2021 = vrsqrt.f32 %v246_v39  ;;  %v247_v45 = vadd.f32 1e-05, %v215_v40  ;;  %v168_v46 = vmul.f32 0.0078125, %v151_v12  ;;  %v297_v47 = vmul.f32 %v2412_v21, %v274_v37  ;;  %739 = vmatmul.mubr.bf16.gmra.mxu0 %v1991_v58  ;;  %852 = vmatmul.mubr.bf16.gmra.mxu1 %v1991_v58 }
  0xcb   :  { %v275_v49 = vmul.f32 %v2016_v44, %v227_v29  ;;  %v153_v50 = vpop.xlane.xlu1 %152  ;;  %v185_v30 = vmul.f32 %v2490_v41, %v2490_v41  ;;  %748 = vmatprep.mubr.bf16.mxu0 %v2157_v10  ;;  %861 = vmatprep.mubr.bf16.mxu1 %v2157_v10  ;;  %v233_v31 = vsub.f32 %v2380_v9, %v2490_v41  ;;  %v458_v40 = vlaneseq }
  0xcc   :  { %2023 = vrsqrt.f32 %v247_v45  ;;  %v200_v61 = vsub.f32 %v168_v46, %v184_v48  ;;  %v169_v52 = vmul.f32 0.0078125, %v153_v50  ;;  %v320_v60 = vadd.f32 %v2423_v35, %v297_v47 }
  0xcd   :  { %v298_v53 = vmul.f32 %v2412_v21, %v275_v49  ;;  %v459_v29 = vshrl.u32 %v458_v40, 7 }
  0xce   :  { %v216_v57 = vmax.f32 %v200_v61, 0.0  ;;  %v201_v6 = vsub.f32 %v169_v52, %v185_v30 }
  0xcf   :  { %v2018_v34 = vpop.eup %2017  ;;  %v321_v62 = vadd.f32 %v2423_v35, %v298_v53  ;;  %v460_v48 = vsub.s32 0, %v459_v29  ;;  %v468_v41 = vsub.s32 2, %v459_v29  ;;  %v464_v12 = vsub.s32 1, %v459_v29 }
  0xd0   :  { %v276_v0 = vmul.f32 %v2018_v34, %v228_v54  ;;  %v248_v3 = vadd.f32 1e-05, %v216_v57  ;;  %v217_v4 = vmax.f32 %v201_v6, 0.0  ;;  %v472_v58 = vsub.s32 3, %v459_v29 }
  0xd1   :  { %v2020_v7 = vpop.eup %2019  ;;  %v1909_v38 = vpack.c.bf16 %v321_v62, %v320_v60  ;;  %v1992_v13 = vld [vmem:[#allocation2 + $0x18] sm:$0xff]  }
  0xd2   :  { %v299_v14 = vmul.f32 %v2412_v21, %v276_v0  ;;  %v277_v15 = vmul.f32 %v2020_v7, %v229_v63  ;;  %2025 = vrsqrt.f32 %v248_v3  ;;  %v249_v42 = vadd.f32 1e-05, %v217_v4  ;;  %749 = vmatmul.mubr.bf16.gmra.mxu0 %v1992_v13  ;;  %862 = vmatmul.mubr.bf16.gmra.mxu1 %v1992_v13 }
  0xd3   :  { %1936 = vst [vmem:[#allocation2 + $0x20] sm:$0xff] %v1909_v38   ;;  %758 = vmatprep.mubr.bf16.mxu0 %v2157_v10  ;;  %871 = vmatprep.mubr.bf16.mxu1 %v2157_v10 }
  0xd4   :  { %v300_v23 = vmul.f32 %v2412_v21, %v277_v15  ;;  %2027 = vrsqrt.f32 %v249_v42  ;;  %v322_v43 = vadd.f32 %v2423_v35, %v299_v14 }
  0xd6   :  { %v323_v36 = vadd.f32 %v2423_v35, %v300_v23 }
  0xd7   :  { %v2022_v20 = vpop.eup %2021 }
  0xd8   :  { %v1914_v17 = vpack.c.bf16 %v323_v36, %v322_v43  ;;  %v278_v19 = vmul.f32 %v2022_v20, %v230_v16 }
  0xd9   :  { %v2024_v1 = vpop.eup %2023 }
  0xda   :  { %1937 = vst [vmem:[#allocation2 + $0x28] sm:$0xff] %v1914_v17   ;;  %v301_v18 = vmul.f32 %v2412_v21, %v278_v19  ;;  %v279_v22 = vmul.f32 %v2024_v1, %v231_v27  ;;  %v1993_v25 = vld [vmem:[#allocation2 + $0x20] sm:$0xff]  }
  0xdb   :  { %759 = vmatmul.mubr.bf16.gmra.mxu0 %v1993_v25  ;;  %872 = vmatmul.mubr.bf16.gmra.mxu1 %v1993_v25 }
  0xdc   :  { %v302_v26 = vmul.f32 %v2412_v21, %v279_v22  ;;  %768 = vmatprep.mubr.bf16.mxu0 %v2157_v10  ;;  %881 = vmatprep.mubr.bf16.mxu1 %v2157_v10  ;;  %v324_v55 = vadd.f32 %v2423_v35, %v301_v18 }
  0xde   :  { %v325_v59 = vadd.f32 %v2423_v35, %v302_v26 }
  0xdf   :  { %v2026_v5 = vpop.eup %2025 }
  0xe0   :  { %v1919_v28 = vpack.c.bf16 %v325_v59, %v324_v55  ;;  %v280_v32 = vmul.f32 %v2026_v5, %v232_v56 }
  0xe1   :  { %v2028_v11 = vpop.eup %2027  ;;  %v1994_v33 = vld [vmem:[#allocation2 + $0x28] sm:$0xff]  }
  0xe2   :  { %1938 = vst [vmem:[#allocation2 + $0x30] sm:$0xff] %v1919_v28   ;;  %v303_v2 = vmul.f32 %v2412_v21, %v280_v32  ;;  %v281_v24 = vmul.f32 %v2028_v11, %v233_v31 }
  0xe3   :  { %769 = vmatmul.mubr.bf16.gmra.mxu0 %v1994_v33  ;;  %882 = vmatmul.mubr.bf16.gmra.mxu1 %v1994_v33 }
  0xe4   :  { %v304_v37 = vmul.f32 %v2412_v21, %v281_v24  ;;  %778 = vmatprep.mubr.bf16.mxu0 %v2157_v10  ;;  %891 = vmatprep.mubr.bf16.mxu1 %v2157_v10  ;;  %v326_v8 = vadd.f32 %v2423_v35, %v303_v2 }
  0xe6   :  { %v327_v51 = vadd.f32 %v2423_v35, %v304_v37  ;;  %v456_v35 = vld [vmem:[%s3162_s4] sm:$0xf] }
  0xe7   :  { %v2535_v44 = vrot.slane %v456_v35, %v460_v48  ;;  %v2537_v45 = vrot.slane %v456_v35, %v468_v41  ;;  %v2541_v49 = vrot.slane %v456_v35, %v472_v58 }
  0xe8   :  { %v1924_v9 = vpack.c.bf16 %v327_v51, %v326_v8 }
  0xe9   :  { %v1995_v39 = vld [vmem:[#allocation2 + $0x30] sm:$0xff]  }
  0xea   :  { %1939 = vst [vmem:[#allocation2 + $0x38] sm:$0xff] %v1924_v9  }
  0xeb   :  { %779 = vmatmul.mubr.bf16.gmra.mxu0 %v1995_v39  ;;  %892 = vmatmul.mubr.bf16.gmra.mxu1 %v1995_v39 }
  0xec   :  { %788 = vmatprep.mubr.bf16.mxu0 %v2157_v10  ;;  %901 = vmatprep.mubr.bf16.mxu1 %v2157_v10  ;;  %v2539_v10 = vrot.slane %v456_v35, %v464_v12 }
  0xf1   :  { %v1996_v21 = vld [vmem:[#allocation2 + $0x38] sm:$0xff]  }
  0xf3   :  { %789 = vmatmul.mubr.bf16.gmra.mxu0 %v1996_v21  ;;  %902 = vmatmul.mubr.bf16.gmra.mxu1 %v1996_v21 }
 0x17a   :  { %v720_v46 = vpop.f32.mrf.mxu0  ;;  %v833_v47 = vpop.f32.mrf.mxu1 }
 0x17b   :  { %v721_v50 = vadd.f32 %v720_v46, %v2535_v44  ;;  %v2545_v30 = vadd.f32 %v833_v47, %v2537_v45 }
 0x17c   :  { %v722_v61 = vpop.f32.mrf.mxu0  ;;  %v835_v52 = vpop.f32.mrf.mxu1 }
 0x17d   :  { %v976_v53 = vmul.f32 0.044715, %v721_v50  ;;  %v978_v54 = vmul.f32 0.044715, %v2545_v30  ;;  %v2549_v57 = vadd.f32 %v722_v61, %v2539_v10  ;;  %v2552_v6 = vadd.f32 %v835_v52, %v2541_v49 }
 0x17e   :  { %v724_v34 = vpop.f32.mrf.mxu0  ;;  %v837_v60 = vpop.f32.mrf.mxu1  ;;  %v2600_v58 = vmul.f32 0.5, %v721_v50 }
 0x17f   :  { %v1040_v62 = vmul.f32 %v976_v53, %v721_v50  ;;  %v1042_v63 = vmul.f32 %v978_v54, %v2545_v30  ;;  %v2556_v0 = vadd.f32 %v724_v34, %v2535_v44  ;;  %v2559_v3 = vadd.f32 %v837_v60, %v2537_v45 }
 0x180   :  { %v977_v4 = vmul.f32 0.044715, %v2549_v57  ;;  %v979_v7 = vmul.f32 0.044715, %v2552_v6  ;;  %v726_v38 = vpop.f32.mrf.mxu0  ;;  %v839_v13 = vpop.f32.mrf.mxu1  ;;  %v2605_v53 = vmul.f32 0.5, %v2545_v30 }
 0x181   :  { %v1104_v14 = vmul.f32 %v1040_v62, %v721_v50  ;;  %v1106_v15 = vmul.f32 %v1042_v63, %v2545_v30  ;;  %v980_v42 = vmul.f32 0.044715, %v2556_v0  ;;  %v982_v36 = vmul.f32 0.044715, %v2559_v3 }
 0x182   :  { %v1041_v23 = vmul.f32 %v977_v4, %v2549_v57  ;;  %v1043_v43 = vmul.f32 %v979_v7, %v2552_v6  ;;  %v2571_v27 = vadd.f32 %v726_v38, %v2539_v10  ;;  %v730_v19 = vpop.f32.mrf.mxu0  ;;  %v2577_v25 = vadd.f32 %v839_v13, %v2541_v49  ;;  %v843_v26 = vpop.f32.mrf.mxu1 }
 0x183   :  { %v1168_v16 = vadd.f32 %v1104_v14, %v721_v50  ;;  %v1170_v20 = vadd.f32 %v1106_v15, %v2545_v30  ;;  %v1044_v17 = vmul.f32 %v980_v42, %v2556_v0  ;;  %v1046_v22 = vmul.f32 %v982_v36, %v2559_v3 }
 0x184   :  { %v1105_v1 = vmul.f32 %v1041_v23, %v2549_v57  ;;  %v1107_v18 = vmul.f32 %v1043_v43, %v2552_v6  ;;  %v981_v32 = vmul.f32 0.044715, %v2571_v27  ;;  %v983_v33 = vmul.f32 0.044715, %v2577_v25  ;;  %v732_v2 = vpop.f32.mrf.mxu0  ;;  %v845_v51 = vpop.f32.mrf.mxu1 }
 0x185   :  { %v1232_v55 = vmul.f32 0.7978846, %v1168_v16  ;;  %v1234_v59 = vmul.f32 0.7978846, %v1170_v20  ;;  %v1108_v56 = vmul.f32 %v1044_v17, %v2556_v0  ;;  %v1110_v31 = vmul.f32 %v1046_v22, %v2559_v3 }
 0x186   :  { %v1169_v5 = vadd.f32 %v1105_v1, %v2549_v57  ;;  %v1171_v28 = vadd.f32 %v1107_v18, %v2552_v6  ;;  %v1045_v39 = vmul.f32 %v981_v32, %v2571_v27  ;;  %v1047_v21 = vmul.f32 %v983_v33, %v2577_v25  ;;  %v734_v61 = vpop.f32.mrf.mxu0  ;;  %v847_v52 = vpop.f32.mrf.mxu1 }
 0x187   :  { %2029 = vtanh.f32 %v1232_v55  ;;  %v1172_v11 = vadd.f32 %v1108_v56, %v2556_v0  ;;  %v1174_v8 = vadd.f32 %v1110_v31, %v2559_v3  ;;  %v2590_v40 = vadd.f32 %v730_v19, %v2535_v44 }
 0x188   :  { %2031 = vtanh.f32 %v1234_v59  ;;  %v1233_v24 = vmul.f32 0.7978846, %v1169_v5  ;;  %v1235_v37 = vmul.f32 0.7978846, %v1171_v28  ;;  %v2593_v48 = vadd.f32 %v843_v26, %v2537_v45  ;;  %v736_v18 = vpop.f32.mrf.mxu0 }
 0x189   :  { %v1236_v9 = vmul.f32 0.7978846, %v1172_v11  ;;  %v1238_v29 = vmul.f32 0.7978846, %v1174_v8  ;;  %v2596_v41 = vadd.f32 %v732_v2, %v2539_v10  ;;  %v1109_v35 = vmul.f32 %v1045_v39, %v2571_v27 }
 0x18a   :  { %2033 = vtanh.f32 %v1233_v24  ;;  %v1111_v12 = vmul.f32 %v1047_v21, %v2577_v25  ;;  %v984_v46 = vmul.f32 0.044715, %v2590_v40  ;;  %v986_v47 = vmul.f32 0.044715, %v2593_v48 }
 0x18b   :  { %2035 = vtanh.f32 %v1235_v37  ;;  %v1173_v54 = vadd.f32 %v1109_v35, %v2571_v27  ;;  %v985_v62 = vmul.f32 0.044715, %v2596_v41  ;;  %v2613_v63 = vadd.f32 %v845_v51, %v2541_v49  ;;  %v740_v51 = vpop.f32.mrf.mxu0 }
 0x18c   :  { %2037 = vtanh.f32 %v1236_v9  ;;  %v1175_v34 = vadd.f32 %v1111_v12, %v2577_v25  ;;  %v1048_v60 = vmul.f32 %v984_v46, %v2590_v40  ;;  %v1050_v50 = vmul.f32 %v986_v47, %v2593_v48 }
 0x18d   :  { %2039 = vtanh.f32 %v1238_v29  ;;  %v1237_v4 = vmul.f32 0.7978846, %v1173_v54  ;;  %v2616_v38 = vadd.f32 %v734_v61, %v2535_v44  ;;  %v2619_v30 = vadd.f32 %v847_v52, %v2537_v45 }
 0x18e   :  { %v1239_v7 = vmul.f32 0.7978846, %v1175_v34  ;;  %v913_v13 = vmul.f32 0.5, %v2549_v57  ;;  %v1112_v14 = vmul.f32 %v1048_v60, %v2590_v40  ;;  %v1114_v15 = vmul.f32 %v1050_v50, %v2593_v48 }
 0x18f   :  { %v1049_v42 = vmul.f32 %v985_v62, %v2596_v41  ;;  %v915_v23 = vmul.f32 0.5, %v2552_v6  ;;  %2041 = vtanh.f32 %v1237_v4  ;;  %v987_v43 = vmul.f32 0.044715, %v2613_v63 }
 0x190   :  { %v988_v36 = vmul.f32 0.044715, %v2616_v38  ;;  %2043 = vtanh.f32 %v1239_v7  ;;  %v1176_v16 = vadd.f32 %v1112_v14, %v2590_v40  ;;  %v1178_v20 = vadd.f32 %v1114_v15, %v2593_v48  ;;  %v742_v14 = vpop.f32.mrf.mxu0 }
 0x191   :  { %v1113_v57 = vmul.f32 %v1049_v42, %v2596_v41  ;;  %v2632_v17 = vmul.f32 0.5, %v2556_v0  ;;  %v1051_v19 = vmul.f32 %v987_v43, %v2613_v63  ;;  %v990_v6 = vmul.f32 0.044715, %v2619_v30 }
 0x192   :  { %v1052_v1 = vmul.f32 %v988_v36, %v2616_v38  ;;  %v2638_v26 = vmul.f32 0.5, %v2559_v3  ;;  %v1240_v55 = vmul.f32 0.7978846, %v1176_v16  ;;  %v1242_v59 = vmul.f32 0.7978846, %v1178_v20  ;;  %v849_v3 = vpop.f32.mrf.mxu1 }
 0x193   :  { %v1177_v56 = vadd.f32 %v1113_v57, %v2596_v41  ;;  %v917_v28 = vmul.f32 0.5, %v2571_v27  ;;  %v1115_v0 = vmul.f32 %v1051_v19, %v2613_v63  ;;  %v1054_v32 = vmul.f32 %v990_v6, %v2619_v30 }
 0x194   :  { %v2030_v22 = vpop.eup %2029  ;;  %v1116_v31 = vmul.f32 %v1052_v1, %v2616_v38  ;;  %2045 = vtanh.f32 %v1240_v55  ;;  %v2646_v2 = vadd.f32 %v736_v18, %v2539_v10  ;;  %v919_v21 = vmul.f32 0.5, %v2577_v25  ;;  %v853_v7 = vpop.f32.mrf.mxu1 }
 0x195   :  { %v2032_v5 = vpop.eup %2031  ;;  %v1360_v11 = vadd.f32 1.0, %v2030_v22  ;;  %v1241_v33 = vmul.f32 0.7978846, %v1177_v56  ;;  %2047 = vtanh.f32 %v1242_v59  ;;  %v1179_v8 = vadd.f32 %v1115_v0, %v2613_v63 }
 0x196   :  { %v1362_v37 = vadd.f32 1.0, %v2032_v5  ;;  %v1180_v27 = vadd.f32 %v1116_v31, %v2616_v38  ;;  %v1118_v29 = vmul.f32 %v1054_v32, %v2619_v30  ;;  %v2653_v61 = vadd.f32 %v849_v3, %v2541_v49  ;;  %v855_v22 = vpop.f32.mrf.mxu1 }
 0x197   :  { %v2034_v24 = vpop.eup %2033  ;;  %2049 = vtanh.f32 %v1241_v33  ;;  %v1243_v46 = vmul.f32 0.7978846, %v1179_v8  ;;  %v1424_v54 = vmul.f32 %v1360_v11, %v2600_v58  ;;  %v989_v50 = vmul.f32 0.044715, %v2646_v2 }
 0x198   :  { %v2036_v9 = vpop.eup %2035  ;;  %v1361_v39 = vadd.f32 1.0, %v2034_v24  ;;  %v1244_v47 = vmul.f32 0.7978846, %v1180_v27  ;;  %v1182_v60 = vadd.f32 %v1118_v29, %v2619_v30  ;;  %v1426_v25 = vmul.f32 %v1362_v37, %v2605_v53  ;;  %v744_v29 = vpop.f32.mrf.mxu0 }
 0x199   :  { %v2038_v35 = vpop.eup %2037  ;;  %v1363_v12 = vadd.f32 1.0, %v2036_v9  ;;  %2051 = vtanh.f32 %v1243_v46  ;;  %v920_v16 = vmul.f32 0.5, %v2590_v40  ;;  %v1053_v58 = vmul.f32 %v989_v50, %v2646_v2 }
 0x19a   :  { %v2040_v52 = vpop.eup %2039  ;;  %v1425_v34 = vmul.f32 %v1361_v39, %v913_v13  ;;  %v1364_v4 = vadd.f32 1.0, %v2038_v35  ;;  %2053 = vtanh.f32 %v1244_v47  ;;  %v1246_v43 = vmul.f32 0.7978846, %v1182_v60 }
 0x19b   :  { %v1427_v62 = vmul.f32 %v1363_v12, %v915_v23  ;;  %v1366_v42 = vadd.f32 1.0, %v2040_v52  ;;  %v991_v13 = vmul.f32 0.044715, %v2653_v61  ;;  %v2666_v53 = vadd.f32 %v740_v51, %v2535_v44  ;;  %v857_v52 = vpop.f32.mrf.mxu1 }
 0x19c   :  { %v1822_v15 = vpack.c.bf16 %v1425_v34, %v1424_v54  ;;  %v2042_v20 = vpop.eup %2041  ;;  %2055 = vtanh.f32 %v1246_v43  ;;  %v2669_v23 = vadd.f32 %v853_v7, %v2537_v45  ;;  %v2672_v57 = vadd.f32 %v742_v14, %v2539_v10  ;;  %v746_v43 = vpop.f32.mrf.mxu0 }
 0x19d   :  { %v1823_v36 = vpack.c.bf16 %v1427_v62, %v1426_v25  ;;  %v2044_v40 = vpop.eup %2043  ;;  %v1365_v19 = vadd.f32 1.0, %v2042_v20  ;;  %v922_v1 = vmul.f32 0.5, %v2593_v48  ;;  %v1117_v6 = vmul.f32 %v1053_v58, %v2646_v2  ;;  %v859_v20 = vpop.f32.mrf.mxu1 }
 0x19e   :  { %1680 = vst [vmem:[%s3163_s5] sm:$0xff] %v1822_v15  ;;  %v1055_v18 = vmul.f32 %v991_v13, %v2653_v61  ;;  %v1428_v55 = vmul.f32 %v1364_v4, %v2632_v17  ;;  %v1430_v59 = vmul.f32 %v1366_v42, %v2638_v26  ;;  %v1367_v56 = vadd.f32 1.0, %v2044_v40 }
 0x19f   :  { %1681 = vst [vmem:[%s3163_s5 + $0x8] sm:$0xff] %v1823_v36  ;;  %v992_v5 = vmul.f32 0.044715, %v2666_v53  ;;  %v1429_v0 = vmul.f32 %v1365_v19, %v917_v28  ;;  %v1181_v31 = vadd.f32 %v1117_v6, %v2646_v2  ;;  %v994_v11 = vmul.f32 0.044715, %v2669_v23 }
 0x1a0   :  { %v1119_v32 = vmul.f32 %v1055_v18, %v2653_v61  ;;  %v1431_v48 = vmul.f32 %v1367_v56, %v919_v21  ;;  %v993_v3 = vmul.f32 0.044715, %v2672_v57  ;;  %v2689_v24 = vadd.f32 %v855_v22, %v2541_v49 }
 0x1a1   :  { %v1056_v33 = vmul.f32 %v992_v5, %v2666_v53  ;;  %v2046_v17 = vpop.eup %2045  ;;  %v1824_v26 = vpack.c.bf16 %v1429_v0, %v1428_v55  ;;  %v1245_v37 = vmul.f32 0.7978846, %v1181_v31  ;;  %v1058_v28 = vmul.f32 %v994_v11, %v2669_v23 }
 0x1a2   :  { %v1183_v8 = vadd.f32 %v1119_v32, %v2653_v61  ;;  %v2048_v27 = vpop.eup %2047  ;;  %v1825_v51 = vpack.c.bf16 %v1431_v48, %v1430_v59  ;;  %v1368_v9 = vadd.f32 1.0, %v2046_v17  ;;  %v1057_v21 = vmul.f32 %v993_v3, %v2672_v57 }
 0x1a3   :  { %v1120_v39 = vmul.f32 %v1056_v33, %v2666_v53  ;;  %1682 = vst [vmem:[%s3163_s5 + $0x10] sm:$0xff] %v1824_v26  ;;  %v921_v12 = vmul.f32 0.5, %v2596_v41  ;;  %2057 = vtanh.f32 %v1245_v37  ;;  %v1122_v47 = vmul.f32 %v1058_v28, %v2669_v23 }
 0x1a4   :  { %v2050_v35 = vpop.eup %2049  ;;  %v1247_v46 = vmul.f32 0.7978846, %v1183_v8  ;;  %1683 = vst [vmem:[%s3163_s5 + $0x18] sm:$0xff] %v1825_v51  ;;  %v923_v34 = vmul.f32 0.5, %v2613_v63  ;;  %v1121_v50 = vmul.f32 %v1057_v21, %v2672_v57  ;;  %v1432_v25 = vmul.f32 %v1368_v9, %v920_v16 }
 0x1a5   :  { %v1369_v54 = vadd.f32 1.0, %v2050_v35  ;;  %v1184_v60 = vadd.f32 %v1120_v39, %v2666_v53  ;;  %v1370_v62 = vadd.f32 1.0, %v2048_v27  ;;  %v1186_v41 = vadd.f32 %v1122_v47, %v2669_v23 }
 0x1a6   :  { %2059 = vtanh.f32 %v1247_v46  ;;  %v2052_v4 = vpop.eup %2051  ;;  %v1185_v15 = vadd.f32 %v1121_v50, %v2672_v57  ;;  %v995_v42 = vmul.f32 0.044715, %v2689_v24  ;;  %v2710_v13 = vadd.f32 %v744_v29, %v2535_v44 }
 0x1a7   :  { %v1433_v7 = vmul.f32 %v1369_v54, %v921_v12  ;;  %v1248_v14 = vmul.f32 0.7978846, %v1184_v60  ;;  %v2054_v36 = vpop.eup %2053  ;;  %v1371_v58 = vadd.f32 1.0, %v2052_v4  ;;  %v1250_v63 = vmul.f32 0.7978846, %v1186_v41 }
 0x1a8   :  { %v2713_v16 = vadd.f32 %v857_v52, %v2537_v45  ;;  %v924_v19 = vmul.f32 0.5, %v2616_v38  ;;  %v1249_v6 = vmul.f32 0.7978846, %v1185_v15  ;;  %v1434_v22 = vmul.f32 %v1370_v62, %v922_v1  ;;  %v750_v38 = vpop.f32.mrf.mxu0 }
 0x1a9   :  { %v1826_v40 = vpack.c.bf16 %v1433_v7, %v1432_v25  ;;  %2061 = vtanh.f32 %v1248_v14  ;;  %v2056_v18 = vpop.eup %2055  ;;  %v1435_v55 = vmul.f32 %v1371_v58, %v923_v34  ;;  %v926_v59 = vmul.f32 0.5, %v2619_v30  ;;  %v863_v30 = vpop.f32.mrf.mxu1 }
 0x1aa   :  { %v1059_v56 = vmul.f32 %v995_v42, %v2689_v24  ;;  %v1372_v5 = vadd.f32 1.0, %v2054_v36  ;;  %v925_v0 = vmul.f32 0.5, %v2646_v2  ;;  %2063 = vtanh.f32 %v1249_v6  ;;  %v752_v52 = vpop.f32.mrf.mxu0 }
 0x1ab   :  { %1684 = vst [vmem:[%s3163_s5 + $0x20] sm:$0xff] %v1826_v40  ;;  %v996_v31 = vmul.f32 0.044715, %v2710_v13  ;;  %v1827_v32 = vpack.c.bf16 %v1435_v55, %v1434_v22  ;;  %2065 = vtanh.f32 %v1250_v63  ;;  %v998_v11 = vmul.f32 0.044715, %v2713_v16  ;;  %v865_v63 = vpop.f32.mrf.mxu1 }
 0x1ac   :  { %v1123_v1 = vmul.f32 %v1059_v56, %v2689_v24  ;;  %v1374_v48 = vadd.f32 1.0, %v2056_v18  ;;  %v2727_v3 = vadd.f32 %v746_v43, %v2539_v10  ;;  %v2730_v17 = vadd.f32 %v859_v20, %v2541_v49  ;;  %v754_v20 = vpop.f32.mrf.mxu0 }
 0x1ad   :  { %v1060_v33 = vmul.f32 %v996_v31, %v2710_v13  ;;  %1685 = vst [vmem:[%s3163_s5 + $0x28] sm:$0xff] %v1827_v32  ;;  %v927_v2 = vmul.f32 0.5, %v2653_v61  ;;  %v1062_v37 = vmul.f32 %v998_v11, %v2713_v16  ;;  %v2739_v8 = vadd.f32 %v750_v38, %v2535_v44 }
 0x1ae   :  { %v1187_v26 = vadd.f32 %v1123_v1, %v2689_v24  ;;  %v928_v28 = vmul.f32 0.5, %v2666_v53  ;;  %v997_v51 = vmul.f32 0.044715, %v2727_v3  ;;  %v2745_v9 = vadd.f32 %v863_v30, %v2537_v45 }
 0x1af   :  { %v1124_v27 = vmul.f32 %v1060_v33, %v2710_v13  ;;  %v1436_v39 = vmul.f32 %v1372_v5, %v924_v19  ;;  %v1126_v61 = vmul.f32 %v1062_v37, %v2713_v16  ;;  %v999_v29 = vmul.f32 0.044715, %v2730_v17  ;;  %v867_v33 = vpop.f32.mrf.mxu1 }
 0x1b0   :  { %v1251_v21 = vmul.f32 0.7978846, %v1187_v26  ;;  %v2058_v35 = vpop.eup %2057  ;;  %v1438_v12 = vmul.f32 %v1374_v48, %v926_v59  ;;  %v1061_v47 = vmul.f32 %v997_v51, %v2727_v3  ;;  %v1000_v53 = vmul.f32 0.044715, %v2739_v8 }
 0x1b1   :  { %v1188_v46 = vadd.f32 %v1124_v27, %v2710_v13  ;;  %v1373_v54 = vadd.f32 1.0, %v2058_v35  ;;  %v1190_v34 = vadd.f32 %v1126_v61, %v2713_v16  ;;  %v1063_v60 = vmul.f32 %v999_v29, %v2730_v17 }
 0x1b2   :  { %2067 = vtanh.f32 %v1251_v21  ;;  %v1125_v62 = vmul.f32 %v1061_v47, %v2727_v3  ;;  %v1064_v41 = vmul.f32 %v1000_v53, %v2739_v8  ;;  %v1002_v4 = vmul.f32 0.044715, %v2745_v9 }
 0x1b3   :  { %v2060_v50 = vpop.eup %2059  ;;  %v1252_v25 = vmul.f32 0.7978846, %v1188_v46  ;;  %v1437_v7 = vmul.f32 %v1373_v54, %v925_v0  ;;  %v1254_v15 = vmul.f32 0.7978846, %v1190_v34  ;;  %v1127_v42 = vmul.f32 %v1063_v60, %v2730_v17 }
 0x1b4   :  { %v1375_v14 = vadd.f32 1.0, %v2060_v50  ;;  %v1189_v43 = vadd.f32 %v1125_v62, %v2727_v3  ;;  %v1128_v36 = vmul.f32 %v1064_v41, %v2739_v8  ;;  %v1066_v58 = vmul.f32 %v1002_v4, %v2745_v9 }
 0x1b5   :  { %2069 = vtanh.f32 %v1252_v25  ;;  %v1828_v19 = vpack.c.bf16 %v1437_v7, %v1436_v39  ;;  %v1191_v18 = vadd.f32 %v1127_v42, %v2730_v17  ;;  %v930_v31 = vmul.f32 0.5, %v2669_v23  ;;  %v869_v25 = vpop.f32.mrf.mxu1 }
 0x1b6   :  { %v2062_v40 = vpop.eup %2061  ;;  %v1439_v6 = vmul.f32 %v1375_v14, %v927_v2  ;;  %2071 = vtanh.f32 %v1254_v15  ;;  %v1253_v55 = vmul.f32 0.7978846, %v1189_v43  ;;  %v1192_v59 = vadd.f32 %v1128_v36, %v2739_v8  ;;  %v756_v2 = vpop.f32.mrf.mxu0 }
 0x1b7   :  { %v1376_v22 = vadd.f32 1.0, %v2062_v40  ;;  %v1130_v56 = vmul.f32 %v1066_v58, %v2745_v9  ;;  %v2064_v5 = vpop.eup %2063  ;;  %1686 = vst [vmem:[%s3163_s5 + $0x30] sm:$0xff] %v1828_v19  ;;  %v1255_v38 = vmul.f32 0.7978846, %v1191_v18  ;;  %v2769_v32 = vadd.f32 %v752_v52, %v2539_v10 }
 0x1b8   :  { %v1829_v0 = vpack.c.bf16 %v1439_v6, %v1438_v12  ;;  %v2066_v1 = vpop.eup %2065  ;;  %v929_v11 = vmul.f32 0.5, %v2672_v57  ;;  %v1377_v30 = vadd.f32 1.0, %v2064_v5  ;;  %v931_v48 = vmul.f32 0.5, %v2689_v24  ;;  %v760_v4 = vpop.f32.mrf.mxu0 }
 0x1b9   :  { %2073 = vtanh.f32 %v1253_v55  ;;  %v2777_v26 = vmul.f32 0.5, %v2710_v13  ;;  %v1256_v23 = vmul.f32 0.7978846, %v1192_v59  ;;  %v1194_v37 = vadd.f32 %v1130_v56, %v2745_v9  ;;  %v873_v56 = vpop.f32.mrf.mxu1 }
 0x1ba   :  { %1687 = vst [vmem:[%s3163_s5 + $0x38] sm:$0xff] %v1829_v0  ;;  %2075 = vtanh.f32 %v1255_v38  ;;  %v1440_v27 = vmul.f32 %v1376_v22, %v928_v28  ;;  %v1441_v51 = vmul.f32 %v1377_v30, %v929_v11  ;;  %v1001_v57 = vmul.f32 0.044715, %v2769_v32 }
 0x1bb   :  { %v2782_v24 = vadd.f32 %v865_v63, %v2541_v49  ;;  %v1378_v39 = vadd.f32 1.0, %v2066_v1  ;;  %v2785_v21 = vadd.f32 %v754_v20, %v2535_v44  ;;  %v2788_v61 = vadd.f32 %v867_v33, %v2537_v45 }
 0x1bc   :  { %v2791_v13 = vadd.f32 %v756_v2, %v2539_v10  ;;  %v1830_v29 = vpack.c.bf16 %v1441_v51, %v1440_v27  ;;  %v1258_v35 = vmul.f32 0.7978846, %v1194_v37  ;;  %v1065_v28 = vmul.f32 %v1001_v57, %v2769_v32  ;;  %v762_v27 = vpop.f32.mrf.mxu0 }
 0x1bd   :  { %v1003_v12 = vmul.f32 0.044715, %v2782_v24  ;;  %v934_v46 = vmul.f32 0.5, %v2713_v16  ;;  %v933_v47 = vmul.f32 0.5, %v2727_v3  ;;  %2077 = vtanh.f32 %v1256_v23 }
 0x1be   :  { %v1004_v53 = vmul.f32 0.044715, %v2785_v21  ;;  %1688 = vst [vmem:[%s3163_s5 + $0x40] sm:$0xff] %v1830_v29  ;;  %v935_v54 = vmul.f32 0.5, %v2730_v17  ;;  %v1129_v34 = vmul.f32 %v1065_v28, %v2769_v32  ;;  %v1006_v50 = vmul.f32 0.044715, %v2788_v61  ;;  %v875_v29 = vpop.f32.mrf.mxu1 }
 0x1bf   :  { %v2068_v52 = vpop.eup %2067  ;;  %v1067_v60 = vmul.f32 %v1003_v12, %v2782_v24  ;;  %v1442_v16 = vmul.f32 %v1378_v39, %v930_v31  ;;  %v1005_v41 = vmul.f32 0.044715, %v2791_v13  ;;  %2079 = vtanh.f32 %v1258_v35 }
 0x1c0   :  { %v1379_v62 = vadd.f32 1.0, %v2068_v52  ;;  %v1068_v3 = vmul.f32 %v1004_v53, %v2785_v21  ;;  %v1193_v7 = vadd.f32 %v1129_v34, %v2769_v32  ;;  %v1070_v17 = vmul.f32 %v1006_v50, %v2788_v61 }
 0x1c1   :  { %v1131_v14 = vmul.f32 %v1067_v60, %v2782_v24  ;;  %v1069_v36 = vmul.f32 %v1005_v41, %v2791_v13  ;;  %v2813_v58 = vadd.f32 %v869_v25, %v2541_v49  ;;  %v2818_v6 = vadd.f32 %v760_v4, %v2535_v44 }
 0x1c2   :  { %v2070_v15 = vpop.eup %2069  ;;  %v1443_v42 = vmul.f32 %v1379_v62, %v931_v48  ;;  %v1132_v43 = vmul.f32 %v1068_v3, %v2785_v21  ;;  %v1257_v20 = vmul.f32 0.7978846, %v1193_v7  ;;  %v1134_v19 = vmul.f32 %v1070_v17, %v2788_v61  ;;  %v877_v62 = vpop.f32.mrf.mxu1 }
 0x1c3   :  { %v2072_v63 = vpop.eup %2071  ;;  %v1195_v40 = vadd.f32 %v1131_v14, %v2782_v24  ;;  %v1380_v22 = vadd.f32 1.0, %v2070_v15  ;;  %v1133_v59 = vmul.f32 %v1069_v36, %v2791_v13  ;;  %v936_v1 = vmul.f32 0.5, %v2739_v8 }
 0x1c4   :  { %v1831_v18 = vpack.c.bf16 %v1443_v42, %v1442_v16  ;;  %v1196_v55 = vadd.f32 %v1132_v43, %v2785_v21  ;;  %v1382_v5 = vadd.f32 1.0, %v2072_v63  ;;  %2081 = vtanh.f32 %v1257_v20 }
 0x1c5   :  { %v1259_v0 = vmul.f32 0.7978846, %v1195_v40  ;;  %v1198_v31 = vadd.f32 %v1134_v19, %v2788_v61  ;;  %v1197_v30 = vadd.f32 %v1133_v59, %v2791_v13  ;;  %v1007_v48 = vmul.f32 0.044715, %v2813_v58 }
 0x1c6   :  { %v2074_v38 = vpop.eup %2073  ;;  %1689 = vst [vmem:[%s3163_s5 + $0x48] sm:$0xff] %v1831_v18  ;;  %v1260_v11 = vmul.f32 0.7978846, %v1196_v55  ;;  %v2830_v23 = vmul.f32 0.5, %v2745_v9  ;;  %v1444_v8 = vmul.f32 %v1380_v22, %v2777_v26  ;;  %v1446_v35 = vmul.f32 %v1382_v5, %v934_v46  ;;  %v764_v26 = vpop.f32.mrf.mxu0 }
 0x1c7   :  { %v2076_v33 = vpop.eup %2075  ;;  %v1381_v2 = vadd.f32 1.0, %v2074_v38  ;;  %2083 = vtanh.f32 %v1259_v0  ;;  %v1262_v37 = vmul.f32 0.7978846, %v1198_v31  ;;  %v1261_v57 = vmul.f32 0.7978846, %v1197_v30 }
 0x1c8   :  { %v1383_v51 = vadd.f32 1.0, %v2076_v33  ;;  %2085 = vtanh.f32 %v1260_v11  ;;  %v1071_v39 = vmul.f32 %v1007_v48, %v2813_v58  ;;  %v1008_v12 = vmul.f32 0.044715, %v2818_v6  ;;  %v766_v59 = vpop.f32.mrf.mxu0 }
 0x1c9   :  { %v1445_v28 = vmul.f32 %v1381_v2, %v933_v47  ;;  %2087 = vtanh.f32 %v1261_v57  ;;  %v2837_v52 = vadd.f32 %v873_v56, %v2537_v45  ;;  %v2841_v25 = vadd.f32 %v762_v27, %v2539_v10 }
 0x1ca   :  { %v1447_v53 = vmul.f32 %v1383_v51, %v935_v54  ;;  %v1135_v9 = vmul.f32 %v1071_v39, %v2813_v58  ;;  %v2078_v34 = vpop.eup %2077  ;;  %2089 = vtanh.f32 %v1262_v37  ;;  %v1072_v50 = vmul.f32 %v1008_v12, %v2818_v6  ;;  %v879_v37 = vpop.f32.mrf.mxu1 }
 0x1cb   :  { %v1832_v60 = vpack.c.bf16 %v1445_v28, %v1444_v8  ;;  %v937_v47 = vmul.f32 0.5, %v2769_v32  ;;  %v939_v54 = vmul.f32 0.5, %v2782_v24  ;;  %v940_v3 = vmul.f32 0.5, %v2785_v21 }
 0x1cc   :  { %v1833_v46 = vpack.c.bf16 %v1447_v53, %v1446_v35  ;;  %v1199_v16 = vadd.f32 %v1135_v9, %v2813_v58  ;;  %v1136_v41 = vmul.f32 %v1072_v50, %v2818_v6  ;;  %v1010_v4 = vmul.f32 0.044715, %v2837_v52  ;;  %v2080_v14 = vpop.eup %2079 }
 0x1cd   :  { %1690 = vst [vmem:[%s3163_s5 + $0x50] sm:$0xff] %v1832_v60  ;;  %v1009_v7 = vmul.f32 0.044715, %v2841_v25  ;;  %v1384_v32 = vadd.f32 1.0, %v2078_v34  ;;  %v2857_v17 = vadd.f32 %v875_v29, %v2541_v49  ;;  %v2860_v15 = vadd.f32 %v764_v26, %v2535_v44 }
 0x1ce   :  { %1691 = vst [vmem:[%s3163_s5 + $0x58] sm:$0xff] %v1833_v46  ;;  %v1263_v24 = vmul.f32 0.7978846, %v1199_v16  ;;  %v1200_v21 = vadd.f32 %v1136_v41, %v2818_v6  ;;  %v1074_v42 = vmul.f32 %v1010_v4, %v2837_v52  ;;  %v2866_v36 = vadd.f32 %v877_v62, %v2537_v45  ;;  %v770_v16 = vpop.f32.mrf.mxu0  ;;  %v883_v62 = vpop.f32.mrf.mxu1 }
 0x1cf   :  { %v1073_v43 = vmul.f32 %v1009_v7, %v2841_v25  ;;  %v2869_v63 = vmul.f32 0.5, %v2788_v61  ;;  %v941_v20 = vmul.f32 0.5, %v2791_v13  ;;  %v1011_v40 = vmul.f32 0.044715, %v2857_v17 }
 0x1d0   :  { %2091 = vtanh.f32 %v1263_v24  ;;  %v1264_v19 = vmul.f32 0.7978846, %v1200_v21  ;;  %v1138_v18 = vmul.f32 %v1074_v42, %v2837_v52  ;;  %v1012_v55 = vmul.f32 0.044715, %v2860_v15 }
 0x1d1   :  { %v1137_v22 = vmul.f32 %v1073_v43, %v2841_v25  ;;  %v2082_v56 = vpop.eup %2081  ;;  %v1448_v5 = vmul.f32 %v1384_v32, %v936_v1  ;;  %v1386_v0 = vadd.f32 1.0, %v2080_v14  ;;  %v1075_v31 = vmul.f32 %v1011_v40, %v2857_v17 }
 0x1d2   :  { %v1014_v61 = vmul.f32 0.044715, %v2866_v36  ;;  %v1385_v38 = vadd.f32 1.0, %v2082_v56  ;;  %2093 = vtanh.f32 %v1264_v19  ;;  %v1202_v13 = vadd.f32 %v1138_v18, %v2837_v52  ;;  %v772_v19 = vpop.f32.mrf.mxu0  ;;  %v885_v56 = vpop.f32.mrf.mxu1 }
 0x1d3   :  { %v1201_v11 = vadd.f32 %v1137_v22, %v2841_v25  ;;  %v1139_v48 = vmul.f32 %v1075_v31, %v2857_v17  ;;  %v1076_v33 = vmul.f32 %v1012_v55, %v2860_v15  ;;  %v2884_v1 = vadd.f32 %v766_v59, %v2539_v10 }
 0x1d4   :  { %v2084_v30 = vpop.eup %2083  ;;  %v1078_v2 = vmul.f32 %v1014_v61, %v2866_v36  ;;  %v1449_v51 = vmul.f32 %v1385_v38, %v937_v47  ;;  %v1266_v39 = vmul.f32 0.7978846, %v1202_v13  ;;  %v1450_v9 = vmul.f32 %v1386_v0, %v2830_v23 }
 0x1d5   :  { %v2086_v27 = vpop.eup %2085  ;;  %v1387_v57 = vadd.f32 1.0, %v2084_v30  ;;  %v1265_v29 = vmul.f32 0.7978846, %v1201_v11  ;;  %v1203_v35 = vadd.f32 %v1139_v48, %v2857_v17  ;;  %v1140_v28 = vmul.f32 %v1076_v33, %v2860_v15 }
 0x1d6   :  { %v1388_v8 = vadd.f32 1.0, %v2086_v27  ;;  %v1142_v12 = vmul.f32 %v1078_v2, %v2866_v36  ;;  %v2088_v53 = vpop.eup %2087  ;;  %v1834_v34 = vpack.c.bf16 %v1449_v51, %v1448_v5  ;;  %2095 = vtanh.f32 %v1266_v39  ;;  %v774_v2 = vpop.f32.mrf.mxu0 }
 0x1d7   :  { %v1451_v60 = vmul.f32 %v1387_v57, %v939_v54  ;;  %v2090_v50 = vpop.eup %2089  ;;  %v1389_v26 = vadd.f32 1.0, %v2088_v53  ;;  %v943_v46 = vmul.f32 0.5, %v2813_v58  ;;  %2097 = vtanh.f32 %v1265_v29 }
 0x1d8   :  { %v1267_v47 = vmul.f32 0.7978846, %v1203_v35  ;;  %1692 = vst [vmem:[%s3163_s5 + $0x60] sm:$0xff] %v1834_v34  ;;  %v1452_v4 = vmul.f32 %v1388_v8, %v940_v3  ;;  %v1204_v7 = vadd.f32 %v1140_v28, %v2860_v15  ;;  %v1206_v23 = vadd.f32 %v1142_v12, %v2866_v36 }
 0x1d9   :  { %v1835_v41 = vpack.c.bf16 %v1451_v60, %v1450_v9  ;;  %v1453_v54 = vmul.f32 %v1389_v26, %v941_v20  ;;  %v1013_v14 = vmul.f32 0.044715, %v2884_v1  ;;  %v2898_v58 = vadd.f32 %v879_v37, %v2541_v49 }
 0x1da   :  { %2099 = vtanh.f32 %v1267_v47  ;;  %v1390_v32 = vadd.f32 1.0, %v2090_v50  ;;  %v1268_v24 = vmul.f32 0.7978846, %v1204_v7  ;;  %v2904_v21 = vadd.f32 %v770_v16, %v2535_v44  ;;  %v887_v50 = vpop.f32.mrf.mxu1  ;;  %v776_v7 = vpop.f32.mrf.mxu0 }
 0x1db   :  { %1693 = vst [vmem:[%s3163_s5 + $0x68] sm:$0xff] %v1835_v41  ;;  %v2907_v3 = vadd.f32 %v883_v62, %v2537_v45  ;;  %v1836_v42 = vpack.c.bf16 %v1453_v54, %v1452_v4  ;;  %v944_v43 = vmul.f32 0.5, %v2818_v6  ;;  %v1077_v20 = vmul.f32 %v1013_v14, %v2884_v1 }
 0x1dc   :  { %v1015_v40 = vmul.f32 0.044715, %v2898_v58  ;;  %v946_v22 = vmul.f32 0.5, %v2837_v52  ;;  %2101 = vtanh.f32 %v1268_v24  ;;  %v1270_v55 = vmul.f32 0.7978846, %v1206_v23 }
 0x1dd   :  { %v2092_v18 = vpop.eup %2091  ;;  %v1016_v59 = vmul.f32 0.044715, %v2904_v21  ;;  %1694 = vst [vmem:[%s3163_s5 + $0x70] sm:$0xff] %v1836_v42  ;;  %v945_v6 = vmul.f32 0.5, %v2841_v25  ;;  %v1141_v0 = vmul.f32 %v1077_v20, %v2884_v1  ;;  %v1454_v61 = vmul.f32 %v1390_v32, %v2869_v63 }
 0x1de   :  { %v1391_v5 = vadd.f32 1.0, %v2092_v18  ;;  %v1079_v31 = vmul.f32 %v1015_v40, %v2898_v58  ;;  %v1018_v38 = vmul.f32 0.044715, %v2907_v3  ;;  %v2924_v13 = vadd.f32 %v772_v19, %v2539_v10  ;;  %v889_v40 = vpop.f32.mrf.mxu1 }
 0x1df   :  { %v1080_v52 = vmul.f32 %v1016_v59, %v2904_v21  ;;  %v2094_v11 = vpop.eup %2093  ;;  %v1205_v48 = vadd.f32 %v1141_v0, %v2884_v1  ;;  %v2929_v25 = vadd.f32 %v885_v56, %v2541_v49  ;;  %2103 = vtanh.f32 %v1270_v55 }
 0x1e0   :  { %v1455_v30 = vmul.f32 %v1391_v5, %v943_v46  ;;  %v1143_v33 = vmul.f32 %v1079_v31, %v2898_v58  ;;  %v1392_v37 = vadd.f32 1.0, %v2094_v11  ;;  %v1082_v27 = vmul.f32 %v1018_v38, %v2907_v3 }
 0x1e1   :  { %v1144_v63 = vmul.f32 %v1080_v52, %v2904_v21  ;;  %v1269_v57 = vmul.f32 0.7978846, %v1205_v48  ;;  %v1017_v29 = vmul.f32 0.044715, %v2924_v13  ;;  %v947_v8 = vmul.f32 0.5, %v2857_v17  ;;  %v780_v52 = vpop.f32.mrf.mxu0  ;;  %v893_v48 = vpop.f32.mrf.mxu1 }
 0x1e2   :  { %v1837_v51 = vpack.c.bf16 %v1455_v30, %v1454_v61  ;;  %v1207_v39 = vadd.f32 %v1143_v33, %v2898_v58  ;;  %v1146_v28 = vmul.f32 %v1082_v27, %v2907_v3  ;;  %v2939_v12 = vadd.f32 %v774_v2, %v2535_v44 }
 0x1e3   :  { %v1208_v35 = vadd.f32 %v1144_v63, %v2904_v21  ;;  %v2096_v53 = vpop.eup %2095  ;;  %2105 = vtanh.f32 %v1269_v57  ;;  %v1081_v34 = vmul.f32 %v1017_v29, %v2924_v13  ;;  %v1019_v60 = vmul.f32 0.044715, %v2929_v25 }
 0x1e4   :  { %1695 = vst [vmem:[%s3163_s5 + $0x78] sm:$0xff] %v1837_v51  ;;  %v1271_v9 = vmul.f32 0.7978846, %v1207_v39  ;;  %v2098_v17 = vpop.eup %2097  ;;  %v1456_v26 = vmul.f32 %v1392_v37, %v944_v43  ;;  %v1394_v46 = vadd.f32 1.0, %v2096_v53  ;;  %v1210_v16 = vadd.f32 %v1146_v28, %v2907_v3 }
 0x1e5   :  { %v1272_v47 = vmul.f32 0.7978846, %v1208_v35  ;;  %v1393_v62 = vadd.f32 1.0, %v2098_v17  ;;  %v1145_v41 = vmul.f32 %v1081_v34, %v2924_v13  ;;  %v1083_v4 = vmul.f32 %v1019_v60, %v2929_v25 }
 0x1e6   :  { %2107 = vtanh.f32 %v1271_v9  ;;  %v1458_v54 = vmul.f32 %v1394_v46, %v946_v22  ;;  %v1274_v14 = vmul.f32 0.7978846, %v1210_v16  ;;  %v1020_v32 = vmul.f32 0.044715, %v2939_v12 }
 0x1e7   :  { %v2100_v23 = vpop.eup %2099  ;;  %2109 = vtanh.f32 %v1272_v47  ;;  %v1457_v24 = vmul.f32 %v1393_v62, %v945_v6  ;;  %v1209_v43 = vadd.f32 %v1145_v41, %v2924_v13  ;;  %v1147_v20 = vmul.f32 %v1083_v4, %v2929_v25 }
 0x1e8   :  { %v1395_v42 = vadd.f32 1.0, %v2100_v23  ;;  %2111 = vtanh.f32 %v1274_v14  ;;  %v1084_v19 = vmul.f32 %v1020_v32, %v2939_v12  ;;  %v2954_v18 = vadd.f32 %v887_v50, %v2537_v45 }
 0x1e9   :  { %v2957_v55 = vadd.f32 %v776_v7, %v2539_v10  ;;  %v2102_v22 = vpop.eup %2101  ;;  %v1838_v59 = vpack.c.bf16 %v1457_v24, %v1456_v26  ;;  %v1273_v5 = vmul.f32 0.7978846, %v1209_v43  ;;  %v1211_v6 = vadd.f32 %v1147_v20, %v2929_v25 }
 0x1ea   :  { %v1459_v56 = vmul.f32 %v1395_v42, %v947_v8  ;;  %v948_v0 = vmul.f32 0.5, %v2860_v15  ;;  %v1148_v31 = vmul.f32 %v1084_v19, %v2939_v12  ;;  %v1022_v61 = vmul.f32 0.044715, %v2954_v18  ;;  %v782_v8 = vpop.f32.mrf.mxu0 }
 0x1eb   :  { %1696 = vst [vmem:[%s3163_s5 + $0x80] sm:$0xff] %v1838_v59  ;;  %v950_v11 = vmul.f32 0.5, %v2866_v36  ;;  %2113 = vtanh.f32 %v1273_v5  ;;  %v1275_v30 = vmul.f32 0.7978846, %v1211_v6  ;;  %v1396_v33 = vadd.f32 1.0, %v2102_v22  ;;  %v895_v59 = vpop.f32.mrf.mxu1 }
 0x1ec   :  { %v1839_v38 = vpack.c.bf16 %v1459_v56, %v1458_v54  ;;  %v949_v2 = vmul.f32 0.5, %v2884_v1  ;;  %v1212_v15 = vadd.f32 %v1148_v31, %v2939_v12  ;;  %v1086_v37 = vmul.f32 %v1022_v61, %v2954_v18  ;;  %v2104_v63 = vpop.eup %2103  ;;  %v784_v31 = vpop.f32.mrf.mxu0 }
 0x1ed   :  { %v951_v27 = vmul.f32 0.5, %v2898_v58  ;;  %2115 = vtanh.f32 %v1275_v30  ;;  %v1021_v36 = vmul.f32 0.044715, %v2957_v55  ;;  %v2976_v51 = vadd.f32 %v889_v40, %v2541_v49 }
 0x1ee   :  { %1697 = vst [vmem:[%s3163_s5 + $0x88] sm:$0xff] %v1839_v38  ;;  %v1276_v57 = vmul.f32 0.7978846, %v1212_v15  ;;  %v1150_v1 = vmul.f32 %v1086_v37, %v2954_v18  ;;  %v2980_v39 = vadd.f32 %v780_v52, %v2535_v44  ;;  %v2983_v29 = vadd.f32 %v893_v48, %v2537_v45 }
 0x1ef   :  { %v952_v35 = vmul.f32 0.5, %v2904_v21  ;;  %v954_v58 = vmul.f32 0.5, %v2907_v3  ;;  %v1085_v28 = vmul.f32 %v1021_v36, %v2957_v55  ;;  %v1023_v53 = vmul.f32 0.044715, %v2976_v51 }
 0x1f0   :  { %v2106_v9 = vpop.eup %2105  ;;  %v1460_v34 = vmul.f32 %v1396_v33, %v948_v0  ;;  %v1398_v60 = vadd.f32 1.0, %v2104_v63  ;;  %v1214_v50 = vadd.f32 %v1150_v1, %v2954_v18  ;;  %v1024_v17 = vmul.f32 0.044715, %v2980_v39 }
 0x1f1   :  { %v1397_v26 = vadd.f32 1.0, %v2106_v9  ;;  %v1149_v46 = vmul.f32 %v1085_v28, %v2957_v55  ;;  %v1087_v47 = vmul.f32 %v1023_v53, %v2976_v51  ;;  %v2994_v21 = vadd.f32 %v782_v8, %v2539_v10  ;;  %v786_v28 = vpop.f32.mrf.mxu0 }
 0x1f2   :  { %2117 = vtanh.f32 %v1276_v57  ;;  %v1278_v16 = vmul.f32 0.7978846, %v1214_v50  ;;  %v1088_v62 = vmul.f32 %v1024_v17, %v2980_v39  ;;  %v1026_v41 = vmul.f32 0.044715, %v2983_v29 }
 0x1f3   :  { %v2108_v3 = vpop.eup %2107  ;;  %v1461_v7 = vmul.f32 %v1397_v26, %v949_v2  ;;  %v1213_v54 = vadd.f32 %v1149_v46, %v2957_v55  ;;  %v1151_v14 = vmul.f32 %v1087_v47, %v2976_v51  ;;  %v1462_v32 = vmul.f32 %v1398_v60, %v950_v11 }
 0x1f4   :  { %v2110_v4 = vpop.eup %2109  ;;  %v1399_v23 = vadd.f32 1.0, %v2108_v3  ;;  %2119 = vtanh.f32 %v1278_v16  ;;  %v1152_v24 = vmul.f32 %v1088_v62, %v2980_v39  ;;  %v1090_v42 = vmul.f32 %v1026_v41, %v2983_v29  ;;  %v790_v41 = vpop.f32.mrf.mxu0 }
 0x1f5   :  { %v2112_v43 = vpop.eup %2111  ;;  %v1840_v20 = vpack.c.bf16 %v1461_v7, %v1460_v34  ;;  %v1277_v19 = vmul.f32 0.7978846, %v1213_v54  ;;  %v1215_v22 = vadd.f32 %v1151_v14, %v2976_v51  ;;  %v1400_v56 = vadd.f32 1.0, %v2110_v4 }
 0x1f6   :  { %v1463_v40 = vmul.f32 %v1399_v23, %v951_v27  ;;  %v1402_v5 = vadd.f32 1.0, %v2112_v43  ;;  %v1216_v6 = vadd.f32 %v1152_v24, %v2980_v39  ;;  %v1154_v0 = vmul.f32 %v1090_v42, %v2983_v29  ;;  %v897_v27 = vpop.f32.mrf.mxu1 }
 0x1f7   :  { %1698 = vst [vmem:[%s3163_s5 + $0x90] sm:$0xff] %v1840_v20  ;;  %2121 = vtanh.f32 %v1277_v19  ;;  %v1279_v52 = vmul.f32 0.7978846, %v1215_v22  ;;  %v1025_v38 = vmul.f32 0.044715, %v2994_v21  ;;  %v953_v30 = vmul.f32 0.5, %v2924_v13 }
 0x1f8   :  { %v1841_v61 = vpack.c.bf16 %v1463_v40, %v1462_v32  ;;  %v2114_v11 = vpop.eup %2113  ;;  %v1280_v48 = vmul.f32 0.7978846, %v1216_v6  ;;  %v1218_v33 = vadd.f32 %v1154_v0, %v2983_v29  ;;  %v3012_v2 = vadd.f32 %v895_v59, %v2541_v49  ;;  %v899_v62 = vpop.f32.mrf.mxu1 }
 0x1f9   :  { %v1401_v15 = vadd.f32 1.0, %v2114_v11  ;;  %2123 = vtanh.f32 %v1279_v52  ;;  %v1089_v37 = vmul.f32 %v1025_v38, %v2994_v21  ;;  %v3019_v63 = vadd.f32 %v784_v31, %v2535_v44 }
 0x1fa   :  { %1699 = vst [vmem:[%s3163_s5 + $0x98] sm:$0xff] %v1841_v61  ;;  %v2116_v36 = vpop.eup %2115  ;;  %v1464_v13 = vmul.f32 %v1400_v56, %v952_v35  ;;  %v1466_v57 = vmul.f32 %v1402_v5, %v954_v58  ;;  %v955_v1 = vmul.f32 0.5, %v2929_v25  ;;  %v1027_v8 = vmul.f32 0.044715, %v3012_v2  ;;  %v903_v56 = vpop.f32.mrf.mxu1 }
 0x1fb   :  { %v1465_v53 = vmul.f32 %v1401_v15, %v953_v30  ;;  %v1403_v9 = vadd.f32 1.0, %v2116_v36  ;;  %2125 = vtanh.f32 %v1280_v48  ;;  %v1153_v34 = vmul.f32 %v1089_v37, %v2994_v21 }
 0x1fc   :  { %v1282_v60 = vmul.f32 0.7978846, %v1218_v33  ;;  %v1091_v50 = vmul.f32 %v1027_v8, %v3012_v2  ;;  %v1028_v17 = vmul.f32 0.044715, %v3019_v63  ;;  %v3027_v26 = vadd.f32 %v897_v27, %v2537_v45 }
 0x1fd   :  { %v1842_v35 = vpack.c.bf16 %v1465_v53, %v1464_v13  ;;  %v1467_v58 = vmul.f32 %v1403_v9, %v955_v1  ;;  %v1217_v25 = vadd.f32 %v1153_v34, %v2994_v21  ;;  %v3031_v46 = vadd.f32 %v786_v28, %v2539_v10  ;;  %v905_v13 = vpop.f32.mrf.mxu1 }
 0x1fe   :  { %v956_v47 = vmul.f32 0.5, %v2939_v12  ;;  %v1155_v3 = vmul.f32 %v1091_v50, %v3012_v2  ;;  %v1092_v16 = vmul.f32 %v1028_v17, %v3019_v63  ;;  %v958_v23 = vmul.f32 0.5, %v2954_v18 }
 0x1ff   :  { %v2118_v4 = vpop.eup %2117  ;;  %1700 = vst [vmem:[%s3163_s5 + $0xa0] sm:$0xff] %v1842_v35  ;;  %v1843_v7 = vpack.c.bf16 %v1467_v58, %v1466_v57  ;;  %v1281_v54 = vmul.f32 0.7978846, %v1217_v25  ;;  %v1030_v14 = vmul.f32 0.044715, %v3027_v26  ;;  %2127 = vtanh.f32 %v1282_v60 }
 0x200   :  { %v1219_v12 = vadd.f32 %v1155_v3, %v3012_v2  ;;  %v1156_v32 = vmul.f32 %v1092_v16, %v3019_v63  ;;  %v1029_v24 = vmul.f32 0.044715, %v3031_v46  ;;  %v3049_v18 = vadd.f32 %v899_v62, %v2541_v49  ;;  %v907_v62 = vpop.f32.mrf.mxu1 }
 0x201   :  { %v2120_v42 = vpop.eup %2119  ;;  %1701 = vst [vmem:[%s3163_s5 + $0xa8] sm:$0xff] %v1843_v7  ;;  %2129 = vtanh.f32 %v1281_v54  ;;  %v1094_v43 = vmul.f32 %v1030_v14, %v3027_v26  ;;  %v3052_v20 = vadd.f32 %v790_v41, %v2535_v44  ;;  %v1404_v40 = vadd.f32 1.0, %v2118_v4 }
 0x202   :  { %v1283_v19 = vmul.f32 0.7978846, %v1219_v12  ;;  %v1220_v22 = vadd.f32 %v1156_v32, %v3019_v63  ;;  %v1093_v59 = vmul.f32 %v1029_v24, %v3031_v46  ;;  %v957_v5 = vmul.f32 0.5, %v2957_v55  ;;  %v792_v55 = vpop.f32.mrf.mxu0 }
 0x203   :  { %v959_v6 = vmul.f32 0.5, %v2976_v51  ;;  %v1158_v0 = vmul.f32 %v1094_v43, %v3027_v26  ;;  %v1031_v31 = vmul.f32 0.044715, %v3049_v18  ;;  %v1406_v52 = vadd.f32 1.0, %v2120_v42 }
 0x204   :  { %v2122_v61 = vpop.eup %2121  ;;  %2131 = vtanh.f32 %v1283_v19  ;;  %v1284_v38 = vmul.f32 0.7978846, %v1220_v22  ;;  %v1157_v11 = vmul.f32 %v1093_v59, %v3031_v46  ;;  %v1032_v15 = vmul.f32 0.044715, %v3052_v20  ;;  %v794_v16 = vpop.f32.mrf.mxu0 }
 0x205   :  { %v1405_v30 = vadd.f32 1.0, %v2122_v61  ;;  %v1222_v48 = vadd.f32 %v1158_v0, %v3027_v26  ;;  %v1095_v33 = vmul.f32 %v1031_v31, %v3049_v18  ;;  %v1468_v51 = vmul.f32 %v1404_v40, %v956_v47 }
 0x206   :  { %v2124_v37 = vpop.eup %2123  ;;  %2133 = vtanh.f32 %v1284_v38  ;;  %v1221_v27 = vadd.f32 %v1157_v11, %v3031_v46  ;;  %v3066_v36 = vadd.f32 %v903_v56, %v2537_v45  ;;  %v1470_v9 = vmul.f32 %v1406_v52, %v958_v23  ;;  %v796_v0 = vpop.f32.mrf.mxu0 }
 0x207   :  { %v1469_v57 = vmul.f32 %v1405_v30, %v957_v5  ;;  %v1407_v1 = vadd.f32 1.0, %v2124_v37  ;;  %v1286_v8 = vmul.f32 0.7978846, %v1222_v48  ;;  %v1159_v28 = vmul.f32 %v1095_v33, %v3049_v18 }
 0x208   :  { %v2126_v53 = vpop.eup %2125  ;;  %v1285_v34 = vmul.f32 0.7978846, %v1221_v27  ;;  %v1096_v60 = vmul.f32 %v1032_v15, %v3052_v20  ;;  %v3071_v50 = vadd.f32 %v792_v55, %v2539_v10  ;;  %v960_v25 = vmul.f32 0.5, %v2980_v39 }
 0x209   :  { %v1844_v17 = vpack.c.bf16 %v1469_v57, %v1468_v51  ;;  %v1471_v35 = vmul.f32 %v1407_v1, %v959_v6  ;;  %2135 = vtanh.f32 %v1286_v8  ;;  %v1223_v58 = vadd.f32 %v1159_v28, %v3049_v18 }
 0x20a   :  { %v962_v47 = vmul.f32 0.5, %v2983_v29  ;;  %2137 = vtanh.f32 %v1285_v34  ;;  %v1160_v3 = vmul.f32 %v1096_v60, %v3052_v20  ;;  %v1408_v4 = vadd.f32 1.0, %v2126_v53 }
 0x20b   :  { %1702 = vst [vmem:[%s3163_s5 + $0xb0] sm:$0xff] %v1844_v17  ;;  %v1845_v41 = vpack.c.bf16 %v1471_v35, %v1470_v9  ;;  %v1287_v7 = vmul.f32 0.7978846, %v1223_v58  ;;  %v1034_v23 = vmul.f32 0.044715, %v3066_v36  ;;  %v961_v54 = vmul.f32 0.5, %v2994_v21  ;;  %v909_v9 = vpop.f32.mrf.mxu1 }
 0x20c   :  { %v1224_v39 = vadd.f32 %v1160_v3, %v3052_v20  ;;  %v1033_v29 = vmul.f32 0.044715, %v3071_v50  ;;  %v3085_v14 = vadd.f32 %v905_v13, %v2541_v49  ;;  %v2128_v12 = vpop.eup %2127  ;;  %v3092_v24 = vadd.f32 %v794_v16, %v2535_v44 }
 0x20d   :  { %1703 = vst [vmem:[%s3163_s5 + $0xb8] sm:$0xff] %v1845_v41  ;;  %2139 = vtanh.f32 %v1287_v7  ;;  %v1098_v32 = vmul.f32 %v1034_v23, %v3066_v36  ;;  %v3095_v21 = vadd.f32 %v907_v62, %v2537_v45  ;;  %v963_v43 = vmul.f32 0.5, %v3012_v2 }
 0x20e   :  { %v2130_v42 = vpop.eup %2129  ;;  %v1288_v40 = vmul.f32 0.7978846, %v1224_v39  ;;  %v1097_v19 = vmul.f32 %v1033_v29, %v3071_v50  ;;  %v1035_v22 = vmul.f32 0.044715, %v3085_v14  ;;  %v1472_v59 = vmul.f32 %v1408_v4, %v960_v25 }
 0x20f   :  { %v1409_v56 = vadd.f32 1.0, %v2130_v42  ;;  %v1162_v5 = vmul.f32 %v1098_v32, %v3066_v36  ;;  %v1036_v6 = vmul.f32 0.044715, %v3092_v24  ;;  %v1410_v44 = vadd.f32 1.0, %v2128_v12 }
 0x210   :  { %2141 = vtanh.f32 %v1288_v40  ;;  %v1161_v45 = vmul.f32 %v1097_v19, %v3071_v50  ;;  %v1099_v31 = vmul.f32 %v1035_v22, %v3085_v14  ;;  %v1038_v11 = vmul.f32 0.044715, %v3095_v21 }
 0x211   :  { %v2132_v61 = vpop.eup %2131  ;;  %v1473_v2 = vmul.f32 %v1409_v56, %v961_v54  ;;  %v1226_v52 = vadd.f32 %v1162_v5, %v3066_v36  ;;  %v1100_v38 = vmul.f32 %v1036_v6, %v3092_v24  ;;  %v3110_v15 = vadd.f32 %v796_v0, %v2539_v10 }
 0x212   :  { %v1411_v30 = vadd.f32 1.0, %v2132_v61  ;;  %v1225_v48 = vadd.f32 %v1161_v45, %v3071_v50  ;;  %v1163_v33 = vmul.f32 %v1099_v31, %v3085_v14  ;;  %v1102_v13 = vmul.f32 %v1038_v11, %v3095_v21 }
 0x213   :  { %v2134_v55 = vpop.eup %2133  ;;  %v1846_v37 = vpack.c.bf16 %v1473_v2, %v1472_v59  ;;  %v1290_v51 = vmul.f32 0.7978846, %v1226_v52  ;;  %v1164_v27 = vmul.f32 %v1100_v38, %v3092_v24  ;;  %v1474_v57 = vmul.f32 %v1410_v44, %v962_v47 }
 0x214   :  { %v1475_v1 = vmul.f32 %v1411_v30, %v963_v43  ;;  %v1289_v8 = vmul.f32 0.7978846, %v1225_v48  ;;  %v1227_v28 = vadd.f32 %v1163_v33, %v3085_v14  ;;  %v1166_v53 = vmul.f32 %v1102_v13, %v3095_v21 }
 0x215   :  { %1704 = vst [vmem:[%s3163_s5 + $0xc0] sm:$0xff] %v1846_v37  ;;  %2143 = vtanh.f32 %v1290_v51  ;;  %v1228_v10 = vadd.f32 %v1164_v27, %v3092_v24  ;;  %v1412_v17 = vadd.f32 1.0, %v2134_v55  ;;  %v964_v25 = vmul.f32 0.5, %v3019_v63 }
 0x216   :  { %v2136_v34 = vpop.eup %2135  ;;  %v1847_v60 = vpack.c.bf16 %v1475_v1, %v1474_v57  ;;  %2145 = vtanh.f32 %v1289_v8  ;;  %v1291_v35 = vmul.f32 0.7978846, %v1227_v28  ;;  %v965_v47 = vmul.f32 0.5, %v3031_v46 }
 0x217   :  { %v2138_v58 = vpop.eup %2137  ;;  %v1037_v3 = vmul.f32 0.044715, %v3110_v15  ;;  %v1230_v62 = vadd.f32 %v1166_v53, %v3095_v21  ;;  %v910_v41 = vadd.f32 %v909_v9, %v2541_v49  ;;  %v1414_v4 = vadd.f32 1.0, %v2136_v34 }
 0x218   :  { %1705 = vst [vmem:[%s3163_s5 + $0xc8] sm:$0xff] %v1847_v60  ;;  %v1413_v16 = vadd.f32 1.0, %v2138_v58  ;;  %2147 = vtanh.f32 %v1291_v35  ;;  %v1292_v7 = vmul.f32 0.7978846, %v1228_v10  ;;  %v1476_v63 = vmul.f32 %v1412_v17, %v964_v25 }
 0x219   :  { %v1101_v23 = vmul.f32 %v1037_v3, %v3110_v15  ;;  %v1039_v46 = vmul.f32 0.044715, %v910_v41  ;;  %v966_v29 = vmul.f32 0.5, %v3027_v26  ;;  %v967_v12 = vmul.f32 0.5, %v3049_v18 }
 0x21a   :  { %v2140_v54 = vpop.eup %2139  ;;  %v1477_v39 = vmul.f32 %v1413_v16, %v965_v47  ;;  %v1294_v40 = vmul.f32 0.7978846, %v1230_v62  ;;  %2149 = vtanh.f32 %v1292_v7  ;;  %v968_v61 = vmul.f32 0.5, %v3052_v20 }
 0x21b   :  { %v1415_v32 = vadd.f32 1.0, %v2140_v54  ;;  %v1165_v42 = vmul.f32 %v1101_v23, %v3110_v15  ;;  %v1103_v19 = vmul.f32 %v1039_v46, %v910_v41  ;;  %v1478_v49 = vmul.f32 %v1414_v4, %v966_v29 }
 0x21c   :  { %v1848_v43 = vpack.c.bf16 %v1477_v39, %v1476_v63  ;;  %2151 = vtanh.f32 %v1294_v40  ;;  %v969_v52 = vmul.f32 0.5, %v3071_v50  ;;  %v970_v30 = vmul.f32 0.5, %v3066_v36 }
 0x21d   :  { %v2142_v22 = vpop.eup %2141  ;;  %v1479_v59 = vmul.f32 %v1415_v32, %v967_v12  ;;  %v1229_v56 = vadd.f32 %v1165_v42, %v3110_v15  ;;  %v1167_v5 = vmul.f32 %v1103_v19, %v910_v41  ;;  %v971_v55 = vmul.f32 0.5, %v3085_v14 }
 0x21e   :  { %1706 = vst [vmem:[%s3163_s5 + $0xd0] sm:$0xff] %v1848_v43  ;;  %v1416_v44 = vadd.f32 1.0, %v2142_v22  ;;  %v972_v8 = vmul.f32 0.5, %v3092_v24  ;;  %v973_v14 = vmul.f32 0.5, %v3110_v15  ;;  %v974_v60 = vmul.f32 0.5, %v3095_v21 }
 0x21f   :  { %v1849_v26 = vpack.c.bf16 %v1479_v59, %v1478_v49  ;;  %v1293_v6 = vmul.f32 0.7978846, %v1229_v56  ;;  %v1231_v18 = vadd.f32 %v1167_v5, %v910_v41  ;;  %v975_v17 = vmul.f32 0.5, %v910_v41 }
 0x220   :  { %v1480_v48 = vmul.f32 %v1416_v44, %v968_v61 }
 0x221   :  { %1707 = vst [vmem:[%s3163_s5 + $0xd8] sm:$0xff] %v1849_v26  ;;  %2153 = vtanh.f32 %v1293_v6  ;;  %v1295_v45 = vmul.f32 0.7978846, %v1231_v18 }
 0x222   :  { %v2144_v0 = vpop.eup %2143 }
 0x223   :  { %v2146_v31 = vpop.eup %2145  ;;  %v1418_v2 = vadd.f32 1.0, %v2144_v0  ;;  %2155 = vtanh.f32 %v1295_v45 }
 0x224   :  { %v1417_v38 = vadd.f32 1.0, %v2146_v31 }
 0x225   :  { %v2148_v11 = vpop.eup %2147  ;;  %v1482_v51 = vmul.f32 %v1418_v2, %v970_v30 }
 0x226   :  { %v1481_v33 = vmul.f32 %v1417_v38, %v969_v52  ;;  %v1419_v37 = vadd.f32 1.0, %v2148_v11 }
 0x227   :  { %v2150_v57 = vpop.eup %2149 }
 0x228   :  { %v1850_v27 = vpack.c.bf16 %v1481_v33, %v1480_v48  ;;  %v1483_v13 = vmul.f32 %v1419_v37, %v971_v55  ;;  %v1420_v36 = vadd.f32 1.0, %v2150_v57 }
 0x229   :  { %v2152_v50 = vpop.eup %2151 }
 0x22a   :  { %1708 = vst [vmem:[%s3163_s5 + $0xe0] sm:$0xff] %v1850_v27  ;;  %v1851_v20 = vpack.c.bf16 %v1483_v13, %v1482_v51  ;;  %v1422_v10 = vadd.f32 1.0, %v2152_v50  ;;  %v1484_v9 = vmul.f32 %v1420_v36, %v972_v8 }
 0x22c   :  { %1709 = vst [vmem:[%s3163_s5 + $0xe8] sm:$0xff] %v1851_v20  ;;  %v1486_v25 = vmul.f32 %v1422_v10, %v974_v60 }
 0x22e   :  { %v2154_v1 = vpop.eup %2153 }
 0x22f   :  { %v1421_v28 = vadd.f32 1.0, %v2154_v1 }
 0x230   :  { %v2156_v53 = vpop.eup %2155 }
 0x231   :  { %v1485_v34 = vmul.f32 %v1421_v28, %v973_v14  ;;  %v1423_v35 = vadd.f32 1.0, %v2156_v53 }
 0x233   :  { %v1852_v58 = vpack.c.bf16 %v1485_v34, %v1484_v9  ;;  %v1487_v47 = vmul.f32 %v1423_v35, %v975_v17 }
 0x235   :  { %1710 = vst [vmem:[%s3163_s5 + $0xf0] sm:$0xff] %v1852_v58  ;;  %v1853_v3 = vpack.c.bf16 %v1487_v47, %v1486_v25 }
 0x237   :  { %1711 = vst [vmem:[%s3163_s5 + $0xf8] sm:$0xff] %v1853_v3 }

// kernel: reformer_classification_forward.9
= control target key start
LH: loop header
LB: loop body
LE: loop exit
PB: predicated region body
PF: predicated region fallthrough
CT: control target
= control target key end

     0   :  { %s3718_s18 = smov 0   ;;  %s3720_s19 = smov 0   ;;  %s4750_s0 = inlined_call_operand.vmem [shape: bf16[128,256], index: 0, kind: input, shape index: {}, may-alias: {0,1}]   ;;  %s4751_s1 = inlined_call_operand.vmem [shape: bf16[128,256], index: 1, kind: input, shape index: {}, may-alias: {0,1}]   ;;  %s4752_s2 = inlined_call_operand.vmem [shape: bf16[128,128], index: 2, kind: input, shape index: {}]   ;;  %s4753_s3 = inlined_call_operand.vmem [shape: f32[1,128], index: 3, kind: input, shape index: {}]   ;;  %s4754_s4 = inlined_call_operand.vmem [shape: bf16[128,128], index: 4, kind: input, shape index: {}]   ;;  %s4755_s5 = inlined_call_operand.vmem [shape: bf16[128,128], index: 5, kind: output, shape index: {}]  }
   0x1   :  { %s3722_s20 = smov 0   ;;  %s3724_s21 = smov 0  }
   0x2   :  { %s3726_s22 = smov 0  }
   0x3 LB: > { %s27_s23 = sadd.s32 1, %s3679_s21  ;;  %p43_p1 = scmp.ne.s32.totalorder %s3671_s19, %s3667_s18  ;;  %s3683_s22 = sphi %s3726_s22, %s15_s22   ;;  %s3679_s21 = sphi %s3724_s21, %s4759_s21   ;;  %s3675_s20 = sphi %s3722_s20, %s4758_s20   ;;  %s3671_s19 = sphi %s3720_s19, %s4757_s19   ;;  %s3667_s18 = sphi %s3718_s18, %s4756_s18  }
   0x4   : > { %p29_p0 = scmp.ge.s32.totalorder %s27_s23, 2  ;;  %p44_p2 = scmp.eq.s32.totalorder %s3683_s22, 0 }
   0x5   : > { %s36_s25 = sadd.s32 1, %s3671_s19  ;;  %p2880_p5 = scmp.ge.s32.totalorder %s3683_s22, 2 }
   0x6   : > { %s4761_s23 = smov (%p29_p0, %s27_s23), 0  ;;  %p45_p3 = por %p44_p2, %p43_p1 }
   0x7   : > { %s33_s24 = ssub.s32 %s3679_s21, %s4761_s23  ;;  %199 = sbr.rel (%p2880_p5) target bundleno = 21 (0x15), region = 24 }
   0x8   : > { %p34_p4 = scmp.eq.s32.totalorder %s33_s24, 0 }
   0xa   : > { %s3753_s26 = scalar_select %p34_p4, %s3671_s19, %s36_s25  }
   0xc   : > { %202 = sbr.rel (!%p45_p3) target bundleno = 21 (0x15), region = 28  ;;  %s204_s27 = sand.u32 (%p45_p3), 1, %s3671_s19  }
   0xd   : > { %s2978_s28 = sshll.u32 (%p45_p3), %s3679_s21, 6  ;;  %s2881_s29 = sshll.u32 (%p45_p3), %s204_s27, 5 }
   0xe   : > { %s211_s7 = scalar_lea.vmem (%p45_p3), %s4750_s0, %s2978_s28  ;;  %s206_s8 = scalar_lea.vmem (%p45_p3), [#allocation3], %s2881_s29 }
   0xf   : > { %v228_v0 = vld [vmem:[%s211_s7] sm:$0xf] (%p45_p3)  ;;  %v230_v1 = vld [vmem:[%s211_s7 + $0x8] sm:$0xf] (%p45_p3)  ;;  %v232_v2 = vld [vmem:[%s211_s7 + $0x10] sm:$0xf] (%p45_p3) }
  0x10   : > { %229 = vst [vmem:[%s206_s8] sm:$0xf] (%p45_p3), %v228_v0  ;;  %231 = vst [vmem:[%s206_s8 + $0x4] sm:$0xf] (%p45_p3), %v230_v1  ;;  %v234_v3 = vld [vmem:[%s211_s7 + $0x18] sm:$0xf] (%p45_p3) }
  0x11   : > { %v236_v4 = vld [vmem:[%s211_s7 + $0x20] sm:$0xf]  ;;  %233 = vst [vmem:[%s206_s8 + $0x8] sm:$0xf] %v232_v2  ;;  %235 = vst [vmem:[%s206_s8 + $0xc] sm:$0xf] %v234_v3 }
  0x12   : > { %237 = vst [vmem:[%s206_s8 + $0x10] sm:$0xf] %v236_v4  ;;  %v238_v5 = vld [vmem:[%s211_s7 + $0x28] sm:$0xf]  ;;  %v240_v6 = vld [vmem:[%s211_s7 + $0x30] sm:$0xf] }
  0x13   : > { %v242_v7 = vld [vmem:[%s211_s7 + $0x38] sm:$0xf]  ;;  %239 = vst [vmem:[%s206_s8 + $0x14] sm:$0xf] %v238_v5  ;;  %241 = vst [vmem:[%s206_s8 + $0x18] sm:$0xf] %v240_v6 }
  0x14   : > { %243 = vst [vmem:[%s206_s8 + $0x1c] sm:$0xf] %v242_v7 }
  0x15 PF: > { %p2885_p6 = scmp.ge.s32.totalorder %s3683_s22, 1  ;;  %p303_p7 = scmp.lt.s32.totalorder %s3683_s22, 3 }
  0x17   : > { %p304_p8 = pnand %p2885_p6, %p303_p7 }
  0x18   : > { %s2887_s9 = sshll.u32 (!%p304_p8), %s3675_s20, 3  ;;  %s3685_s14 = smov (!%p304_p8), 96  }
  0x19   : > { %307 = sbr.rel (%p304_p8) target bundleno = 2060 (0x80c), region = 77  ;;  %p353_p9 = scmp.lt.s32.totalorder (!%p304_p8), %s2887_s9, 15 }
  0x1a   : > { %s310_s15 = sand.u32 (!%p304_p8), 1, %s3667_s18   ;;  %s3686_s18 = smov (!%p304_p8), 64  }
  0x1b   : > { %s2886_s16 = sshll.u32 (!%p304_p8), %s310_s15, 5  ;;  %s3687_s20 = smov (!%p304_p8), 32  }
  0x1c   : > { %s3861_s17 = scalar_lea.vmem (!%p304_p8), [#allocation3], %s2886_s16 }
  0x1e   : > { %s4763_s9 = smov (!%p353_p9, %s2887_s9), 15  ;;  %vm496_vm0 = vcmask 261120   ;;  %v3005_v56 = vld [vmem:[%s3861_s17] sm:$0xff]   ;;  %vm646_vm2 = vcmask 523264  }
  0x1f   : > { %s2979_s10 = sshll.u32 %s4763_s9, 3  ;;  %v3006_v57 = vunpack.c.l.bf16 %v3005_v56  ;;  %v3007_v58 = vunpack.c.h.bf16 %v3005_v56 }
  0x20   : > { %s3770_s13 = scalar_lea.vmem %s4751_s1, %s2979_s10 }
  0x21   : > { %v478_v8 = vld [vmem:[%s3770_s13 + $0x20] ss:$16 sps:$4 sm:$0xff]   ;;  %v479_v9 = vld [vmem:[%s3770_s13 + $0x28] ss:$16 sps:$4 sm:$0xff]   ;;  %v460_v59 = vmul.f32 0.17677669, %v3006_v57 }
  0x22   : > { %v475_v10 = vld [vmem:[%s3770_s13 + $0x10] ss:$8 sps:$4 sm:$0xff]   ;;  %v3775_v11 = vunpack.c.h.bf16 %v478_v8  ;;  %v3777_v12 = vunpack.c.l.bf16 %v478_v8  ;;  %v3779_v13 = vunpack.c.h.bf16 %v479_v9  ;;  %v3781_v14 = vunpack.c.l.bf16 %v479_v9  ;;  %v473_v17 = vld [vmem:[%s3770_s13] ss:$8 sps:$4 sm:$0xff]  }
  0x23   : > { %v3783_v15 = vunpack.c.h.bf16 %v475_v10  ;;  %v3785_v16 = vunpack.c.l.bf16 %v475_v10  ;;  %v3806_v30 = vunpack.c.h.bf16 %v473_v17  ;;  %v3808_v31 = vunpack.c.l.bf16 %v473_v17  ;;  %v1004_v36 = vld [vmem:[%s3770_s13 + $0x30] ss:$8 sps:$4 sm:$0xff]   ;;  %v1001_v38 = vld [vmem:[%s3770_s13 + $0x20] ss:$8 sps:$4 sm:$0xff]  }
  0x24   : > { %v494_v18 = vmul.f32 %v3775_v11, %v3775_v11  ;;  %v492_v19 = vmul.f32 %v3777_v12, %v3777_v12  ;;  %v495_v20 = vmul.f32 %v3779_v13, %v3779_v13  ;;  %v493_v21 = vmul.f32 %v3781_v14, %v3781_v14  ;;  %v1000_v42 = vld [vmem:[%s3770_s13 + $0x10] ss:$8 sps:$4 sm:$0xff]   ;;  %v998_v47 = vld [vmem:[%s3770_s13] ss:$8 sps:$4 sm:$0xff]  }
  0x25   : > { %v491_v22 = vmul.f32 %v3783_v15, %v3783_v15  ;;  %v490_v23 = vmul.f32 %v3785_v16, %v3785_v16  ;;  %v489_v32 = vmul.f32 %v3806_v30, %v3806_v30  ;;  %v488_v33 = vmul.f32 %v3808_v31, %v3808_v31 }
  0x26   : > { %v515_v24 = vsel %vm496_vm0, %v494_v18, 0.0  ;;  %v509_v25 = vsel %vm496_vm0, %v492_v19, 0.0  ;;  %v518_v26 = vsel %vm496_vm0, %v495_v20, 0.0  ;;  %v512_v27 = vsel %vm496_vm0, %v493_v21, 0.0 }
  0x27   : > { %516 = vadd.xlane.f32.xlu0 %v515_v24  ;;  %510 = vadd.xlane.f32.xlu1 %v509_v25  ;;  %v506_v28 = vsel %vm496_vm0, %v491_v22, 0.0  ;;  %v503_v29 = vsel %vm496_vm0, %v490_v23, 0.0  ;;  %v500_v34 = vsel %vm496_vm0, %v489_v32, 0.0  ;;  %v497_v35 = vsel %vm496_vm0, %v488_v33, 0.0 }
  0x28   : > { %v3817_v37 = vunpack.c.h.bf16 %v1004_v36  ;;  %v3822_v40 = vunpack.c.l.bf16 %v1001_v38  ;;  %v3824_v41 = vunpack.c.l.bf16 %v1004_v36  ;;  %v3830_v44 = vunpack.c.h.bf16 %v1001_v38 }
  0x29   : > { %v3834_v46 = vunpack.c.l.bf16 %v1000_v42  ;;  %v3840_v49 = vunpack.c.h.bf16 %v1000_v42  ;;  %v3845_v51 = vunpack.c.l.bf16 %v998_v47  ;;  %v3850_v53 = vunpack.c.h.bf16 %v998_v47 }
  0x2a   : > { %v1020_v39 = vmul.f32 %v3817_v37, %v3817_v37  ;;  %v1017_v43 = vmul.f32 %v3822_v40, %v3822_v40  ;;  %v1019_v45 = vmul.f32 %v3824_v41, %v3824_v41  ;;  %v1018_v48 = vmul.f32 %v3830_v44, %v3830_v44 }
  0x2b   : > { %519 = vadd.xlane.f32.xlu0 %v518_v26  ;;  %513 = vadd.xlane.f32.xlu1 %v512_v27  ;;  %v1015_v50 = vmul.f32 %v3834_v46, %v3834_v46  ;;  %v1016_v52 = vmul.f32 %v3840_v49, %v3840_v49  ;;  %v1013_v54 = vmul.f32 %v3845_v51, %v3845_v51  ;;  %v461_v60 = vmul.f32 0.17677669, %v3007_v58 }
  0x2c   : > { %v1014_v55 = vmul.f32 %v3850_v53, %v3850_v53 }
  0x2d   : > { %v3864_v61 = vpack.c.bf16 %v461_v60, %v460_v59 }
  0x2f   : > { %507 = vadd.xlane.f32.xlu1 %v506_v28  ;;  %504 = vadd.xlane.f32.xlu0 %v503_v29 }
  0x30   : > { %3202 = vmatprep.mubr.msk.bf16.mxu0 %vm496_vm0, %v3864_v61 }
  0x33   : > { %501 = vadd.xlane.f32.xlu1 %v500_v34  ;;  %498 = vadd.xlane.f32.xlu0 %v497_v35 }
  0x44   : > { %1043 = vrot.lane.b32.xlu1 %v1020_v39, %s3685_s14 }
  0x48   : > { %1037 = vrot.lane.b32.xlu1 %v1017_v43, %s3685_s14 }
  0x49   : > { %1041 = vrot.lane.b32.xlu0 %v1019_v45, %s3685_s14 }
  0x4c   : > { %1039 = vrot.lane.b32.xlu1 %v1018_v48, %s3685_s14 }
  0x4d   : > { %1033 = vrot.lane.b32.xlu0 %v1015_v50, %s3685_s14 }
  0x50   : > { %1035 = vrot.lane.b32.xlu1 %v1016_v52, %s3685_s14 }
  0x51   : > { %1029 = vrot.lane.b32.xlu0 %v1013_v54, %s3685_s14 }
  0x54   : > { %1031 = vrot.lane.b32.xlu1 %v1014_v55, %s3685_s14 }
  0xb0   : > { %v517_v62 = vpop.xlane.xlu0 %516  ;;  %v511_v63 = vpop.xlane.xlu1 %510 }
  0xb1   : > { %v527_v0 = vmax.f32 %v517_v62, 1e-24  ;;  %v525_v1 = vmax.f32 %v511_v63, 1e-24  ;;  %v3091_v62 = vld [vmem:[%s3861_s17 + $0x8] sm:$0xff]  }
  0xb3   : > { %3453 = vrsqrt.f32 %v525_v1  ;;  %v3010_v1 = vunpack.c.l.bf16 %v3091_v62 }
  0xb4   : > { %v520_v2 = vpop.xlane.xlu0 %519  ;;  %v514_v3 = vpop.xlane.xlu1 %513  ;;  %3455 = vrsqrt.f32 %v527_v0 }
  0xb5   : > { %v528_v4 = vmax.f32 %v520_v2, 1e-24  ;;  %v526_v5 = vmax.f32 %v514_v3, 1e-24  ;;  %v3011_v2 = vunpack.c.h.bf16 %v3091_v62  ;;  %v3092_v3 = vld [vmem:[%s3861_s17 + $0x10] sm:$0xff]  }
  0xb7   : > { %3457 = vrsqrt.f32 %v528_v4  ;;  %v462_v4 = vmul.f32 0.17677669, %v3010_v1 }
  0xb8   : > { %3459 = vrsqrt.f32 %v526_v5  ;;  %v508_v6 = vpop.xlane.xlu1 %507  ;;  %v505_v7 = vpop.xlane.xlu0 %504  ;;  %v463_v5 = vmul.f32 0.17677669, %v3011_v2 }
  0xb9   : > { %v524_v8 = vmax.f32 %v508_v6, 1e-24  ;;  %v523_v9 = vmax.f32 %v505_v7, 1e-24  ;;  %v3014_v6 = vunpack.c.l.bf16 %v3092_v3  ;;  %v3015_v7 = vunpack.c.h.bf16 %v3092_v3 }
  0xbb   : > { %3461 = vrsqrt.f32 %v524_v8 }
  0xbc   : > { %3463 = vrsqrt.f32 %v523_v9  ;;  %v502_v10 = vpop.xlane.xlu1 %501  ;;  %v499_v17 = vpop.xlane.xlu0 %498  ;;  %v465_v9 = vmul.f32 0.17677669, %v3015_v7 }
  0xbd   : > { %v522_v18 = vmax.f32 %v502_v10, 1e-24  ;;  %v521_v19 = vmax.f32 %v499_v17, 1e-24  ;;  %v3093_v10 = vld [vmem:[%s3861_s17 + $0x18] sm:$0xff]  }
  0xbe   : > { %v3018_v17 = vunpack.c.l.bf16 %v3093_v10 }
  0xbf   : > { %3465 = vrsqrt.f32 %v522_v18  ;;  %v3019_v18 = vunpack.c.h.bf16 %v3093_v10 }
  0xc0   : > { %v1044_v20 = vpop.permute.xlu1 %1043  ;;  %v1042_v21 = vpop.permute.xlu0 %1041  ;;  %3467 = vrsqrt.f32 %v521_v19 }
  0xc1   : > { %v3454_v22 = vpop.eup %3453  ;;  %v1074_v23 = vsel %vm496_vm0, %v1044_v20, 0.0  ;;  %v1071_v24 = vsel %vm496_vm0, %v1042_v21, 0.0  ;;  %v466_v20 = vmul.f32 0.17677669, %v3018_v17  ;;  %v467_v21 = vmul.f32 0.17677669, %v3019_v18 }
  0xc2   : > { %v3456_v25 = vpop.eup %3455  ;;  %1075 = vadd.xlane.f32.xlu1 %v1074_v23  ;;  %1072 = vadd.xlane.f32.xlu0 %v1071_v24  ;;  %v541_v28 = vmul.f32 %v3454_v22, %v3777_v12 }
  0xc3   : > { %v543_v33 = vmul.f32 %v3456_v25, %v3775_v11  ;;  %v3905_v22 = vpack.c.bf16 %v467_v21, %v466_v20 }
  0xc4   : > { %v3458_v26 = vpop.eup %3457  ;;  %v1038_v27 = vpop.permute.xlu1 %1037 }
  0xc5   : > { %v3460_v29 = vpop.eup %3459  ;;  %v1065_v32 = vsel %vm496_vm0, %v1038_v27, 0.0  ;;  %v544_v34 = vmul.f32 %v3458_v26, %v3779_v13  ;;  %v1034_v43 = vpop.permute.xlu0 %1033 }
  0xc6   : > { %1066 = vadd.xlane.f32.xlu0 %v1065_v32  ;;  %v542_v35 = vmul.f32 %v3460_v29, %v3781_v14  ;;  %v1059_v11 = vsel %vm496_vm0, %v1034_v43, 0.0 }
  0xc7   : > { %v548_v36 = vpack.c.bf16 %v544_v34, %v543_v33 }
  0xc8   : > { %v3462_v38 = vpop.eup %3461  ;;  %v1040_v39 = vpop.permute.xlu1 %1039  ;;  %v547_v42 = vpack.c.bf16 %v542_v35, %v541_v28 }
  0xc9   : > { %v3464_v45 = vpop.eup %3463  ;;  %3370 = vmatprep.subr.msk.bf16.mxu0 %vm496_vm0, %v548_v36  ;;  %v571_v12 = vsel %vm496_vm0, %v548_v36, 0  ;;  %v1068_v47 = vsel %vm496_vm0, %v1040_v39, 0.0  ;;  %v540_v14 = vmul.f32 %v3462_v38, %v3783_v15  ;;  %v1030_v52 = vpop.permute.xlu0 %1029 }
  0xca   : > { %3195 = vmatpush3.bf16.xpose.msra.mxu0 %v571_v12  ;;  %1069 = vadd.xlane.f32.xlu0 %v1068_v47  ;;  %v539_v13 = vmul.f32 %v3464_v45, %v3785_v16  ;;  %v1053_v58 = vsel %vm496_vm0, %v1030_v52, 0.0  ;;  %v568_v59 = vsel %vm496_vm0, %v547_v42, 0 }
  0xcb   : > { %3371 = vmatprep.subr.msk.bf16.mxu0 %vm496_vm0, %v547_v42 }
  0xcc   : > { %v1036_v48 = vpop.permute.xlu1 %1035  ;;  %v3466_v54 = vpop.eup %3465  ;;  %v546_v55 = vpack.c.bf16 %v540_v14, %v539_v13 }
  0xcd   : > { %v1062_v50 = vsel %vm496_vm0, %v1036_v48, 0.0  ;;  %v3468_v56 = vpop.eup %3467  ;;  %v538_v60 = vmul.f32 %v3466_v54, %v3806_v30  ;;  %v464_v30 = vmul.f32 0.17677669, %v3014_v6  ;;  %v1591_v54 = vld [vmem:[%s3770_s13 + $0x30] ss:$8 sps:$4 sm:$0xff]  }
  0xce   : > { %1063 = vadd.xlane.f32.xlu1 %v1062_v50  ;;  %1060 = vadd.xlane.f32.xlu0 %v1059_v11  ;;  %v537_v15 = vmul.f32 %v3468_v56, %v3808_v31  ;;  %v565_v63 = vsel %vm496_vm0, %v546_v55, 0  ;;  %v3894_v31 = vpack.c.bf16 %v463_v5, %v462_v4  ;;  %v415_v4 = vlaneseq }
  0xcf   : > { %v3899_v19 = vpack.c.bf16 %v465_v9, %v464_v30 }
  0xd0   : > { %v1032_v57 = vpop.permute.xlu1 %1031  ;;  %v545_v0 = vpack.c.bf16 %v538_v60, %v537_v15  ;;  %v3931_v60 = vunpack.c.h.bf16 %v1591_v54  ;;  %v3949_v5 = vshrl.u32 %v415_v4, 7 }
  0xd1   : > { %v1056_v16 = vsel %vm496_vm0, %v1032_v57, 0.0 }
  0xd2   : > { %3197 = vmatpush3.bf16.xpose.msra.mxu0 %v568_v59  ;;  %1057 = vadd.xlane.f32.xlu1 %v1056_v16  ;;  %v562_v8 = vsel %vm496_vm0, %v545_v0, 0  ;;  %v3959_v6 = vadd.s32 24, %v3949_v5  ;;  %v3983_v20 = vadd.s32 48, %v3949_v5  ;;  %v3986_v21 = vadd.s32 32, %v3949_v5 }
  0xd3   : > { %3372 = vmatprep.subr.msk.bf16.mxu0 %vm496_vm0, %v546_v55  ;;  %1054 = vadd.xlane.f32.xlu0 %v1053_v58 }
  0xda   : > { %3199 = vmatpush3.bf16.xpose.msra.mxu0 %v565_v63 }
  0xdb   : > { %3373 = vmatprep.subr.msk.bf16.mxu0 %vm496_vm0, %v545_v0 }
  0xe2   : > { %3201 = vmatpush3.bf16.xpose.msra.mxu0 %v562_v8  ;;  %v3964_v8 = vadd.s32 8, %v3949_v5 }
  0xe3   : > { %1111 = vrot.lane.b32.xlu1 %v3894_v31, %s3685_s14 }
  0xe9   : > { %3203 = vmatmul.mubr.msk.bf16.vlgmr.msra.gmra.mxu0 %vm496_vm0, %v3894_v31 }
  0xea   : > { %3206 = vmatprep.mubr.msk.bf16.mxu0 %vm496_vm0, %v3899_v19 }
  0xf1   : > { %3207 = vmatmul.mubr.msk.bf16.gmra.mxu0 %vm496_vm0, %v3905_v22 }
 0x14b   : > { %v1076_v23 = vpop.xlane.xlu1 %1075  ;;  %v1073_v24 = vpop.xlane.xlu0 %1072 }
 0x14c   : > { %v1084_v25 = vmax.f32 %v1076_v23, 1e-24  ;;  %v1083_v26 = vmax.f32 %v1073_v24, 1e-24 }
 0x14e   : > { %3469 = vrsqrt.f32 %v1084_v25 }
 0x14f   : > { %3471 = vrsqrt.f32 %v1083_v26  ;;  %v1067_v27 = vpop.xlane.xlu0 %1066 }
 0x150   : > { %v1081_v28 = vmax.f32 %v1067_v27, 1e-24  ;;  %v3998_v27 = vadd.s32 56, %v3949_v5 }
 0x152   : > { %3473 = vrsqrt.f32 %v1081_v28 }
 0x153   : > { %v1070_v29 = vpop.xlane.xlu0 %1069 }
 0x154   : > { %v1082_v32 = vmax.f32 %v1070_v29, 1e-24 }
 0x156   : > { %3475 = vrsqrt.f32 %v1082_v32 }
 0x157   : > { %v1064_v33 = vpop.xlane.xlu1 %1063  ;;  %v1061_v34 = vpop.xlane.xlu0 %1060 }
 0x158   : > { %v1080_v35 = vmax.f32 %v1064_v33, 1e-24  ;;  %v1079_v36 = vmax.f32 %v1061_v34, 1e-24  ;;  %v4014_v34 = vadd.s32 40, %v3949_v5 }
 0x15a   : > { %3477 = vrsqrt.f32 %v1080_v35 }
 0x15b   : > { %v3470_v38 = vpop.eup %3469  ;;  %3479 = vrsqrt.f32 %v1079_v36  ;;  %v1058_v39 = vpop.xlane.xlu1 %1057 }
 0x15c   : > { %v3472_v42 = vpop.eup %3471  ;;  %v1100_v43 = vmul.f32 %v3470_v38, %v3817_v37  ;;  %v1078_v45 = vmax.f32 %v1058_v39, 1e-24  ;;  %v1055_v12 = vpop.xlane.xlu0 %1054  ;;  %v3917_v37 = vunpack.c.l.bf16 %v1591_v54  ;;  %v1585_v54 = vld [vmem:[%s3770_s13 + $0x8] ss:$8 sps:$4 sm:$0xff]  }
 0x15d   : > { %v1099_v47 = vmul.f32 %v3472_v42, %v3824_v41  ;;  %v1077_v11 = vmax.f32 %v1055_v12, 1e-24  ;;  %v1588_v41 = vld [vmem:[%s3770_s13 + $0x20] ss:$8 sps:$4 sm:$0xff]  }
 0x15e   : > { %3481 = vrsqrt.f32 %v1078_v45  ;;  %v3943_v2 = vunpack.c.h.bf16 %v1588_v41 }
 0x15f   : > { %v3474_v13 = vpop.eup %3473  ;;  %v1104_v14 = vpack.c.bf16 %v1100_v43, %v1099_v47  ;;  %3483 = vrsqrt.f32 %v1077_v11 }
 0x160   : > { %v1097_v48 = vmul.f32 %v3474_v13, %v3822_v40  ;;  %v1606_v40 = vmul.f32 %v3917_v37, %v3917_v37  ;;  %v1605_v3 = vmul.f32 %v3943_v2, %v3943_v2  ;;  %v1587_v13 = vld [vmem:[%s3770_s13] ss:$24 sps:$4 sm:$0xff]  }
 0x161   : > { %1127 = vrot.lane.b32.xlu0 %v1104_v14, %s3685_s14  ;;  %v4047_v14 = vunpack.c.h.bf16 %v1587_v13 }
 0x163   : > { %v3476_v50 = vpop.eup %3475 }
 0x164   : > { %v1098_v52 = vmul.f32 %v3476_v50, %v3830_v44  ;;  %v3927_v44 = vunpack.c.l.bf16 %v1588_v41  ;;  %v1603_v50 = vmul.f32 %v4047_v14, %v4047_v14 }
 0x165   : > { %1109 = vrot.lane.b32.xlu0 %v3864_v61, %s3685_s14 }
 0x166   : > { %v1103_v55 = vpack.c.bf16 %v1098_v52, %v1097_v48  ;;  %v3429_v48 = vld [vmem:[%s3770_s13 + $0x34] ss:$8 sps:$4 sm:$0xff]   ;;  %v4052_v52 = vunpack.c.l.bf16 %v1587_v13 }
 0x167   : > { %v3478_v56 = vpop.eup %3477  ;;  %3210 = vmatprep.subr.bf16.mxu1 %v3429_v48 }
 0x168   : > { %v3480_v57 = vpop.eup %3479  ;;  %1125 = vrot.lane.b32.xlu1 %v1103_v55, %s3685_s14  ;;  %v1096_v58 = vmul.f32 %v3478_v56, %v3840_v49  ;;  %v1607_v49 = vmul.f32 %v3931_v60, %v3931_v60  ;;  %3211 = vmatpush3.bf16.msra.mxu1 %v3429_v48  ;;  %v3430_v55 = vld [vmem:[%s3770_s13 + $0x24] ss:$8 sps:$4 sm:$0xff]   ;;  %v1600_v41 = vmul.f32 %v4052_v52, %v4052_v52  ;;  %v4059_v56 = vunpack.c.l.bf16 %v1585_v54 }
 0x169   : > { %v1095_v59 = vmul.f32 %v3480_v57, %v3834_v46  ;;  %1113 = vrot.lane.b32.xlu0 %v3899_v19, %s3685_s14  ;;  %v1604_v46 = vmul.f32 %v3927_v44, %v3927_v44  ;;  %3212 = vmatprep.subr.bf16.mxu1 %v3430_v55  ;;  %v3431_v57 = vld [vmem:[%s3770_s13 + $0x14] ss:$8 sps:$4 sm:$0xff]  }
 0x16b   : > { %v3482_v16 = vpop.eup %3481  ;;  %v1102_v15 = vpack.c.bf16 %v1096_v58, %v1095_v59  ;;  %v4062_v58 = vunpack.c.h.bf16 %v1585_v54  ;;  %v1601_v59 = vmul.f32 %v4059_v56, %v4059_v56 }
 0x16c   : > { %1115 = vrot.lane.b32.xlu1 %v3905_v22, %s3685_s14  ;;  %v3484_v62 = vpop.eup %3483  ;;  %v1094_v0 = vmul.f32 %v3482_v16, %v3850_v53  ;;  %v3954_v53 = vand.u32 127, %v415_v4  ;;  %3213 = vmatpush3.bf16.msra.mxu1 %v3430_v55 }
 0x16d   : > { %1628 = vrot.lane.b32.xlu0 %v1606_v40, %s3686_s18  ;;  %v1093_v63 = vmul.f32 %v3484_v62, %v3845_v51  ;;  %v3952_v51 = vadd.s32 16, %v3949_v5  ;;  %3214 = vmatprep.subr.bf16.mxu1 %v3431_v57  ;;  %v3432_v40 = vld [vmem:[%s3770_s13 + $0x4] ss:$8 sps:$4 sm:$0xff]   ;;  %v1602_v16 = vmul.f32 %v4062_v58, %v4062_v58 }
 0x16e   : > { %vm436_vm3 = vcmp.eq.s32.totalorder %v3949_v5, %v3954_v53  ;;  %vm439_vm4 = vcmp.eq.s32.totalorder %v3959_v6, %v3954_v53  ;;  %vm437_vm5 = vcmp.eq.s32.totalorder %v3964_v8, %v3954_v53  ;;  %vm442_vm6 = vcmp.eq.s32.totalorder %v3983_v20, %v3954_v53 }
 0x16f   : > { %v1101_v1 = vpack.c.bf16 %v1094_v0, %v1093_v63  ;;  %vm438_vm1 = vcmp.eq.s32.totalorder %v3952_v51, %v3954_v53  ;;  %vm440_vm7 = vcmp.eq.s32.totalorder %v3986_v21, %v3954_v53  ;;  %vm443_vm8 = vcmp.eq.s32.totalorder %v3998_v27, %v3954_v53 }
 0x170   : > { %1123 = vrot.lane.b32.xlu1 %v1102_v15, %s3685_s14  ;;  %vm441_vm9 = vcmp.eq.s32.totalorder %v4014_v34, %v3954_v53  ;;  %3215 = vmatpush3.bf16.msra.mxu1 %v3431_v57 }
 0x171   : > { %1624 = vrot.lane.b32.xlu0 %v1604_v46, %s3686_s18  ;;  %3216 = vmatprep.subr.bf16.mxu1 %v3432_v40  ;;  %v1112_v46 = vpop.permute.xlu1 %1111 }
 0x174   : > { %1630 = vrot.lane.b32.xlu1 %v1607_v49, %s3686_s18  ;;  %3217 = vmatpush3.bf16.msra.mxu1 %v3432_v40 }
 0x178   : > { %1121 = vrot.lane.b32.xlu1 %v1101_v1, %s3685_s14 }
 0x17c   : > { %1626 = vrot.lane.b32.xlu1 %v1605_v3, %s3686_s18 }
 0x1a9   : > { %v3204_v7 = vpop.f32.mrf.mxu0 }
 0x1aa   : > { %v3969_v30 = vsel %vm438_vm1, -50000.0, %v3204_v7 }
 0x1ab   : > { %v607_v9 = vpop.f32.mrf.mxu0  ;;  %v653_v10 = vsel %vm646_vm2, %v3969_v30, -inf }
 0x1ac   : > { %v3978_v17 = vsel %vm436_vm3, -50000.0, %v607_v9  ;;  %654 = vmax.xlane.f32.xlu0 %v653_v10 }
 0x1ad   : > { %v3205_v18 = vpop.f32.mrf.mxu0  ;;  %v647_v25 = vsel %vm646_vm2, %v3978_v17, -inf }
 0x1ae   : > { %v3991_v23 = vsel %vm439_vm4, -50000.0, %v3205_v18 }
 0x1af   : > { %v610_v24 = vpop.f32.mrf.mxu0  ;;  %v656_v26 = vsel %vm646_vm2, %v3991_v23, -inf }
 0x1b0   : > { %v4003_v28 = vsel %vm437_vm5, -50000.0, %v610_v24  ;;  %648 = vmax.xlane.f32.xlu0 %v647_v25  ;;  %657 = vmax.xlane.f32.xlu1 %v656_v26 }
 0x1b1   : > { %v3208_v29 = vpop.f32.mrf.mxu0  ;;  %v650_v33 = vsel %vm646_vm2, %v4003_v28, -inf }
 0x1b2   : > { %v4019_v35 = vsel %vm442_vm6, -50000.0, %v3208_v29 }
 0x1b3   : > { %v623_v32 = vpop.f32.mrf.mxu0  ;;  %v665_v45 = vsel %vm646_vm2, %v4019_v35, -inf }
 0x1b4   : > { %v4024_v36 = vsel %vm440_vm7, -50000.0, %v623_v32  ;;  %651 = vmax.xlane.f32.xlu1 %v650_v33 }
 0x1b5   : > { %v3209_v38 = vpop.f32.mrf.mxu0  ;;  %v659_v39 = vsel %vm646_vm2, %v4024_v36, -inf }
 0x1b6   : > { %v4031_v42 = vsel %vm443_vm8, -50000.0, %v3209_v38  ;;  %660 = vmax.xlane.f32.xlu0 %v659_v39 }
 0x1b7   : > { %v626_v43 = vpop.f32.mrf.mxu0  ;;  %v668_v12 = vsel %vm646_vm2, %v4031_v42, -inf }
 0x1b8   : > { %666 = vmax.xlane.f32.xlu1 %v665_v45  ;;  %v4042_v47 = vsel %vm441_vm9, -50000.0, %v626_v43 }
 0x1b9   : > { %v662_v11 = vsel %vm646_vm2, %v4042_v47, -inf }
 0x1ba   : > { %669 = vmax.xlane.f32.xlu0 %v668_v12 }
 0x1be   : > { %663 = vmax.xlane.f32.xlu0 %v662_v11 }
 0x1c9   : > { %1622 = vrot.lane.b32.xlu1 %v1603_v50, %s3686_s18 }
 0x1cd   : > { %1616 = vrot.lane.b32.xlu1 %v1600_v41, %s3686_s18 }
 0x1d1   : > { %1618 = vrot.lane.b32.xlu1 %v1601_v59, %s3686_s18 }
 0x1d3   : > { %v1128_v15 = vpop.permute.xlu0 %1127 }
 0x1d4   : > { %3374 = vmatprep.subr.msk.bf16.mxu0 %vm496_vm0, %v1128_v15  ;;  %v1151_v62 = vsel %vm496_vm0, %v1128_v15, 0  ;;  %1620 = vrot.lane.b32.xlu0 %v1602_v16, %s3686_s18 }
 0x1d5   : > { %3239 = vmatpush3.bf16.xpose.msra.mxu0 %v1151_v62 }
 0x1d7   : > { %v1110_v49 = vpop.permute.xlu0 %1109 }
 0x1d8   : > { %3246 = vmatprep.mubr.msk.bf16.mxu0 %vm496_vm0, %v1110_v49 }
 0x1da   : > { %v1126_v63 = vpop.permute.xlu1 %1125 }
 0x1db   : > { %3375 = vmatprep.subr.msk.bf16.mxu0 %vm496_vm0, %v1126_v63  ;;  %v1148_v0 = vsel %vm496_vm0, %v1126_v63, 0  ;;  %v1114_v9 = vpop.permute.xlu0 %1113 }
 0x1dd   : > { %3241 = vmatpush3.bf16.xpose.msra.mxu0 %v1148_v0 }
 0x1de   : > { %v1116_v1 = vpop.permute.xlu1 %1115 }
 0x1df   : > { %v1629_v24 = vpop.permute.xlu0 %1628 }
 0x1e0   : > { %v1658_v25 = vsel %vm496_vm0, %v1629_v24, 0.0 }
 0x1e2   : > { %v1124_v3 = vpop.permute.xlu1 %1123 }
 0x1e3   : > { %3376 = vmatprep.subr.msk.bf16.mxu0 %vm496_vm0, %v1124_v3  ;;  %v1145_v4 = vsel %vm496_vm0, %v1124_v3, 0  ;;  %v1625_v26 = vpop.permute.xlu0 %1624 }
 0x1e4   : > { %v1652_v32 = vsel %vm496_vm0, %v1625_v26, 0.0 }
 0x1e5   : > { %3243 = vmatpush3.bf16.xpose.msra.mxu0 %v1145_v4 }
 0x1e6   : > { %v1631_v7 = vpop.permute.xlu1 %1630 }
 0x1e7   : > { %v1661_v29 = vsel %vm496_vm0, %v1631_v7, 0.0 }
 0x1ea   : > { %v1122_v10 = vpop.permute.xlu1 %1121 }
 0x1eb   : > { %3377 = vmatprep.subr.msk.bf16.mxu0 %vm496_vm0, %v1122_v10  ;;  %v1142_v18 = vsel %vm496_vm0, %v1122_v10, 0 }
 0x1ed   : > { %3245 = vmatpush3.bf16.xpose.msra.mxu0 %v1142_v18 }
 0x1ee   : > { %v1627_v33 = vpop.permute.xlu1 %1626 }
 0x1ef   : > { %v1655_v38 = vsel %vm496_vm0, %v1627_v33, 0.0 }
 0x1f3   : > { %1659 = vadd.xlane.f32.xlu0 %v1658_v25 }
 0x1f4   : > { %3247 = vmatmul.mubr.msk.bf16.vlgmr.msra.gmra.mxu0 %vm496_vm0, %v1112_v46 }
 0x1f5   : > { %1662 = vadd.xlane.f32.xlu1 %v1661_v29  ;;  %3250 = vmatprep.mubr.msk.bf16.mxu0 %vm496_vm0, %v1114_v9 }
 0x1f7   : > { %1653 = vadd.xlane.f32.xlu0 %v1652_v32 }
 0x1fb   : > { %1656 = vadd.xlane.f32.xlu0 %v1655_v38 }
 0x1fc   : > { %3251 = vmatmul.mubr.msk.bf16.gmra.mxu0 %vm496_vm0, %v1116_v1 }
 0x235   : > { %v655_v39 = vpop.xlane.xlu0 %654 }
 0x236   : > { %v673_v13 = vsub.f32 %v3969_v30, %v655_v39 }
 0x238   : > { %v683_v41 = vmul.f32 1.442695, %v673_v13 }
 0x239   : > { %v649_v43 = vpop.xlane.xlu0 %648  ;;  %v658_v45 = vpop.xlane.xlu1 %657 }
 0x23a   : > { %v671_v12 = vsub.f32 %v3978_v17, %v649_v43  ;;  %v674_v11 = vsub.f32 %v3991_v23, %v658_v45 }
 0x23c   : > { %v679_v48 = vmul.f32 1.442695, %v671_v12  ;;  %v685_v50 = vmul.f32 1.442695, %v674_v11 }
 0x23d   : > { %v652_v54 = vpop.xlane.xlu1 %651 }
 0x23e   : > { %v672_v55 = vsub.f32 %v4003_v28, %v652_v54  ;;  %3485 = vpow2.f32 %v679_v48 }
 0x23f   : > { %v661_v57 = vpop.xlane.xlu0 %660  ;;  %3487 = vpow2.f32 %v685_v50 }
 0x240   : > { %v681_v59 = vmul.f32 1.442695, %v672_v55  ;;  %v675_v16 = vsub.f32 %v4024_v36, %v661_v57 }
 0x241   : > { %v667_v40 = vpop.xlane.xlu1 %666 }
 0x242   : > { %3489 = vpow2.f32 %v681_v59  ;;  %v677_v30 = vsub.f32 %v4019_v35, %v667_v40  ;;  %v687_v62 = vmul.f32 1.442695, %v675_v16 }
 0x243   : > { %3491 = vpow2.f32 %v683_v41  ;;  %v670_v17 = vpop.xlane.xlu0 %669 }
 0x244   : > { %v678_v23 = vsub.f32 %v4031_v42, %v670_v17  ;;  %v691_v0 = vmul.f32 1.442695, %v677_v30  ;;  %3493 = vpow2.f32 %v687_v62  ;;  %v2177_v30 = vld [vmem:[%s3770_s13 + $0x20] ss:$16 sps:$4 sm:$0xff]  }
 0x245   : > { %v1623_v15 = vpop.permute.xlu1 %1622  ;;  %v4130_v62 = vunpack.c.h.bf16 %v2177_v30 }
 0x246   : > { %v1649_v46 = vsel %vm496_vm0, %v1623_v15, 0.0  ;;  %v693_v28 = vmul.f32 1.442695, %v678_v23 }
 0x247   : > { %v664_v49 = vpop.xlane.xlu0 %663  ;;  %1650 = vadd.xlane.f32.xlu1 %v1649_v46  ;;  %v4137_v46 = vunpack.c.l.bf16 %v2177_v30 }
 0x248   : > { %v676_v63 = vsub.f32 %v4042_v47, %v664_v49  ;;  %3495 = vpow2.f32 %v693_v28 }
 0x249   : > { %v1617_v1 = vpop.permute.xlu1 %1616 }
 0x24a   : > { %v689_v3 = vmul.f32 1.442695, %v676_v63  ;;  %v1640_v18 = vsel %vm496_vm0, %v1617_v1, 0.0 }
 0x24b   : > { %v1621_v36 = vpop.permute.xlu0 %1620  ;;  %v4098_v4 = vpop.eup %3485 }
 0x24c   : > { %3497 = vpow2.f32 %v689_v3  ;;  %v1646_v42 = vsel %vm496_vm0, %v1621_v36, 0.0  ;;  %v4100_v7 = vpop.eup %3487  ;;  %v695_v1 = vsel %vm646_vm2, %v4098_v4, 0.0 }
 0x24d   : > { %3499 = vpow2.f32 %v691_v0  ;;  %1647 = vadd.xlane.f32.xlu0 %v1646_v42  ;;  %v1619_v35 = vpop.permute.xlu1 %1618  ;;  %v704_v42 = vsel %vm646_vm2, %v4100_v7, 0.0 }
 0x24e   : > { %v1643_v9 = vsel %vm496_vm0, %v1619_v35, 0.0 }
 0x24f   : > { %v4103_v10 = vpop.eup %3489  ;;  %1644 = vadd.xlane.f32.xlu1 %v1643_v9 }
 0x250   : > { %v3492_v47 = vpop.eup %3491  ;;  %v735_v24 = vpack.c.bf16 %v4103_v10, %v4098_v4 }
 0x251   : > { %1641 = vadd.xlane.f32.xlu0 %v1640_v18  ;;  %v736_v25 = vpack.c.bf16 %v4100_v7, %v3492_v47  ;;  %v4111_v26 = vpop.eup %3493  ;;  %v701_v63 = vsel %vm646_vm2, %v3492_v47, 0.0 }
 0x252   : > { %3218 = vmatprep.mubr.msk.bf16.mxu1 %vm646_vm2, %v735_v24 }
 0x253   : > { %3219 = vmatmul.mubr.msk.bf16.vlgmr.msra.gmra.mxu1 %vm646_vm2, %v736_v25 }
 0x255   : > { %v4113_v29 = vpop.eup %3495 }
 0x259   : > { %v4115_v32 = vpop.eup %3497 }
 0x25a   : > { %v3500_v33 = vpop.eup %3499  ;;  %v737_v38 = vpack.c.bf16 %v4115_v32, %v4111_v26 }
 0x25b   : > { %v738_v39 = vpack.c.bf16 %v4113_v29, %v3500_v33  ;;  %v713_v18 = vsel %vm646_vm2, %v3500_v33, 0.0 }
 0x25c   : > { %3222 = vmatprep.mubr.msk.bf16.mxu1 %vm646_vm2, %v737_v38 }
 0x25d   : > { %3223 = vmatmul.mubr.msk.bf16.gmra.mxu1 %vm646_vm2, %v738_v39  ;;  %v707_v39 = vsel %vm646_vm2, %v4111_v26, 0.0 }
 0x27c   : > { %v1660_v43 = vpop.xlane.xlu0 %1659 }
 0x27d   : > { %v1670_v45 = vmax.f32 %v1660_v43, 1e-24 }
 0x27e   : > { %v1663_v12 = vpop.xlane.xlu1 %1662 }
 0x27f   : > { %v1671_v11 = vmax.f32 %v1663_v12, 1e-24  ;;  %3501 = vrsqrt.f32 %v1670_v45 }
 0x280   : > { %v1654_v13 = vpop.xlane.xlu0 %1653 }
 0x281   : > { %3503 = vrsqrt.f32 %v1671_v11  ;;  %v1668_v48 = vmax.f32 %v1654_v13, 1e-24 }
 0x283   : > { %3505 = vrsqrt.f32 %v1668_v48 }
 0x284   : > { %v1657_v50 = vpop.xlane.xlu0 %1656 }
 0x285   : > { %v1669_v54 = vmax.f32 %v1657_v50, 1e-24 }
 0x287   : > { %3507 = vrsqrt.f32 %v1669_v54 }
 0x28c   : > { %v3502_v55 = vpop.eup %3501 }
 0x28d   : > { %v1686_v41 = vmul.f32 %v3502_v55, %v3917_v37 }
 0x28e   : > { %v3504_v57 = vpop.eup %3503 }
 0x28f   : > { %v1687_v59 = vmul.f32 %v3504_v57, %v3931_v60  ;;  %v2193_v60 = vmul.f32 %v4130_v62, %v4130_v62 }
 0x290   : > { %v3506_v40 = vpop.eup %3505 }
 0x291   : > { %v1691_v16 = vpack.c.bf16 %v1687_v59, %v1686_v41  ;;  %v1684_v17 = vmul.f32 %v3506_v40, %v3927_v44  ;;  %v2173_v44 = vld [vmem:[%s3770_s13] ss:$16 sps:$4 sm:$0xff]  }
 0x293   : > { %1714 = vrot.lane.b32.xlu0 %v1691_v16, %s3686_s18 }
 0x294   : > { %v3508_v23 = vpop.eup %3507 }
 0x295   : > { %v1685_v15 = vmul.f32 %v3508_v23, %v3943_v2  ;;  %v4143_v2 = vunpack.c.h.bf16 %v2173_v44 }
 0x297   : > { %1696 = vrot.lane.b32.xlu0 %v3864_v61, %s3686_s18  ;;  %v1690_v37 = vpack.c.bf16 %v1685_v15, %v1684_v17  ;;  %v2191_v61 = vmul.f32 %v4137_v46, %v4137_v46  ;;  %v2189_v28 = vmul.f32 %v4143_v2, %v4143_v2 }
 0x299   : > { %1712 = vrot.lane.b32.xlu1 %v1690_v37, %s3686_s18 }
 0x29b   : > { %1700 = vrot.lane.b32.xlu0 %v3899_v19, %s3686_s18  ;;  %v4148_v19 = vunpack.c.l.bf16 %v2173_v44 }
 0x29d   : > { %v2187_v49 = vmul.f32 %v4148_v19, %v4148_v19 }
 0x29f   : > { %2215 = vrot.lane.b32.xlu0 %v2193_v60, %s3687_s20 }
 0x2a3   : > { %2211 = vrot.lane.b32.xlu0 %v2191_v61, %s3687_s20  ;;  %v2174_v61 = vld [vmem:[%s3770_s13 + $0x8] ss:$16 sps:$4 sm:$0xff]  }
 0x2a7   : > { %2207 = vrot.lane.b32.xlu0 %v2189_v28, %s3687_s20 }
 0x2ab   : > { %2203 = vrot.lane.b32.xlu0 %v2187_v49, %s3687_s20  ;;  %v4223_v49 = vunpack.c.h.bf16 %v2174_v61 }
 0x2b4   : > { %v4155_v0 = vpop.f32.mrf.mxu0 }
 0x2b6   : > { %v1187_v3 = vpop.f32.mrf.mxu0 }
 0x2b7   : > { %v4169_v7 = vsel %vm436_vm3, -50000.0, %v1187_v3 }
 0x2b8   : > { %v3249_v35 = vpop.f32.mrf.mxu0  ;;  %v1226_v12 = vsel %vm646_vm2, %v4169_v7, -inf }
 0x2b9   : > { %v4178_v11 = vsel %vm439_vm4, -50000.0, %v3249_v35  ;;  %v4236_v35 = vunpack.c.l.bf16 %v2174_v61 }
 0x2ba   : > { %v4162_v47 = vpop.f32.mrf.mxu0  ;;  %v1235_v13 = vsel %vm646_vm2, %v4178_v11, -inf }
 0x2bc   : > { %v4171_v33 = vpop.f32.mrf.mxu0 }
 0x2be   : > { %v1203_v26 = vpop.f32.mrf.mxu0 }
 0x2bf   : > { %v4185_v48 = vsel %vm440_vm7, -50000.0, %v1203_v26  ;;  %v716_v26 = vsel %vm646_vm2, %v4113_v29, 0.0 }
 0x2c0   : > { %v3253_v50 = vpop.f32.mrf.mxu0  ;;  %v1238_v55 = vsel %vm646_vm2, %v4185_v48, -inf }
 0x2c1   : > { %v4192_v57 = vsel %vm443_vm8, -50000.0, %v3253_v50  ;;  %v4257_v50 = vsel %vm438_vm1, -50000.0, %v4155_v0 }
 0x2c2   : > { %v1247_v17 = vsel %vm646_vm2, %v4192_v57, -inf  ;;  %v1206_v0 = vpop.f32.mrf.mxu0 }
 0x2ca   : > { %702 = vadd.xlane.f32.xlu0 %v701_v63  ;;  %v2190_v63 = vmul.f32 %v4223_v49, %v4223_v49 }
 0x2ce   : > { %696 = vadd.xlane.f32.xlu0 %v695_v1  ;;  %v3433_v1 = vld [vmem:[%s3770_s13 + $0x34] ss:$8 sps:$4 sm:$0xff]  }
 0x2d0   : > { %v1651_v36 = vpop.xlane.xlu1 %1650 }
 0x2d1   : > { %v1667_v9 = vmax.f32 %v1651_v36, 1e-24 }
 0x2d2   : > { %705 = vadd.xlane.f32.xlu0 %v704_v42  ;;  %v3434_v42 = vld [vmem:[%s3770_s13 + $0x24] ss:$8 sps:$4 sm:$0xff]  }
 0x2d3   : > { %3509 = vrsqrt.f32 %v1667_v9 }
 0x2d6   : > { %714 = vadd.xlane.f32.xlu0 %v713_v18  ;;  %v1648_v24 = vpop.xlane.xlu0 %1647  ;;  %v2188_v18 = vmul.f32 %v4236_v35, %v4236_v35 }
 0x2d7   : > { %v1666_v25 = vmax.f32 %v1648_v24, 1e-24 }
 0x2d8   : > { %v1645_v38 = vpop.xlane.xlu1 %1644 }
 0x2d9   : > { %3511 = vrsqrt.f32 %v1666_v25  ;;  %v1665_v4 = vmax.f32 %v1645_v38, 1e-24 }
 0x2da   : > { %708 = vadd.xlane.f32.xlu0 %v707_v39  ;;  %v1642_v43 = vpop.xlane.xlu0 %1641 }
 0x2db   : > { %3513 = vrsqrt.f32 %v1665_v4  ;;  %v1664_v45 = vmax.f32 %v1642_v43, 1e-24 }
 0x2dd   : > { %3515 = vrsqrt.f32 %v1664_v45 }
 0x2de   : > { %1227 = vmax.xlane.f32.xlu0 %v1226_v12  ;;  %v698_v12 = vsel %vm646_vm2, %v4103_v10, 0.0  ;;  %v4265_v10 = vsel %vm437_vm5, -50000.0, %v4162_v47  ;;  %v4280_v47 = vsel %vm441_vm9, -50000.0, %v1206_v0 }
 0x2df   : > { %v1229_v29 = vsel %vm646_vm2, %v4265_v10, -inf }
 0x2e0   : > { %v3510_v54 = vpop.eup %3509 }
 0x2e1   : > { %v1683_v40 = vmul.f32 %v3510_v54, %v4047_v14  ;;  %v1232_v54 = vsel %vm646_vm2, %v4257_v50, -inf }
 0x2e2   : > { %1236 = vmax.xlane.f32.xlu0 %v1235_v13  ;;  %v710_v13 = vsel %vm646_vm2, %v4115_v32, 0.0  ;;  %v4273_v32 = vsel %vm442_vm6, -50000.0, %v4171_v33 }
 0x2e6   : > { %v3512_v41 = vpop.eup %3511  ;;  %1239 = vmax.xlane.f32.xlu0 %v1238_v55  ;;  %v1244_v55 = vsel %vm646_vm2, %v4273_v32, -inf }
 0x2e7   : > { %v1682_v59 = vmul.f32 %v3512_v41, %v4062_v58  ;;  %v2178_v58 = vld [vmem:[%s3770_s13 + $0x28] ss:$16 sps:$4 sm:$0xff]   ;;  %v1241_v41 = vsel %vm646_vm2, %v4280_v47, -inf }
 0x2e8   : > { %v3514_v16 = vpop.eup %3513  ;;  %v4205_v14 = vunpack.c.h.bf16 %v2178_v58  ;;  %v4214_v44 = vunpack.c.l.bf16 %v2178_v58 }
 0x2e9   : > { %v1689_v23 = vpack.c.bf16 %v1683_v40, %v1682_v59  ;;  %v1681_v30 = vmul.f32 %v3514_v16, %v4059_v56  ;;  %v3437_v56 = vld [vmem:[%s4752_s2 + $0x8] sm:$0xff]  }
 0x2ea   : > { %v3516_v15 = vpop.eup %3515  ;;  %1248 = vmax.xlane.f32.xlu0 %v1247_v17  ;;  %3226 = vmatprep.subr.bf16.mxu1 %v3437_v56  ;;  %v2192_v28 = vmul.f32 %v4214_v44, %v4214_v44  ;;  %v3436_v59 = vld [vmem:[%s3770_s13 + $0x4] ss:$8 sps:$4 sm:$0xff]  }
 0x2eb   : > { %1710 = vrot.lane.b32.xlu1 %v1689_v23, %s3686_s18  ;;  %v1680_v37 = vmul.f32 %v3516_v15, %v4052_v52  ;;  %3227 = vmatpush3.bf16.msra.mxu1 %v3437_v56  ;;  %v2194_v52 = vmul.f32 %v4205_v14, %v4205_v14 }
 0x2ed   : > { %v1688_v60 = vpack.c.bf16 %v1681_v30, %v1680_v37 }
 0x2ef   : > { %1708 = vrot.lane.b32.xlu1 %v1688_v60, %s3686_s18 }
 0x2f3   : > { %1698 = vrot.lane.b32.xlu1 %v3894_v31, %s3686_s18  ;;  %v3438_v31 = vld [vmem:[%s4752_s2] sm:$0xff]  }
 0x2f4   : > { %3228 = vmatprep.subr.bf16.mxu1 %v3438_v31 }
 0x2f5   : > { %3229 = vmatpush3.bf16.msra.mxu1 %v3438_v31 }
 0x2f7   : > { %1702 = vrot.lane.b32.xlu1 %v3905_v22, %s3686_s18  ;;  %v3435_v22 = vld [vmem:[%s3770_s13 + $0x14] ss:$8 sps:$4 sm:$0xff]  }
 0x2fb   : > { %2217 = vrot.lane.b32.xlu1 %v2194_v52, %s3687_s20 }
 0x2ff   : > { %2213 = vrot.lane.b32.xlu1 %v2192_v28, %s3687_s20 }
 0x300   : > { %1340 = vrot.lane.b32.xlu0 %v3435_v22, %s3685_s14 }
 0x303   : > { %2209 = vrot.lane.b32.xlu1 %v2190_v63, %s3687_s20 }
 0x305   : > { %v1715_v3 = vpop.permute.xlu0 %1714 }
 0x306   : > { %3378 = vmatprep.subr.msk.bf16.mxu0 %vm496_vm0, %v1715_v3  ;;  %v1738_v36 = vsel %vm496_vm0, %v1715_v3, 0 }
 0x307   : > { %1344 = vrot.lane.b32.xlu1 %v3433_v1, %s3685_s14  ;;  %3283 = vmatpush3.bf16.xpose.msra.mxu0 %v1738_v36 }
 0x309   : > { %v1697_v9 = vpop.permute.xlu0 %1696 }
 0x30a   : > { %3290 = vmatprep.mubr.msk.bf16.mxu0 %vm496_vm0, %v1697_v9 }
 0x30b   : > { %1342 = vrot.lane.b32.xlu1 %v3434_v42, %s3685_s14  ;;  %v1713_v24 = vpop.permute.xlu1 %1712 }
 0x30c   : > { %3379 = vmatprep.subr.msk.bf16.mxu0 %vm496_vm0, %v1713_v24  ;;  %v1735_v25 = vsel %vm496_vm0, %v1713_v24, 0 }
 0x30d   : > { %v1701_v38 = vpop.permute.xlu0 %1700 }
 0x30f   : > { %2205 = vrot.lane.b32.xlu1 %v2188_v18, %s3687_s20  ;;  %3285 = vmatpush3.bf16.xpose.msra.mxu0 %v1735_v25 }
 0x311   : > { %v2216_v4 = vpop.permute.xlu0 %2215 }
 0x312   : > { %v2245_v39 = vsel %vm496_vm0, %v2216_v4, 0.0 }
 0x315   : > { %v2212_v43 = vpop.permute.xlu0 %2211 }
 0x316   : > { %v2239_v45 = vsel %vm496_vm0, %v2212_v43, 0.0 }
 0x319   : > { %v2208_v37 = vpop.permute.xlu0 %2207 }
 0x31a   : > { %v2233_v56 = vsel %vm496_vm0, %v2208_v37, 0.0 }
 0x31d   : > { %v2204_v31 = vpop.permute.xlu0 %2203 }
 0x31e   : > { %v2227_v61 = vsel %vm496_vm0, %v2204_v31, 0.0 }
 0x31f   : > { %2246 = vadd.xlane.f32.xlu0 %v2245_v39 }
 0x323   : > { %2240 = vadd.xlane.f32.xlu0 %v2239_v45 }
 0x333   : > { %699 = vadd.xlane.f32.xlu1 %v698_v12 }
 0x337   : > { %717 = vadd.xlane.f32.xlu1 %v716_v26 }
 0x33b   : > { %711 = vadd.xlane.f32.xlu1 %v710_v13 }
 0x33f   : > { %1233 = vmax.xlane.f32.xlu1 %v1232_v54 }
 0x343   : > { %1230 = vmax.xlane.f32.xlu1 %v1229_v29 }
 0x347   : > { %1245 = vmax.xlane.f32.xlu1 %v1244_v55 }
 0x34b   : > { %1242 = vmax.xlane.f32.xlu1 %v1241_v41 }
 0x353   : > { %v703_v42 = vpop.xlane.xlu0 %702 }
 0x357   : > { %v697_v9 = vpop.xlane.xlu0 %696 }
 0x35b   : > { %v706_v18 = vpop.xlane.xlu0 %705 }
 0x35c   : > { %1338 = vrot.lane.b32.xlu1 %v3436_v59, %s3685_s14  ;;  %3517 = vrcp.f32 %v706_v18  ;;  %s2891_s14 = sshll.u32 %s4763_s9, 2 }
 0x35d   : > { %v1711_v33 = vpop.permute.xlu1 %1710  ;;  %3519 = vrcp.f32 %v697_v9  ;;  %s372_s30 = scalar_lea.vmem %s4755_s5, %s2891_s14 }
 0x35e   : > { %v1732_v40 = vsel %vm496_vm0, %v1711_v33, 0  ;;  %3380 = vmatprep.subr.msk.bf16.mxu0 %vm496_vm0, %v1711_v33  ;;  %3521 = vrcp.f32 %v703_v42 }
 0x35f   : > { %3287 = vmatpush3.bf16.xpose.msra.mxu0 %v1732_v40  ;;  %v715_v24 = vpop.xlane.xlu0 %714 }
 0x361   : > { %v1709_v16 = vpop.permute.xlu1 %1708 }
 0x362   : > { %3381 = vmatprep.subr.msk.bf16.mxu0 %vm496_vm0, %v1709_v16  ;;  %v1729_v23 = vsel %vm496_vm0, %v1709_v16, 0 }
 0x363   : > { %v709_v25 = vpop.xlane.xlu0 %708 }
 0x365   : > { %v1699_v17 = vpop.permute.xlu1 %1698 }
 0x367   : > { %3289 = vmatpush3.bf16.xpose.msra.mxu0 %v1729_v23  ;;  %v1228_v43 = vpop.xlane.xlu0 %1227 }
 0x368   : > { %v1250_v55 = vsub.f32 %v4169_v7, %v1228_v43 }
 0x369   : > { %v1703_v30 = vpop.permute.xlu1 %1702  ;;  %v3518_v0 = vpop.eup %3517 }
 0x36a   : > { %v3520_v41 = vpop.eup %3519  ;;  %v1258_v37 = vmul.f32 1.442695, %v1250_v55 }
 0x36b   : > { %v1237_v26 = vpop.xlane.xlu0 %1236  ;;  %v3522_v33 = vpop.eup %3521 }
 0x36d   : > { %v2218_v15 = vpop.permute.xlu1 %2217 }
 0x36e   : > { %3291 = vmatmul.mubr.msk.bf16.vlgmr.msra.gmra.mxu0 %vm496_vm0, %v1699_v17  ;;  %v2248_v63 = vsel %vm496_vm0, %v2218_v15, 0.0  ;;  %v1253_v15 = vsub.f32 %v4178_v11, %v1237_v26 }
 0x36f   : > { %3294 = vmatprep.mubr.msk.bf16.mxu0 %vm496_vm0, %v1701_v38  ;;  %v3220_v38 = vpop.f32.mrf.mxu1  ;;  %v1240_v40 = vpop.xlane.xlu0 %1239 }
 0x371   : > { %v2214_v60 = vpop.permute.xlu1 %2213  ;;  %v809_v4 = vpop.f32.mrf.mxu1 }
 0x372   : > { %v2242_v58 = vsel %vm496_vm0, %v2214_v60, 0.0  ;;  %v840_v60 = vmul.f32 %v3520_v41, %v809_v4 }
 0x373   : > { %2243 = vadd.xlane.f32.xlu0 %v2242_v58  ;;  %v3221_v45 = vpop.f32.mrf.mxu1  ;;  %v1249_v42 = vpop.xlane.xlu0 %1248 }
 0x375   : > { %v2210_v52 = vpop.permute.xlu1 %2209  ;;  %v812_v13 = vpop.f32.mrf.mxu1 }
 0x376   : > { %3295 = vmatmul.mubr.msk.bf16.gmra.mxu0 %vm496_vm0, %v1703_v30  ;;  %v2236_v1 = vsel %vm496_vm0, %v2210_v52, 0.0  ;;  %v843_v30 = vmul.f32 %v3518_v0, %v3221_v45 }
 0x377   : > { %2234 = vadd.xlane.f32.xlu0 %v2233_v56  ;;  %v3224_v29 = vpop.f32.mrf.mxu1  ;;  %v842_v56 = vmul.f32 %v3522_v33, %v3220_v38  ;;  %v1341_v43 = vpop.permute.xlu0 %1340 }
 0x379   : > { %v4296_v28 = vpop.permute.xlu1 %1344  ;;  %v825_v23 = vpop.f32.mrf.mxu1 }
 0x37a   : > { %3254 = vmatprep.subr.bf16.mxu1 %v4296_v28 }
 0x37b   : > { %2228 = vadd.xlane.f32.xlu0 %v2227_v61 }
 0x37d   : > { %v4299_v22 = vpop.permute.xlu1 %1342 }
 0x380   : > { %2249 = vadd.xlane.f32.xlu1 %v2248_v63  ;;  %v3225_v63 = vpop.f32.mrf.mxu1 }
 0x381   : > { %v2206_v3 = vpop.permute.xlu1 %2205 }
 0x382   : > { %v2230_v36 = vsel %vm496_vm0, %v2206_v3, 0.0  ;;  %v1264_v3 = vmul.f32 1.442695, %v1253_v15  ;;  %v828_v38 = vpop.f32.mrf.mxu1 }
 0x384   : > { %2237 = vadd.xlane.f32.xlu1 %v2236_v1  ;;  %v857_v1 = vpack.c.bf16 %v843_v30, %v842_v56 }
 0x388   : > { %2231 = vadd.xlane.f32.xlu1 %v2230_v36 }
 0x3bc   : > { %v700_v39 = vpop.xlane.xlu1 %699 }
 0x3bd   : > { %3523 = vrcp.f32 %v700_v39 }
 0x3c0   : > { %v718_v12 = vpop.xlane.xlu1 %717 }
 0x3c1   : > { %3525 = vrcp.f32 %v718_v12 }
 0x3c2   : > { %3527 = vrcp.f32 %v709_v25 }
 0x3c3   : > { %3529 = vrcp.f32 %v715_v24 }
 0x3c4   : > { %v712_v54 = vpop.xlane.xlu1 %711 }
 0x3c5   : > { %3531 = vrcp.f32 %v712_v54 }
 0x3c6   : > { %3533 = vpow2.f32 %v1258_v37 }
 0x3c8   : > { %v1234_v59 = vpop.xlane.xlu1 %1233 }
 0x3c9   : > { %v1252_v16 = vsub.f32 %v4257_v50, %v1234_v59  ;;  %v1254_v50 = vsub.f32 %v4185_v48, %v1240_v40  ;;  %v1257_v48 = vsub.f32 %v4192_v57, %v1249_v42 }
 0x3ca   : > { %v3524_v17 = vpop.eup %3523 }
 0x3cb   : > { %v841_v58 = vmul.f32 %v3524_v17, %v812_v13  ;;  %v1262_v52 = vmul.f32 1.442695, %v1252_v16  ;;  %v1266_v39 = vmul.f32 1.442695, %v1254_v50 }
 0x3cc   : > { %v1231_v31 = vpop.xlane.xlu1 %1230 }
 0x3cd   : > { %v1251_v61 = vsub.f32 %v4265_v10, %v1231_v31  ;;  %v856_v7 = vpack.c.bf16 %v841_v58, %v840_v60  ;;  %3535 = vpow2.f32 %v1262_v52  ;;  %v2247_v60 = vpop.xlane.xlu0 %2246 }
 0x3ce   : > { %v3526_v36 = vpop.eup %3525 }
 0x3cf   : > { %v1260_v9 = vmul.f32 1.442695, %v1251_v61  ;;  %3230 = vmatprep.mubr.msk.bf16.mxu1 %vm496_vm0, %v856_v7  ;;  %v3528_v11 = vpop.eup %3527  ;;  %v847_v4 = vmul.f32 %v3526_v36, %v3225_v63  ;;  %v2257_v7 = vmax.f32 %v2247_v60, 1e-24 }
 0x3d0   : > { %v1246_v18 = vpop.xlane.xlu1 %1245  ;;  %3231 = vmatmul.mubr.msk.bf16.vlgmr.msra.gmra.mxu1 %vm496_vm0, %v857_v1  ;;  %v3530_v24 = vpop.eup %3529  ;;  %v844_v45 = vmul.f32 %v3528_v11, %v825_v23 }
 0x3d1   : > { %3537 = vpow2.f32 %v1260_v9  ;;  %v1256_v10 = vsub.f32 %v4273_v32, %v1246_v18  ;;  %3255 = vmatpush3.bf16.msra.mxu1 %v4296_v28  ;;  %v846_v54 = vmul.f32 %v3530_v24, %v3224_v29  ;;  %v1272_v28 = vmul.f32 1.442695, %v1257_v48  ;;  %v2241_v58 = vpop.xlane.xlu0 %2240 }
 0x3d2   : > { %v3532_v25 = vpop.eup %3531  ;;  %3539 = vpow2.f32 %v1264_v3  ;;  %3256 = vmatprep.subr.bf16.mxu1 %v4299_v22  ;;  %v2255_v56 = vmax.f32 %v2241_v58, 1e-24 }
 0x3d3   : > { %v845_v12 = vmul.f32 %v3532_v25, %v828_v38  ;;  %v1270_v26 = vmul.f32 1.442695, %v1256_v10  ;;  %v859_v55 = vpack.c.bf16 %v847_v4, %v846_v54  ;;  %3541 = vpow2.f32 %v1266_v39  ;;  %v4319_v29 = vpop.eup %3533  ;;  %v3053_v4 = vld [vmem:[%s3861_s17] sm:$0xff]  }
 0x3d4   : > { %v1243_v13 = vpop.xlane.xlu1 %1242  ;;  %v3055_v39 = vunpack.c.h.bf16 %v3053_v4 }
 0x3d5   : > { %v1255_v0 = vsub.f32 %v4280_v47, %v1243_v13  ;;  %3257 = vmatpush3.bf16.msra.mxu1 %v4299_v22  ;;  %v858_v32 = vpack.c.bf16 %v845_v12, %v844_v45  ;;  %3543 = vpow2.f32 %v1270_v26 }
 0x3d6   : > { %3258 = vmatprep.subr.bf16.mxu1 %v1341_v43 }
 0x3d7   : > { %v1268_v57 = vmul.f32 1.442695, %v1255_v0  ;;  %3234 = vmatprep.mubr.msk.bf16.mxu1 %vm496_vm0, %v858_v32  ;;  %v2160_v32 = vmul.f32 0.17677669, %v3055_v39 }
 0x3d8   : > { %v1339_v41 = vpop.permute.xlu1 %1338  ;;  %3235 = vmatmul.mubr.msk.bf16.gmra.mxu1 %vm496_vm0, %v859_v55 }
 0x3d9   : > { %3545 = vpow2.f32 %v1268_v57  ;;  %3259 = vmatpush3.bf16.msra.mxu1 %v1341_v43  ;;  %v3101_v43 = vld [vmem:[%s3861_s17 + $0x10] sm:$0xff]  }
 0x3da   : > { %3547 = vpow2.f32 %v1272_v28  ;;  %3260 = vmatprep.subr.bf16.mxu1 %v1339_v41  ;;  %v4321_v47 = vpop.eup %3535  ;;  %v3062_v26 = vunpack.c.l.bf16 %v3101_v43  ;;  %v3100_v28 = vld [vmem:[%s3861_s17 + $0x8] sm:$0xff]  }
 0x3db   : > { %3549 = vrsqrt.f32 %v2255_v56 }
 0x3dd   : > { %3261 = vmatpush3.bf16.msra.mxu1 %v1339_v41 }
 0x3de   : > { %v4323_v22 = vpop.eup %3537 }
 0x3df   : > { %v4325_v59 = vpop.eup %3539  ;;  %v1314_v33 = vpack.c.bf16 %v4323_v22, %v4319_v29 }
 0x3e0   : > { %v1315_v40 = vpack.c.bf16 %v4325_v59, %v4321_v47  ;;  %v4333_v16 = vpop.eup %3541 }
 0x3e1   : > { %3262 = vmatprep.mubr.msk.bf16.mxu1 %vm646_vm2, %v1314_v33  ;;  %v2163_v33 = vmul.f32 0.17677669, %v3062_v26 }
 0x3e2   : > { %3263 = vmatmul.mubr.msk.bf16.vlgmr.msra.gmra.mxu1 %vm646_vm2, %v1315_v40  ;;  %v4335_v17 = vpop.eup %3543 }
 0x3e6   : > { %v4337_v23 = vpop.eup %3545 }
 0x3e7   : > { %v4339_v30 = vpop.eup %3547  ;;  %v1316_v15 = vpack.c.bf16 %v4337_v23, %v4333_v16 }
 0x3e8   : > { %v1317_v37 = vpack.c.bf16 %v4339_v30, %v4335_v17  ;;  %v3550_v63 = vpop.eup %3549 }
 0x3e9   : > { %3266 = vmatprep.mubr.msk.bf16.mxu1 %vm646_vm2, %v1316_v15  ;;  %v2271_v42 = vmul.f32 %v3550_v63, %v4137_v46  ;;  %v3054_v46 = vunpack.c.l.bf16 %v3053_v4  ;;  %v3058_v15 = vunpack.c.l.bf16 %v3100_v28 }
 0x3ea   : > { %3267 = vmatmul.mubr.msk.bf16.gmra.mxu1 %vm646_vm2, %v1317_v37  ;;  %v3059_v37 = vunpack.c.h.bf16 %v3100_v28 }
 0x3eb   : > { %v2159_v0 = vmul.f32 0.17677669, %v3054_v46 }
 0x3ec   : > { %v2162_v63 = vmul.f32 0.17677669, %v3059_v37  ;;  %v1286_v37 = vsel %vm646_vm2, %v4333_v16, 0.0 }
 0x3ed   : > { %v2167_v60 = vpack.c.bf16 %v2160_v32, %v2159_v0  ;;  %v1280_v0 = vsel %vm646_vm2, %v4321_v47, 0.0 }
 0x3fc   : > { %v2244_v52 = vpop.xlane.xlu0 %2243 }
 0x3fd   : > { %v2256_v31 = vmax.f32 %v2244_v52, 1e-24 }
 0x3ff   : > { %3551 = vrsqrt.f32 %v2256_v31 }
 0x400   : > { %v2235_v61 = vpop.xlane.xlu0 %2234  ;;  %3553 = vrsqrt.f32 %v2257_v7  ;;  %v2161_v7 = vmul.f32 0.17677669, %v3058_v15  ;;  %v1277_v15 = vsel %vm646_vm2, %v4323_v22, 0.0  ;;  %v3444_v22 = vld [vmem:[%s4752_s2 + $0x10] sm:$0xff]  }
 0x401   : > { %v2253_v3 = vmax.f32 %v2235_v61, 1e-24 }
 0x404   : > { %v2229_v50 = vpop.xlane.xlu0 %2228 }
 0x405   : > { %v2251_v24 = vmax.f32 %v2229_v50, 1e-24 }
 0x409   : > { %v2250_v1 = vpop.xlane.xlu1 %2249 }
 0x40a   : > { %v2258_v36 = vmax.f32 %v2250_v1, 1e-24 }
 0x40c   : > { %v3552_v9 = vpop.eup %3551  ;;  %3555 = vrsqrt.f32 %v2258_v36 }
 0x40d   : > { %v2238_v11 = vpop.xlane.xlu1 %2237  ;;  %v2272_v18 = vmul.f32 %v3552_v9, %v4214_v44  ;;  %3557 = vrsqrt.f32 %v2253_v3  ;;  %v3554_v45 = vpop.eup %3553  ;;  %v3063_v44 = vunpack.c.h.bf16 %v3101_v43 }
 0x40e   : > { %v2254_v10 = vmax.f32 %v2238_v11, 1e-24  ;;  %v2273_v13 = vmul.f32 %v3554_v45, %v4130_v62 }
 0x40f   : > { %v2277_v25 = vpack.c.bf16 %v2272_v18, %v2271_v42  ;;  %v2164_v40 = vmul.f32 0.17677669, %v3063_v44 }
 0x410   : > { %3559 = vrsqrt.f32 %v2254_v10 }
 0x411   : > { %v2232_v38 = vpop.xlane.xlu1 %2231  ;;  %2299 = vrot.lane.b32.xlu1 %v2277_v25, %s3687_s20  ;;  %3561 = vrsqrt.f32 %v2251_v24  ;;  %v2169_v61 = vpack.c.bf16 %v2164_v40, %v2163_v33  ;;  %v1283_v33 = vsel %vm646_vm2, %v4325_v59, 0.0  ;;  %v3440_v59 = vld [vmem:[%s3770_s13 + $0x14] ss:$8 sps:$4 sm:$0xff]  }
 0x412   : > { %v2252_v48 = vmax.f32 %v2232_v38, 1e-24 }
 0x414   : > { %3563 = vrsqrt.f32 %v2252_v48 }
 0x419   : > { %v3556_v12 = vpop.eup %3555 }
 0x41a   : > { %v2274_v54 = vmul.f32 %v3556_v12, %v4205_v14  ;;  %v3558_v55 = vpop.eup %3557  ;;  %v3102_v14 = vld [vmem:[%s3861_s17 + $0x18] sm:$0xff]   ;;  %s4607_s17 = scalar_lea.vmem %s4754_s4, %s2891_s14 }
 0x41b   : > { %v2269_v58 = vmul.f32 %v3558_v55, %v4143_v2  ;;  %v3066_v36 = vunpack.c.l.bf16 %v3102_v14  ;;  %v3067_v50 = vunpack.c.h.bf16 %v3102_v14 }
 0x41c   : > { %v2278_v57 = vpack.c.bf16 %v2274_v54, %v2273_v13 }
 0x41d   : > { %v3560_v41 = vpop.eup %3559  ;;  %v2165_v42 = vmul.f32 0.17677669, %v3066_v36  ;;  %v2166_v9 = vmul.f32 0.17677669, %v3067_v50  ;;  %v3442_v36 = vld [vmem:[%s3770_s13 + $0x4] ss:$8 sps:$4 sm:$0xff]  }
 0x41e   : > { %2301 = vrot.lane.b32.xlu0 %v2278_v57, %s3687_s20  ;;  %v2270_v62 = vmul.f32 %v3560_v41, %v4223_v49  ;;  %v3562_v56 = vpop.eup %3561  ;;  %v2168_v49 = vpack.c.bf16 %v2162_v63, %v2161_v7  ;;  %v1274_v57 = vsel %vm646_vm2, %v4319_v29, 0.0  ;;  %v1292_v29 = vsel %vm646_vm2, %v4335_v17, 0.0  ;;  %v3443_v17 = vld [vmem:[%s4752_s2 + $0x18] sm:$0xff]  }
 0x41f   : > { %v2267_v1 = vmul.f32 %v3562_v56, %v4148_v19  ;;  %v2170_v11 = vpack.c.bf16 %v2166_v9, %v2165_v42  ;;  %3270 = vmatprep.subr.bf16.mxu1 %v3443_v17  ;;  %v1289_v7 = vsel %vm646_vm2, %v4337_v23, 0.0 }
 0x420   : > { %v2276_v52 = vpack.c.bf16 %v2270_v62, %v2269_v58  ;;  %v3441_v58 = vld [vmem:[%s3770_s13 + $0x34] ss:$8 sps:$4 sm:$0xff]   ;;  %3271 = vmatpush3.bf16.msra.mxu1 %v3443_v17 }
 0x421   : > { %v3564_v31 = vpop.eup %3563  ;;  %3272 = vmatprep.subr.bf16.mxu1 %v3444_v22 }
 0x422   : > { %2283 = vrot.lane.b32.xlu0 %v2167_v60, %s3687_s20  ;;  %2297 = vrot.lane.b32.xlu1 %v2276_v52, %s3687_s20  ;;  %v2268_v3 = vmul.f32 %v3564_v31, %v4236_v35  ;;  %v3439_v60 = vld [vmem:[%s3770_s13 + $0x24] ss:$8 sps:$4 sm:$0xff]  }
 0x424   : > { %v2275_v2 = vpack.c.bf16 %v2268_v3, %v2267_v1  ;;  %3273 = vmatpush3.bf16.msra.mxu1 %v3444_v22 }
 0x426   : > { %2287 = vrot.lane.b32.xlu0 %v2169_v61, %s3687_s20  ;;  %2295 = vrot.lane.b32.xlu1 %v2275_v2, %s3687_s20  ;;  %v1295_v61 = vsel %vm646_vm2, %v4339_v30, 0.0 }
 0x42a   : > { %2285 = vrot.lane.b32.xlu1 %v2168_v49, %s3687_s20 }
 0x42e   : > { %2289 = vrot.lane.b32.xlu1 %v2170_v11, %s3687_s20  ;;  %v3292_v18 = vpop.f32.mrf.mxu0 }
 0x42f   : > { %v4370_v35 = vsel %vm438_vm1, -50000.0, %v3292_v18 }
 0x430   : > { %v1774_v24 = vpop.f32.mrf.mxu0  ;;  %v1819_v25 = vsel %vm646_vm2, %v4370_v35, -inf }
 0x431   : > { %v4377_v38 = vsel %vm436_vm3, -50000.0, %v1774_v24 }
 0x432   : > { %v3293_v19 = vpop.f32.mrf.mxu0  ;;  %v1813_v4 = vsel %vm646_vm2, %v4377_v38, -inf }
 0x433   : > { %v4396_v12 = vsel %vm439_vm4, -50000.0, %v3293_v19 }
 0x434   : > { %v1777_v10 = vpop.f32.mrf.mxu0  ;;  %v1822_v44 = vsel %vm646_vm2, %v4396_v12, -inf }
 0x435   : > { %v4405_v13 = vsel %vm437_vm5, -50000.0, %v1777_v10 }
 0x436   : > { %v3296_v48 = vpop.f32.mrf.mxu0  ;;  %v1816_v32 = vsel %vm646_vm2, %v4405_v13, -inf }
 0x437   : > { %v4384_v46 = vsel %vm442_vm6, -50000.0, %v3296_v48 }
 0x438   : > { %v1790_v39 = vpop.f32.mrf.mxu0  ;;  %v1831_v43 = vsel %vm646_vm2, %v4384_v46, -inf }
 0x439   : > { %v4391_v45 = vsel %vm440_vm7, -50000.0, %v1790_v39 }
 0x43a   : > { %v1825_v26 = vsel %vm646_vm2, %v4391_v45, -inf  ;;  %v3297_v54 = vpop.f32.mrf.mxu0 }
 0x43b   : > { %v4414_v28 = vsel %vm443_vm8, -50000.0, %v3297_v54 }
 0x43c   : > { %v1793_v55 = vpop.f32.mrf.mxu0  ;;  %v1834_v41 = vsel %vm646_vm2, %v4414_v28, -inf }
 0x43d   : > { %v4423_v47 = vsel %vm441_vm9, -50000.0, %v1793_v55 }
 0x43e   : > { %v1828_v40 = vsel %vm646_vm2, %v4423_v47, -inf }
 0x445   : > { %1820 = vmax.xlane.f32.xlu0 %v1819_v25 }
 0x449   : > { %1814 = vmax.xlane.f32.xlu0 %v1813_v4 }
 0x44d   : > { %1832 = vmax.xlane.f32.xlu0 %v1831_v43 }
 0x451   : > { %1826 = vmax.xlane.f32.xlu0 %v1825_v26 }
 0x452   : > { %1823 = vmax.xlane.f32.xlu1 %v1822_v44 }
 0x455   : > { %1281 = vadd.xlane.f32.xlu0 %v1280_v0 }
 0x456   : > { %1817 = vmax.xlane.f32.xlu1 %v1816_v32 }
 0x459   : > { %1275 = vadd.xlane.f32.xlu0 %v1274_v57 }
 0x45a   : > { %1835 = vmax.xlane.f32.xlu1 %v1834_v41 }
 0x45d   : > { %1284 = vadd.xlane.f32.xlu0 %v1283_v33 }
 0x45e   : > { %1829 = vmax.xlane.f32.xlu1 %v1828_v40 }
 0x461   : > { %1293 = vadd.xlane.f32.xlu0 %v1292_v29 }
 0x462   : > { %1278 = vadd.xlane.f32.xlu1 %v1277_v15 }
 0x465   : > { %1287 = vadd.xlane.f32.xlu0 %v1286_v37 }
 0x473   : > { %1929 = vrot.lane.b32.xlu1 %v3439_v60, %s3686_s18 }
 0x477   : > { %1927 = vrot.lane.b32.xlu1 %v3440_v59, %s3686_s18 }
 0x47b   : > { %1931 = vrot.lane.b32.xlu0 %v3441_v58, %s3686_s18 }
 0x483   : > { %v2300_v56 = vpop.permute.xlu1 %2299 }
 0x484   : > { %v2322_v52 = vsel %vm496_vm0, %v2300_v56, 0 }
 0x490   : > { %v2302_v16 = vpop.permute.xlu0 %2301  ;;  %v4465_v49 = vpop.f32.mrf.mxu1 }
 0x491   : > { %v2325_v62 = vsel %vm496_vm0, %v2302_v16, 0  ;;  %3382 = vmatprep.subr.msk.bf16.mxu0 %vm496_vm0, %v2302_v16 }
 0x492   : > { %3327 = vmatpush3.bf16.xpose.msra.mxu0 %v2325_v62  ;;  %v4467_v9 = vpop.f32.mrf.mxu1 }
 0x493   : > { %3383 = vmatprep.subr.msk.bf16.mxu0 %vm496_vm0, %v2300_v56 }
 0x494   : > { %v2284_v14 = vpop.permute.xlu0 %2283  ;;  %v2298_v31 = vpop.permute.xlu1 %2297 }
 0x495   : > { %3334 = vmatprep.mubr.msk.bf16.mxu0 %vm496_vm0, %v2284_v14  ;;  %v2319_v63 = vsel %vm496_vm0, %v2298_v31, 0  ;;  %v4470_v24 = vpop.f32.mrf.mxu1 }
 0x497   : > { %v4473_v4 = vpop.f32.mrf.mxu1 }
 0x498   : > { %v2296_v1 = vpop.permute.xlu1 %2295  ;;  %v2288_v2 = vpop.permute.xlu0 %2287 }
 0x499   : > { %v2316_v3 = vsel %vm496_vm0, %v2296_v1, 0  ;;  %v4478_v32 = vpop.f32.mrf.mxu1 }
 0x49a   : > { %3329 = vmatpush3.bf16.xpose.msra.mxu0 %v2322_v52 }
 0x49b   : > { %1296 = vadd.xlane.f32.xlu1 %v1295_v61  ;;  %3384 = vmatprep.subr.msk.bf16.mxu0 %vm496_vm0, %v2298_v31  ;;  %v4481_v40 = vpop.f32.mrf.mxu1 }
 0x49c   : > { %v2286_v50 = vpop.permute.xlu1 %2285 }
 0x49d   : > { %v4484_v37 = vpop.f32.mrf.mxu1 }
 0x49f   : > { %1290 = vadd.xlane.f32.xlu1 %v1289_v7  ;;  %v4489_v22 = vpop.f32.mrf.mxu1 }
 0x4a0   : > { %v2290_v23 = vpop.permute.xlu1 %2289 }
 0x4a2   : > { %3331 = vmatpush3.bf16.xpose.msra.mxu0 %v2319_v63  ;;  %v3264_v16 = vpop.f32.mrf.mxu1 }
 0x4a3   : > { %3385 = vmatprep.subr.msk.bf16.mxu0 %vm496_vm0, %v2296_v1 }
 0x4a4   : > { %v1396_v52 = vpop.f32.mrf.mxu1 }
 0x4aa   : > { %3333 = vmatpush3.bf16.xpose.msra.mxu0 %v2316_v3 }
 0x4b0   : > { %1925 = vrot.lane.b32.xlu1 %v3442_v36, %s3686_s18  ;;  %v3265_v36 = vpop.f32.mrf.mxu1 }
 0x4b1   : > { %3335 = vmatmul.mubr.msk.bf16.vlgmr.msra.gmra.mxu0 %vm496_vm0, %v2286_v50 }
 0x4b2   : > { %3338 = vmatprep.mubr.msk.bf16.mxu0 %vm496_vm0, %v2288_v2 }
 0x4b9   : > { %3339 = vmatmul.mubr.msk.bf16.gmra.mxu0 %vm496_vm0, %v2290_v23 }
 0x4ce   : > { %v1821_v30 = vpop.xlane.xlu0 %1820 }
 0x4cf   : > { %v1839_v18 = vsub.f32 %v4370_v35, %v1821_v30 }
 0x4d1   : > { %v1849_v10 = vmul.f32 1.442695, %v1839_v18 }
 0x4d2   : > { %v1815_v42 = vpop.xlane.xlu0 %1814 }
 0x4d3   : > { %v1837_v25 = vsub.f32 %v4377_v38, %v1815_v42  ;;  %3565 = vpow2.f32 %v1849_v10 }
 0x4d5   : > { %v1845_v54 = vmul.f32 1.442695, %v1837_v25 }
 0x4d6   : > { %v1833_v11 = vpop.xlane.xlu0 %1832 }
 0x4d7   : > { %v1843_v43 = vsub.f32 %v4384_v46, %v1833_v11  ;;  %v1399_v11 = vpop.f32.mrf.mxu1 }
 0x4d9   : > { %v1857_v38 = vmul.f32 1.442695, %v1843_v43 }
 0x4da   : > { %v1827_v19 = vpop.xlane.xlu0 %1826 }
 0x4db   : > { %v1824_v48 = vpop.xlane.xlu1 %1823  ;;  %v1841_v0 = vsub.f32 %v4391_v45, %v1827_v19 }
 0x4dc   : > { %v1840_v39 = vsub.f32 %v4396_v12, %v1824_v48 }
 0x4dd   : > { %v1853_v33 = vmul.f32 1.442695, %v1841_v0 }
 0x4de   : > { %v1851_v26 = vmul.f32 1.442695, %v1840_v39  ;;  %v1282_v44 = vpop.xlane.xlu0 %1281 }
 0x4df   : > { %v1818_v35 = vpop.xlane.xlu1 %1817 }
 0x4e0   : > { %3567 = vpow2.f32 %v1851_v26  ;;  %v1838_v55 = vsub.f32 %v4405_v13, %v1818_v35  ;;  %v4487_v17 = vpop.eup %3565  ;;  %v3268_v35 = vpop.f32.mrf.mxu1 }
 0x4e1   : > { %3569 = vpow2.f32 %v1845_v54  ;;  %v1867_v34 = vsel %vm646_vm2, %v4487_v17, 0.0 }
 0x4e2   : > { %v1847_v57 = vmul.f32 1.442695, %v1838_v55  ;;  %v1276_v41 = vpop.xlane.xlu0 %1275 }
 0x4e3   : > { %v1836_v12 = vpop.xlane.xlu1 %1835 }
 0x4e4   : > { %3571 = vpow2.f32 %v1847_v57  ;;  %v1844_v46 = vsub.f32 %v4414_v28, %v1836_v12 }
 0x4e5   : > { %3573 = vpow2.f32 %v1857_v38  ;;  %v1412_v38 = vpop.f32.mrf.mxu1 }
 0x4e6   : > { %v1859_v29 = vmul.f32 1.442695, %v1844_v46  ;;  %v1285_v45 = vpop.xlane.xlu0 %1284  ;;  %3575 = vpow2.f32 %v1853_v33 }
 0x4e7   : > { %v1830_v15 = vpop.xlane.xlu1 %1829  ;;  %v3269_v57 = vpop.f32.mrf.mxu1 }
 0x4e8   : > { %3577 = vpow2.f32 %v1859_v29  ;;  %v1842_v13 = vsub.f32 %v4423_v47, %v1830_v15 }
 0x4e9   : > { %3579 = vrcp.f32 %v1282_v44  ;;  %v1415_v29 = vpop.f32.mrf.mxu1 }
 0x4ea   : > { %3581 = vrcp.f32 %v1285_v45  ;;  %v1855_v60 = vmul.f32 1.442695, %v1842_v13  ;;  %v1294_v59 = vpop.xlane.xlu0 %1293 }
 0x4eb   : > { %3583 = vrcp.f32 %v1276_v41  ;;  %v1279_v58 = vpop.xlane.xlu1 %1278 }
 0x4ec   : > { %3585 = vpow2.f32 %v1855_v60 }
 0x4ed   : > { %v4491_v28 = vpop.eup %3567  ;;  %3587 = vrcp.f32 %v1279_v58 }
 0x4ee   : > { %v1902_v62 = vpack.c.bf16 %v4491_v28, %v4487_v17  ;;  %v1288_v56 = vpop.xlane.xlu0 %1287  ;;  %v4495_v47 = vpop.eup %3569  ;;  %v1870_v27 = vsel %vm646_vm2, %v4491_v28, 0.0  ;;  %v3449_v28 = vld [vmem:[%s4752_s2 + $0x28] sm:$0xff]  }
 0x4ef   : > { %v1930_v26 = vpop.permute.xlu1 %1929  ;;  %v1861_v53 = vsel %vm646_vm2, %v4495_v47, 0.0 }
 0x4f1   : > { %v4497_v14 = vpop.eup %3571 }
 0x4f2   : > { %v1932_v31 = vpop.permute.xlu0 %1931  ;;  %v1901_v61 = vpack.c.bf16 %v4497_v14, %v4495_v47  ;;  %v4501_v7 = vpop.eup %3573  ;;  %v3446_v47 = vld [vmem:[%s3770_s13 + $0x14] ss:$8 sps:$4 sm:$0xff]  }
 0x4f3   : > { %3298 = vmatprep.subr.bf16.mxu1 %v1932_v31  ;;  %v4503_v63 = vpop.eup %3575  ;;  %v1928_v44 = vpop.permute.xlu1 %1927 }
 0x4f4   : > { %v1873_v17 = vsel %vm646_vm2, %v4503_v63, 0.0 }
 0x4f5   : > { %v4505_v1 = vpop.eup %3577 }
 0x4f6   : > { %v3580_v3 = vpop.eup %3579  ;;  %v1904_v50 = vpack.c.bf16 %v4505_v1, %v4501_v7 }
 0x4f7   : > { %v3582_v2 = vpop.eup %3581  ;;  %v1429_v48 = vmul.f32 %v3580_v3, %v3264_v16 }
 0x4f8   : > { %v3584_v23 = vpop.eup %3583  ;;  %v1430_v18 = vmul.f32 %v3582_v2, %v3265_v36 }
 0x4f9   : > { %v4509_v30 = vpop.eup %3585  ;;  %v1427_v10 = vmul.f32 %v3584_v23, %v1396_v52 }
 0x4fa   : > { %v3588_v42 = vpop.eup %3587  ;;  %v1903_v19 = vpack.c.bf16 %v4509_v30, %v4503_v63  ;;  %v1444_v43 = vpack.c.bf16 %v1430_v18, %v1429_v48  ;;  %v3088_v63 = vld [vmem:[%s4607_s17 + $0x8] sm:$0xff]  }
 0x4fb   : > { %v1428_v25 = vmul.f32 %v3588_v42, %v1399_v11 }
 0x4fd   : > { %v1443_v39 = vpack.c.bf16 %v1428_v25, %v1427_v10 }
 0x4ff   : > { %3274 = vmatprep.mubr.msk.bf16.mxu1 %vm496_vm0, %v1443_v39  ;;  %v1864_v39 = vsel %vm646_vm2, %v4497_v14, 0.0  ;;  %v3445_v14 = vld [vmem:[%s3770_s13 + $0x24] ss:$8 sps:$4 sm:$0xff]  }
 0x500   : > { %3275 = vmatmul.mubr.msk.bf16.vlgmr.msra.gmra.mxu1 %vm496_vm0, %v1444_v43  ;;  %v1879_v43 = vsel %vm646_vm2, %v4501_v7, 0.0  ;;  %v3450_v7 = vld [vmem:[%s4752_s2 + $0x20] sm:$0xff]  }
 0x501   : > { %3299 = vmatpush3.bf16.msra.mxu1 %v1932_v31 }
 0x502   : > { %3300 = vmatprep.subr.bf16.mxu1 %v1930_v26 }
 0x505   : > { %3301 = vmatpush3.bf16.msra.mxu1 %v1930_v26  ;;  %v3447_v26 = vld [vmem:[%s3770_s13 + $0x34] ss:$8 sps:$4 sm:$0xff]  }
 0x506   : > { %3302 = vmatprep.subr.bf16.mxu1 %v1928_v44 }
 0x509   : > { %3303 = vmatpush3.bf16.msra.mxu1 %v1928_v44  ;;  %v2989_v44 = vld [vmem:[%s4607_s17] sm:$0xff]  }
 0x524   : > { %v1297_v54 = vpop.xlane.xlu1 %1296 }
 0x525   : > { %3589 = vrcp.f32 %v1297_v54  ;;  %v2994_v54 = vunpack.c.l.bf16 %v3088_v63 }
 0x526   : > { %3591 = vrcp.f32 %v1288_v56 }
 0x527   : > { %3593 = vrcp.f32 %v1294_v59 }
 0x528   : > { %v1291_v0 = vpop.xlane.xlu1 %1290 }
 0x529   : > { %3595 = vrcp.f32 %v1291_v0  ;;  %v2894_v0 = vld [vmem:[%s4753_s3] ss:$0 sm:$0xff] }
 0x52c   : > { %v1926_v55 = vpop.permute.xlu1 %1925 }
 0x52d   : > { %3304 = vmatprep.subr.bf16.mxu1 %v1926_v55 }
 0x52e   : > { %3305 = vmatpush3.bf16.msra.mxu1 %v1926_v55  ;;  %v401_v55 = vadd.f32 %v2994_v54, %v2894_v0 }
 0x52f   : > { %3314 = vmatprep.subr.bf16.mxu1 %v3449_v28 }
 0x532   : > { %v3590_v41 = vpop.eup %3589 }
 0x533   : > { %v3592_v33 = vpop.eup %3591  ;;  %v1434_v45 = vmul.f32 %v3590_v41, %v3269_v57  ;;  %v2991_v41 = vunpack.c.h.bf16 %v2989_v44 }
 0x534   : > { %v3594_v12 = vpop.eup %3593  ;;  %v1431_v15 = vmul.f32 %v3592_v33, %v1412_v38  ;;  %v2995_v38 = vunpack.c.h.bf16 %v3088_v63  ;;  %v955_v33 = vadd.f32 %v4465_v49, %v401_v55 }
 0x535   : > { %v1433_v60 = vmul.f32 %v3594_v12, %v3268_v35  ;;  %v2990_v35 = vunpack.c.l.bf16 %v2989_v44 }
 0x536   : > { %v3596_v46 = vpop.eup %3595  ;;  %v402_v12 = vadd.f32 %v2995_v38, %v2894_v0 }
 0x537   : > { %v1432_v13 = vmul.f32 %v3596_v46, %v1415_v29  ;;  %v1446_v16 = vpack.c.bf16 %v1434_v45, %v1433_v60  ;;  %v399_v57 = vadd.f32 %v2990_v35, %v2894_v0  ;;  %v400_v45 = vadd.f32 %v2991_v41, %v2894_v0 }
 0x538   : > { %v1882_v60 = vsel %vm646_vm2, %v4505_v1, 0.0  ;;  %v3090_v1 = vld [vmem:[%s4607_s17 + $0x18] sm:$0xff]  }
 0x539   : > { %v1445_v58 = vpack.c.bf16 %v1432_v13, %v1431_v15  ;;  %v953_v29 = vadd.f32 %v4467_v9, %v399_v57 }
 0x53b   : > { %3278 = vmatprep.mubr.msk.bf16.mxu1 %vm496_vm0, %v1445_v58  ;;  %v956_v58 = vadd.f32 %v4470_v24, %v402_v12  ;;  %v3089_v24 = vld [vmem:[%s4607_s17 + $0x10] sm:$0xff]  }
 0x53c   : > { %3279 = vmatmul.mubr.msk.bf16.gmra.mxu1 %vm496_vm0, %v1446_v16 }
 0x53d   : > { %3306 = vmatprep.mubr.msk.bf16.mxu1 %vm646_vm2, %v1901_v61 }
 0x544   : > { %3307 = vmatmul.mubr.msk.bf16.vlgmr.msra.gmra.mxu1 %vm646_vm2, %v1902_v62 }
 0x545   : > { %3310 = vmatprep.mubr.msk.bf16.mxu1 %vm646_vm2, %v1903_v19  ;;  %3315 = vmatpush3.bf16.msra.mxu1 %v3449_v28 }
 0x546   : > { %3316 = vmatprep.subr.bf16.mxu1 %v3450_v7 }
 0x549   : > { %3317 = vmatpush3.bf16.msra.mxu1 %v3450_v7 }
 0x54c   : > { %3311 = vmatmul.mubr.msk.bf16.gmra.mxu1 %vm646_vm2, %v1904_v50 }
 0x571   : > { %v3336_v59 = vpop.f32.mrf.mxu0 }
 0x572   : > { %v4531_v61 = vsel %vm438_vm1, -50000.0, %v3336_v59  ;;  %v954_v59 = vadd.f32 %v4473_v4, %v400_v45  ;;  %v2999_v4 = vunpack.c.h.bf16 %v3089_v24 }
 0x573   : > { %v2361_v56 = vpop.f32.mrf.mxu0  ;;  %v2406_v5 = vsel %vm646_vm2, %v4531_v61, -inf }
 0x574   : > { %v4524_v52 = vsel %vm436_vm3, -50000.0, %v2361_v56 }
 0x575   : > { %v2400_v31 = vsel %vm646_vm2, %v4524_v52, -inf  ;;  %v3337_v3 = vpop.f32.mrf.mxu0 }
 0x576   : > { %2401 = vmax.xlane.f32.xlu0 %v2400_v31  ;;  %v4545_v51 = vsel %vm439_vm4, -50000.0, %v3337_v3  ;;  %v1876_v31 = vsel %vm646_vm2, %v4509_v30, 0.0 }
 0x577   : > { %v2364_v62 = vpop.f32.mrf.mxu0  ;;  %v2409_v42 = vsel %vm646_vm2, %v4545_v51, -inf }
 0x578   : > { %v4536_v36 = vsel %vm437_vm5, -50000.0, %v2364_v62  ;;  %v3448_v62 = vld [vmem:[%s3770_s13 + $0x4] ss:$8 sps:$4 sm:$0xff]  }
 0x579   : > { %v2403_v50 = vsel %vm646_vm2, %v4536_v36, -inf  ;;  %v3340_v2 = vpop.f32.mrf.mxu0 }
 0x57a   : > { %2407 = vmax.xlane.f32.xlu0 %v2406_v5  ;;  %2404 = vmax.xlane.f32.xlu1 %v2403_v50  ;;  %v4559_v6 = vsel %vm442_vm6, -50000.0, %v3340_v2  ;;  %v3002_v5 = vunpack.c.l.bf16 %v3090_v1  ;;  %v2998_v50 = vunpack.c.l.bf16 %v3089_v24 }
 0x57b   : > { %v2377_v23 = vpop.f32.mrf.mxu0  ;;  %v2418_v10 = vsel %vm646_vm2, %v4559_v6, -inf }
 0x57c   : > { %v4550_v8 = vsel %vm440_vm7, -50000.0, %v2377_v23  ;;  %v405_v2 = vadd.f32 %v3002_v5, %v2894_v0  ;;  %v3003_v23 = vunpack.c.h.bf16 %v3090_v1 }
 0x57d   : > { %v2412_v11 = vsel %vm646_vm2, %v4550_v8, -inf  ;;  %v3341_v18 = vpop.f32.mrf.mxu0 }
 0x57e   : > { %2410 = vmax.xlane.f32.xlu1 %v2409_v42  ;;  %2413 = vmax.xlane.f32.xlu0 %v2412_v11  ;;  %v4573_v20 = vsel %vm443_vm8, -50000.0, %v3341_v18  ;;  %v403_v42 = vadd.f32 %v2998_v50, %v2894_v0  ;;  %v959_v11 = vadd.f32 %v4478_v32, %v405_v2  ;;  %v406_v18 = vadd.f32 %v3003_v23, %v2894_v0 }
 0x57f   : > { %v2380_v19 = vpop.f32.mrf.mxu0  ;;  %v2421_v48 = vsel %vm646_vm2, %v4573_v20, -inf }
 0x580   : > { %v4564_v21 = vsel %vm441_vm9, -50000.0, %v2380_v19  ;;  %v957_v30 = vadd.f32 %v4481_v40, %v403_v42 }
 0x581   : > { %v2415_v25 = vsel %vm646_vm2, %v4564_v21, -inf }
 0x582   : > { %2419 = vmax.xlane.f32.xlu0 %v2418_v10  ;;  %2416 = vmax.xlane.f32.xlu1 %v2415_v25  ;;  %v404_v10 = vadd.f32 %v2999_v4, %v2894_v0 }
 0x586   : > { %2422 = vmax.xlane.f32.xlu1 %v2421_v48  ;;  %1868 = vadd.xlane.f32.xlu0 %v1867_v34  ;;  %v960_v34 = vadd.f32 %v4484_v37, %v406_v18 }
 0x58a   : > { %1865 = vadd.xlane.f32.xlu1 %v1864_v39  ;;  %1862 = vadd.xlane.f32.xlu0 %v1861_v53 }
 0x58e   : > { %1871 = vadd.xlane.f32.xlu0 %v1870_v27 }
 0x592   : > { %1880 = vadd.xlane.f32.xlu0 %v1879_v43 }
 0x596   : > { %1874 = vadd.xlane.f32.xlu0 %v1873_v17  ;;  %v958_v17 = vadd.f32 %v4489_v22, %v404_v10 }
 0x59b   : > { %2516 = vrot.lane.b32.xlu1 %v3445_v14, %s3687_s20 }
 0x59f   : > { %2514 = vrot.lane.b32.xlu1 %v3446_v47, %s3687_s20 }
 0x5ac   : > { %2518 = vrot.lane.b32.xlu0 %v3447_v26, %s3687_s20 }
 0x5c0   : > { %v3276_v46 = vpop.f32.mrf.mxu1 }
 0x5c1   : > { %v4616_v15 = vadd.f32 %v3276_v46, %v955_v33 }
 0x5c2   : > { %v1509_v13 = vpop.f32.mrf.mxu1 }
 0x5c3   : > { %v4621_v16 = vadd.f32 %v1509_v13, %v953_v29  ;;  %1883 = vadd.xlane.f32.xlu1 %v1882_v60 }
 0x5c4   : > { %v3277_v49 = vpop.f32.mrf.mxu1 }
 0x5c5   : > { %v4624_v56 = vadd.f32 %v3277_v49, %v956_v58 }
 0x5c6   : > { %v1512_v9 = vpop.f32.mrf.mxu1 }
 0x5c7   : > { %v4628_v3 = vadd.f32 %v1512_v9, %v954_v59  ;;  %1877 = vadd.xlane.f32.xlu1 %v1876_v31 }
 0x5d8   : > { %2512 = vrot.lane.b32.xlu1 %v3448_v62, %s3687_s20 }
 0x5fc   : > { %v3280_v19 = vpop.f32.mrf.mxu1 }
 0x5fd   : > { %v4636_v25 = vadd.f32 %v3280_v19, %v959_v11 }
 0x5fe   : > { %v1525_v48 = vpop.f32.mrf.mxu1 }
 0x5ff   : > { %v4639_v39 = vadd.f32 %v1525_v48, %v957_v30  ;;  %v2402_v53 = vpop.xlane.xlu0 %2401 }
 0x600   : > { %v2424_v27 = vsub.f32 %v4524_v52, %v2402_v53  ;;  %v3281_v43 = vpop.f32.mrf.mxu1 }
 0x601   : > { %v4643_v14 = vadd.f32 %v3281_v43, %v960_v34 }
 0x602   : > { %v2432_v32 = vmul.f32 1.442695, %v2424_v27  ;;  %v1528_v47 = vpop.f32.mrf.mxu1 }
 0x603   : > { %v4645_v28 = vadd.f32 %v1528_v47, %v958_v17  ;;  %v2405_v40 = vpop.xlane.xlu1 %2404  ;;  %v2408_v7 = vpop.xlane.xlu0 %2407 }
 0x604   : > { %3597 = vpow2.f32 %v2432_v32  ;;  %v2425_v26 = vsub.f32 %v4536_v36, %v2405_v40  ;;  %v2426_v37 = vsub.f32 %v4531_v61, %v2408_v7  ;;  %v3308_v58 = vpop.f32.mrf.mxu1 }
 0x606   : > { %v2434_v63 = vmul.f32 1.442695, %v2425_v26  ;;  %v2436_v44 = vmul.f32 1.442695, %v2426_v37  ;;  %v1983_v62 = vpop.f32.mrf.mxu1 }
 0x607   : > { %v2411_v54 = vpop.xlane.xlu1 %2410  ;;  %v2414_v52 = vpop.xlane.xlu0 %2413 }
 0x608   : > { %3599 = vpow2.f32 %v2434_v63  ;;  %v2427_v22 = vsub.f32 %v4545_v51, %v2411_v54  ;;  %v2428_v0 = vsub.f32 %v4550_v8, %v2414_v52  ;;  %v3309_v23 = vpop.f32.mrf.mxu1 }
 0x609   : > { %3601 = vpow2.f32 %v2436_v44 }
 0x60a   : > { %v2438_v35 = vmul.f32 1.442695, %v2427_v22  ;;  %v2440_v55 = vmul.f32 1.442695, %v2428_v0  ;;  %v1986_v34 = vpop.f32.mrf.mxu1 }
 0x60b   : > { %v2417_v38 = vpop.xlane.xlu1 %2416  ;;  %v2420_v57 = vpop.xlane.xlu0 %2419 }
 0x60c   : > { %3603 = vpow2.f32 %v2438_v35  ;;  %v2429_v41 = vsub.f32 %v4564_v21, %v2417_v38  ;;  %v2430_v36 = vsub.f32 %v4559_v6, %v2420_v57  ;;  %v3312_v35 = vpop.f32.mrf.mxu1 }
 0x60d   : > { %3605 = vpow2.f32 %v2440_v55 }
 0x60e   : > { %v2442_v61 = vmul.f32 1.442695, %v2429_v41  ;;  %v2444_v33 = vmul.f32 1.442695, %v2430_v36  ;;  %v1999_v38 = vpop.f32.mrf.mxu1 }
 0x60f   : > { %v2423_v12 = vpop.xlane.xlu1 %2422  ;;  %v1869_v46 = vpop.xlane.xlu0 %1868 }
 0x610   : > { %3607 = vpow2.f32 %v2442_v61  ;;  %v2431_v51 = vsub.f32 %v4573_v20, %v2423_v12  ;;  %v3313_v57 = vpop.f32.mrf.mxu1 }
 0x611   : > { %v4654_v29 = vpop.eup %3597  ;;  %3609 = vpow2.f32 %v2444_v33 }
 0x612   : > { %v2446_v8 = vmul.f32 1.442695, %v2431_v51  ;;  %v2448_v45 = vsel %vm646_vm2, %v4654_v29, 0.0  ;;  %3611 = vrcp.f32 %v1869_v46  ;;  %v2002_v12 = vpop.f32.mrf.mxu1 }
 0x613   : > { %v1866_v13 = vpop.xlane.xlu1 %1865  ;;  %2449 = vadd.xlane.f32.xlu0 %v2448_v45  ;;  %v1863_v21 = vpop.xlane.xlu0 %1862 }
 0x614   : > { %3613 = vpow2.f32 %v2446_v8 }
 0x615   : > { %v4658_v6 = vpop.eup %3599  ;;  %3615 = vrcp.f32 %v1866_v13 }
 0x616   : > { %v4660_v60 = vpop.eup %3601  ;;  %3617 = vrcp.f32 %v1863_v21  ;;  %v2451_v20 = vsel %vm646_vm2, %v4658_v6, 0.0  ;;  %v2488_v49 = vpack.c.bf16 %v4658_v6, %v4654_v29  ;;  %v3452_v29 = vld [vmem:[%s4752_s2 + $0x30] sm:$0xff]  }
 0x617   : > { %2452 = vadd.xlane.f32.xlu1 %v2451_v20  ;;  %v2454_v59 = vsel %vm646_vm2, %v4660_v60, 0.0  ;;  %v1872_v9 = vpop.xlane.xlu0 %1871  ;;  %v2517_v54 = vpop.permute.xlu1 %2516 }
 0x618   : > { %2455 = vadd.xlane.f32.xlu0 %v2454_v59  ;;  %3619 = vrcp.f32 %v1872_v9 }
 0x619   : > { %v4668_v31 = vpop.eup %3603 }
 0x61a   : > { %v2489_v1 = vpack.c.bf16 %v4668_v31, %v4660_v60  ;;  %v2457_v24 = vsel %vm646_vm2, %v4668_v31, 0.0  ;;  %v4674_v50 = vpop.eup %3605 }
 0x61b   : > { %v1881_v5 = vpop.xlane.xlu0 %1880  ;;  %v2460_v18 = vsel %vm646_vm2, %v4674_v50, 0.0  ;;  %v2515_v52 = vpop.permute.xlu1 %2514 }
 0x61c   : > { %2458 = vadd.xlane.f32.xlu0 %v2457_v24 }
 0x61d   : > { %v4676_v2 = vpop.eup %3607 }
 0x61e   : > { %v2463_v42 = vsel %vm646_vm2, %v4676_v2, 0.0  ;;  %v2490_v4 = vpack.c.bf16 %v4676_v2, %v4674_v50  ;;  %v3610_v11 = vpop.eup %3609 }
 0x61f   : > { %2464 = vadd.xlane.f32.xlu1 %v2463_v42  ;;  %v1875_v19 = vpop.xlane.xlu0 %1874  ;;  %v3612_v30 = vpop.eup %3611  ;;  %v2466_v17 = vsel %vm646_vm2, %v3610_v11, 0.0 }
 0x620   : > { %2461 = vadd.xlane.f32.xlu0 %v2460_v18  ;;  %v2016_v26 = vmul.f32 %v3612_v30, %v3308_v58  ;;  %v3451_v58 = vld [vmem:[%s4752_s2 + $0x38] sm:$0xff]  }
 0x621   : > { %v3614_v10 = vpop.eup %3613 }
 0x622   : > { %v3616_v48 = vpop.eup %3615  ;;  %v2469_v53 = vsel %vm646_vm2, %v3614_v10, 0.0  ;;  %v2491_v27 = vpack.c.bf16 %v3614_v10, %v3610_v11 }
 0x623   : > { %v3618_v43 = vpop.eup %3617  ;;  %2470 = vadd.xlane.f32.xlu1 %v2469_v53  ;;  %v2015_v32 = vmul.f32 %v3616_v48, %v1986_v34  ;;  %v2519_v47 = vpop.permute.xlu0 %2518 }
 0x624   : > { %2467 = vadd.xlane.f32.xlu0 %v2466_v17  ;;  %v2014_v40 = vmul.f32 %v3618_v43, %v1983_v62  ;;  %3342 = vmatprep.subr.bf16.mxu1 %v2519_v47 }
 0x625   : > { %v3620_v7 = vpop.eup %3619 }
 0x626   : > { %v2017_v37 = vmul.f32 %v3620_v7, %v3309_v23  ;;  %v2030_v63 = vpack.c.bf16 %v2015_v32, %v2014_v40 }
 0x628   : > { %v2031_v44 = vpack.c.bf16 %v2017_v37, %v2016_v26  ;;  %3318 = vmatprep.mubr.msk.bf16.mxu1 %vm496_vm0, %v2030_v63 }
 0x62a   : > { %3319 = vmatmul.mubr.msk.bf16.vlgmr.msra.gmra.mxu1 %vm496_vm0, %v2031_v44 }
 0x62b   : > { %3343 = vmatpush3.bf16.msra.mxu1 %v2519_v47 }
 0x62c   : > { %3344 = vmatprep.subr.bf16.mxu1 %v2517_v54 }
 0x62f   : > { %3345 = vmatpush3.bf16.msra.mxu1 %v2517_v54 }
 0x630   : > { %3346 = vmatprep.subr.bf16.mxu1 %v2515_v52 }
 0x633   : > { %3347 = vmatpush3.bf16.msra.mxu1 %v2515_v52 }
 0x64c   : > { %v1884_v22 = vpop.xlane.xlu1 %1883 }
 0x64d   : > { %3621 = vrcp.f32 %v1884_v22 }
 0x64e   : > { %3623 = vrcp.f32 %v1875_v19 }
 0x64f   : > { %3625 = vrcp.f32 %v1881_v5 }
 0x650   : > { %v1878_v0 = vpop.xlane.xlu1 %1877 }
 0x651   : > { %3627 = vrcp.f32 %v1878_v0 }
 0x654   : > { %v2513_v55 = vpop.permute.xlu1 %2512 }
 0x655   : > { %3348 = vmatprep.subr.bf16.mxu1 %v2513_v55 }
 0x656   : > { %3349 = vmatpush3.bf16.msra.mxu1 %v2513_v55 }
 0x657   : > { %3358 = vmatprep.subr.bf16.mxu1 %v3451_v58 }
 0x65a   : > { %v3622_v41 = vpop.eup %3621 }
 0x65b   : > { %v3624_v36 = vpop.eup %3623  ;;  %v2021_v46 = vmul.f32 %v3622_v41, %v3313_v57 }
 0x65c   : > { %v3626_v61 = vpop.eup %3625  ;;  %v2018_v51 = vmul.f32 %v3624_v36, %v1999_v38 }
 0x65d   : > { %v2020_v45 = vmul.f32 %v3626_v61, %v3312_v35 }
 0x65e   : > { %v3628_v33 = vpop.eup %3627 }
 0x65f   : > { %v2019_v8 = vmul.f32 %v3628_v33, %v2002_v12  ;;  %v2033_v21 = vpack.c.bf16 %v2021_v46, %v2020_v45 }
 0x661   : > { %v2032_v13 = vpack.c.bf16 %v2019_v8, %v2018_v51 }
 0x663   : > { %3322 = vmatprep.mubr.msk.bf16.mxu1 %vm496_vm0, %v2032_v13 }
 0x664   : > { %3323 = vmatmul.mubr.msk.bf16.gmra.mxu1 %vm496_vm0, %v2033_v21 }
 0x665   : > { %3350 = vmatprep.mubr.msk.bf16.mxu1 %vm646_vm2, %v2488_v49 }
 0x66c   : > { %3351 = vmatmul.mubr.msk.bf16.vlgmr.msra.gmra.mxu1 %vm646_vm2, %v2489_v1 }
 0x66d   : > { %3354 = vmatprep.mubr.msk.bf16.mxu1 %vm646_vm2, %v2490_v4  ;;  %3359 = vmatpush3.bf16.msra.mxu1 %v3451_v58 }
 0x66e   : > { %3360 = vmatprep.subr.bf16.mxu1 %v3452_v29 }
 0x671   : > { %3361 = vmatpush3.bf16.msra.mxu1 %v3452_v29 }
 0x674   : > { %3355 = vmatmul.mubr.msk.bf16.gmra.mxu1 %vm646_vm2, %v2491_v27 }
 0x69c   : > { %v2450_v1 = vpop.xlane.xlu0 %2449 }
 0x69d   : > { %3629 = vrcp.f32 %v2450_v1 }
 0x6a0   : > { %v2453_v5 = vpop.xlane.xlu1 %2452 }
 0x6a1   : > { %v2456_v24 = vpop.xlane.xlu0 %2455 }
 0x6a5   : > { %v2459_v50 = vpop.xlane.xlu0 %2458 }
 0x6a6   : > { %3631 = vrcp.f32 %v2459_v50 }
 0x6a7   : > { %3633 = vrcp.f32 %v2453_v5 }
 0x6a8   : > { %v2465_v2 = vpop.xlane.xlu1 %2464  ;;  %3635 = vrcp.f32 %v2456_v24 }
 0x6a9   : > { %v2462_v23 = vpop.xlane.xlu0 %2461  ;;  %3637 = vrcp.f32 %v2465_v2 }
 0x6aa   : > { %v3630_v34 = vpop.eup %3629 }
 0x6ac   : > { %v2471_v11 = vpop.xlane.xlu1 %2470 }
 0x6ad   : > { %v2468_v19 = vpop.xlane.xlu0 %2467  ;;  %3639 = vrcp.f32 %v2471_v11 }
 0x6ae   : > { %3641 = vrcp.f32 %v2462_v23 }
 0x6af   : > { %3643 = vrcp.f32 %v2468_v19 }
 0x6b3   : > { %v3632_v53 = vpop.eup %3631 }
 0x6b4   : > { %v3634_v27 = vpop.eup %3633 }
 0x6b5   : > { %v3636_v17 = vpop.eup %3635 }
 0x6ea   : > { %v3320_v6 = vpop.f32.mrf.mxu1 }
 0x6eb   : > { %v4707_v60 = vadd.f32 %v3320_v6, %v4616_v15 }
 0x6ec   : > { %v2096_v20 = vpop.f32.mrf.mxu1 }
 0x6ed   : > { %v4710_v49 = vadd.f32 %v2096_v20, %v4621_v16 }
 0x6ee   : > { %v3321_v59 = vpop.f32.mrf.mxu1 }
 0x6ef   : > { %v4713_v9 = vadd.f32 %v3321_v59, %v4624_v56 }
 0x6f0   : > { %v2099_v31 = vpop.f32.mrf.mxu1 }
 0x6f1   : > { %v4716_v62 = vadd.f32 %v2099_v31, %v4628_v3 }
 0x724   : > { %v3324_v15 = vpop.f32.mrf.mxu1 }
 0x725   : > { %v2133_v16 = vadd.f32 %v3324_v15, %v4636_v25 }
 0x726   : > { %v2112_v42 = vpop.f32.mrf.mxu1 }
 0x727   : > { %v2131_v56 = vadd.f32 %v2112_v42, %v4639_v39 }
 0x728   : > { %v3325_v4 = vpop.f32.mrf.mxu1 }
 0x729   : > { %v2134_v3 = vadd.f32 %v3325_v4, %v4643_v14 }
 0x72a   : > { %v2115_v18 = vpop.f32.mrf.mxu1 }
 0x72b   : > { %v2132_v30 = vadd.f32 %v2115_v18, %v4645_v28  ;;  %v3638_v28 = vpop.eup %3637 }
 0x72c   : > { %v3352_v10 = vpop.f32.mrf.mxu1  ;;  %v3640_v44 = vpop.eup %3639 }
 0x72d   : > { %v2603_v14 = vmul.f32 %v3636_v17, %v3352_v10  ;;  %v3642_v54 = vpop.eup %3641 }
 0x72e   : > { %v2570_v48 = vpop.f32.mrf.mxu1  ;;  %v3644_v0 = vpop.eup %3643 }
 0x72f   : > { %v2601_v32 = vmul.f32 %v3630_v34, %v2570_v48 }
 0x730   : > { %v3353_v25 = vpop.f32.mrf.mxu1 }
 0x731   : > { %v2604_v43 = vmul.f32 %v3632_v53, %v3353_v25 }
 0x732   : > { %v2573_v39 = vpop.f32.mrf.mxu1 }
 0x733   : > { %v2602_v47 = vmul.f32 %v3634_v27, %v2573_v39  ;;  %v2618_v26 = vpack.c.bf16 %v2604_v43, %v2603_v14 }
 0x734   : > { %v3356_v40 = vpop.f32.mrf.mxu1 }
 0x735   : > { %v2617_v7 = vpack.c.bf16 %v2602_v47, %v2601_v32  ;;  %v2607_v38 = vmul.f32 %v3644_v0, %v3356_v40 }
 0x736   : > { %v2586_v37 = vpop.f32.mrf.mxu1 }
 0x737   : > { %3362 = vmatprep.mubr.msk.bf16.mxu1 %vm496_vm0, %v2617_v7  ;;  %v2605_v35 = vmul.f32 %v3642_v54, %v2586_v37 }
 0x738   : > { %v3357_v63 = vpop.f32.mrf.mxu1  ;;  %3363 = vmatmul.mubr.msk.bf16.vlgmr.msra.gmra.mxu1 %vm496_vm0, %v2618_v26 }
 0x739   : > { %v2608_v52 = vmul.f32 %v3640_v44, %v3357_v63 }
 0x73a   : > { %v2589_v22 = vpop.f32.mrf.mxu1 }
 0x73b   : > { %v2606_v55 = vmul.f32 %v3638_v28, %v2589_v22  ;;  %v2620_v41 = vpack.c.bf16 %v2608_v52, %v2607_v38 }
 0x73d   : > { %v2619_v57 = vpack.c.bf16 %v2606_v55, %v2605_v35 }
 0x73f   : > { %3366 = vmatprep.mubr.msk.bf16.mxu1 %vm496_vm0, %v2619_v57 }
 0x740   : > { %3367 = vmatmul.mubr.msk.bf16.gmra.mxu1 %vm496_vm0, %v2620_v41 }
 0x7f8   : > { %v3364_v36 = vpop.f32.mrf.mxu1 }
 0x7f9   : > { %v2716_v12 = vadd.f32 %v3364_v36, %v4707_v60 }
 0x7fa   : > { %v2683_v61 = vpop.f32.mrf.mxu1 }
 0x7fb   : > { %v2714_v8 = vadd.f32 %v2683_v61, %v4710_v49 }
 0x7fc   : > { %v3365_v33 = vpop.f32.mrf.mxu1 }
 0x7fd   : > { %v2717_v46 = vadd.f32 %v3365_v33, %v4713_v9 }
 0x7fe   : > { %v2686_v51 = vpop.f32.mrf.mxu1 }
 0x7ff   : > { %v3076_v45 = vpack.c.bf16 %v2717_v46, %v2716_v12  ;;  %v2715_v13 = vadd.f32 %v2686_v51, %v4716_v62 }
 0x800   : > { %v3368_v21 = vpop.f32.mrf.mxu1 }
 0x801   : > { %3103 = vst [vmem:[%s372_s30 + $0x8] sm:$0xff] %v3076_v45   ;;  %v3071_v58 = vpack.c.bf16 %v2715_v13, %v2714_v8  ;;  %v2720_v60 = vadd.f32 %v3368_v21, %v2133_v16 }
 0x802   : > { %v2699_v29 = vpop.f32.mrf.mxu1 }
 0x803   : > { %3072 = vst [vmem:[%s372_s30] sm:$0xff] %v3071_v58   ;;  %v2718_v9 = vadd.f32 %v2699_v29, %v2131_v56 }
 0x804   : > { %v3369_v6 = vpop.f32.mrf.mxu1 }
 0x805   : > { %v2721_v20 = vadd.f32 %v3369_v6, %v2134_v3 }
 0x806   : > { %v2702_v59 = vpop.f32.mrf.mxu1 }
 0x807   : > { %v3086_v31 = vpack.c.bf16 %v2721_v20, %v2720_v60  ;;  %v2719_v1 = vadd.f32 %v2702_v59, %v2132_v30 }
 0x809   : > { %3105 = vst [vmem:[%s372_s30 + $0x18] sm:$0xff] %v3086_v31   ;;  %v3081_v24 = vpack.c.bf16 %v2719_v1, %v2718_v9 }
 0x80b   : > { %3104 = vst [vmem:[%s372_s30 + $0x10] sm:$0xff] %v3081_v24  }
 0x80c PF: > { %s15_s22 = sadd.s32 1, %s3683_s22   ;;  %s4756_s18 = smov %s3671_s19 }
 0x80d   : > { %p12_p10 = scmp.ge.s32.totalorder %s15_s22, 4   ;;  %s4757_s19 = smov %s3753_s26 }
 0x80e   : > { %s4758_s20 = smov %s3679_s21  ;;  %s4759_s21 = smov %s4761_s23 }
 0x80f   :  { %14 = sbr.rel (!%p12_p10) target bundleno = 3 (0x3), region = 122 }

</bundles_post_ra>
